<compile_context>
chip_gen: v5e
topology: v5e:2x2
jax: 0.10.0
libtpu: 0.0.40
codegen_flags: <defaults>
</compile_context>

<pallas_src>
import functools

import jax
import jax.numpy as jnp
from jax.experimental import pallas as pl
from jax.experimental.pallas import tpu as pltpu


# --------------------------------------------------------------------------------------
# Fused kernel: conv (im2col + one MXU matmul per image) -> VMEM-resident intermediate
#               -> finalize (BN fold + 0.3*sigmoid) at the last grid step.
# --------------------------------------------------------------------------------------
def _make_disp_fused_kernel(N, Nb, Hout, Wout, KH, KW, sh, sw, Cin, Cout, eps,
                            single_step):
    HW = Hout * Wout
    inv_count = 1.0 / float(N * HW)

    def kernel(xpad_ref, w_ref, gamma_ref, beta_ref, out_ref, conv_ref):
        # xpad_ref : (Nb, Cin, Hp, Wp)   padded NCHW batch block (f32 or bf16)
        # w_ref    : (Cout, KH*KW*Cin)   weight, K ordered (kh, kw, ci)
        # gamma/beta: (1, Cout, 1)       f32 BN affine params
        # out_ref  : (N, Cout, HW)       final activations (revisited block, written at finalize)
        # conv_ref : (N, Cout, HW) f32   VMEM scratch holding the bias-free conv result
        b = pl.program_id(0)

        # ---- Phase 1: conv for this batch block (one transposed MXU matmul per image) ----
        for j in range(Nb):                                   # static, Nb is small
            pieces = []
            for kh in range(KH):
                for kw in range(KW):
                    if sh == 1 and sw == 1:
                        patch = xpad_ref[j, :, kh:kh + Hout, kw:kw + Wout]   # (Cin, Hout, Wout)
                    else:
                        # TODO(synk): stride>1 path is never exercised by the demo (stride=1);
                        # validate in interpret mode before relying on it.
                        patch = xpad_ref[j, :,
                                         pl.ds(kh, Hout, stride=sh),
                                         pl.ds(kw, Wout, stride=sw)]
                    pieces.append(patch.reshape(Cin, HW))
            im2col_t = jnp.concatenate(pieces, axis=0)        # (KH*KW*Cin, HW), sublane concat

            conv = jnp.dot(w_ref[...], im2col_t,
                           preferred_element_type=jnp.float32)   # (Cout, HW) f32, NCHW-ordered

            # Static store index on the demo path (single grid step); dynamic leading-axis
            # store only when the batch is blocked across grid steps.
            idx = j if single_step else b * Nb + j
            conv_ref[idx] = conv

        # ---- Phase 2 (finalize, last grid step only): BN fold + 0.3*sigmoid ----
        @pl.when(b == pl.num_programs(0) - 1)
        def _():
            c = conv_ref[...]                                  # (N, Cout, HW) f32, VMEM resident
            # Two-pass mean/variance (numerically safer than E[x^2]-E[x]^2).
            s = jnp.sum(jnp.sum(c, axis=2, keepdims=True), axis=0, keepdims=True)
            mean = s * inv_count                               # (1, Cout, 1)
            d = c - mean
            v = jnp.sum(jnp.sum(d * d, axis=2, keepdims=True), axis=0, keepdims=True)
            var = v * inv_count                                # biased batch variance
            scale = gamma_ref[...] * jax.lax.rsqrt(var + eps)  # (1, Cout, 1)
            # Conv bias + BN affine fold into one scale/shift; the bias cancels exactly
            # in train-mode BN, so it never needs to touch the data.
            shift = beta_ref[...] - mean * scale
            out_ref[...] = 0.3 * jax.nn.sigmoid(c * scale + shift)

    return kernel


# --------------------------------------------------------------------------------------
# Wrapper (layout glue only: zero pad + tiny weight reshape; no activation transposes).
# --------------------------------------------------------------------------------------
@functools.partial(jax.jit,
                   static_argnames=("stride", "eps", "matmul_dtype", "batch_block"))
def disp_forward(x_nchw, w_oihw, b, gamma, beta, *, stride=1, eps=1e-5,
                 matmul_dtype=jnp.float32, batch_block=None):
    # `b` (conv bias) is intentionally unused: it cancels exactly under train-mode BN.
    del b
    N, Cin, H, W = x_nchw.shape
    Cout, _, KH, KW = w_oihw.shape
    ph, pw = KH // 2, KW // 2                       # get_padd(kernel_size)
    sh = sw = stride
    Hout = (H + 2 * ph - KH) // sh + 1
    Wout = (W + 2 * pw - KW) // sw + 1
    Hp, Wp = H + 2 * ph, W + 2 * pw
    HW = Hout * Wout

    Nb = N if batch_block is None else batch_block  # images per grid step
    assert N % Nb == 0, "batch_block must divide the batch size"
    nb = N // Nb                                    # number of grid steps

    # Layout glue (no full-tensor activation transposes):
    xpad = jnp.pad(x_nchw, ((0, 0), (0, 0), (ph, ph), (pw, pw))).astype(matmul_dtype)
    # Weight OIHW -> (Cout, KH*KW*Cin) with K ordered (kh, kw, ci) to match im2col_T rows.
    w2d = (jnp.transpose(w_oihw, (0, 2, 3, 1))
           .reshape(Cout, KH * KW * Cin).astype(matmul_dtype))
    gamma3 = gamma.reshape(1, Cout, 1).astype(jnp.float32)
    beta3 = beta.reshape(1, Cout, 1).astype(jnp.float32)

    out_flat = pl.pallas_call(
        _make_disp_fused_kernel(N, Nb, Hout, Wout, KH, KW, sh, sw, Cin, Cout, eps,
                                single_step=(nb == 1)),
        grid=(nb,),
        in_specs=[
            pl.BlockSpec((Nb, Cin, Hp, Wp), lambda bb: (bb, 0, 0, 0)),
            pl.BlockSpec((Cout, KH * KW * Cin), lambda bb: (0, 0)),
            pl.BlockSpec((1, Cout, 1), lambda bb: (0, 0, 0)),
            pl.BlockSpec((1, Cout, 1), lambda bb: (0, 0, 0)),
        ],
        # Full output stays VMEM-resident across the (arbitrary) batch axis; written once.
        out_specs=pl.BlockSpec((N, Cout, HW), lambda bb: (0, 0, 0)),
        out_shape=jax.ShapeDtypeStruct((N, Cout, HW), jnp.float32),
        scratch_shapes=[pltpu.VMEM((N, Cout, HW), jnp.float32)],
        compiler_params=pltpu.CompilerParams(
            dimension_semantics=("arbitrary",),      # revisited output + carried scratch
            vmem_limit_bytes=32 * 1024 * 1024,
        ),
    )(xpad, w2d, gamma3, beta3)

    # (N, Cout, HW) -> (N, Cout, Hout, Wout): trailing-dim split, no transpose.
    return out_flat.reshape(N, Cout, Hout, Wout)


# --------------------------------------------------------------------------------------
# Pure-JAX reference matching PyTorch Disp.forward (train-mode BN).
# --------------------------------------------------------------------------------------
def disp_reference(x_nchw, w_oihw, b, gamma, beta, *, stride=1, eps=1e-5):
    KH = w_oihw.shape[2]
    p = KH // 2
    y = jax.lax.conv_general_dilated(
        x_nchw, w_oihw, (stride, stride), [(p, p), (p, p)],
        dimension_numbers=("NCHW", "OIHW", "NCHW"),
    )
    y = y + b.reshape(1, -1, 1, 1)
    mean = jnp.mean(y, axis=(0, 2, 3), keepdims=True)
    var = jnp.mean((y - mean) ** 2, axis=(0, 2, 3), keepdims=True)
    y = (y - mean) / jnp.sqrt(var + eps)
    y = y * gamma.reshape(1, -1, 1, 1) + beta.reshape(1, -1, 1, 1)
    return 0.3 * jax.nn.sigmoid(y)


if __name__ == "__main__":
    # Disp(in_channels=4, out_channels=8, kernel_size=3, stride=1)
    N, Cin, H, W = 2, 4, 16, 16
    Cout, K, stride = 8, 3, 1

    key = jax.random.PRNGKey(0)
    kx, kw, kb = jax.random.split(key, 3)
    x = jax.random.normal(kx, (N, Cin, H, W), dtype=jnp.float32)
    conv_w = 0.1 * jax.random.normal(kw, (Cout, Cin, K, K), dtype=jnp.float32)
    conv_b = 0.1 * jax.random.normal(kb, (Cout,), dtype=jnp.float32)
    bn_gamma = jnp.ones((Cout,), dtype=jnp.float32)   # PyTorch BatchNorm2d default init
    bn_beta = jnp.zeros((Cout,), dtype=jnp.float32)

    ref = disp_reference(x, conv_w, conv_b, bn_gamma, bn_beta, stride=stride)

    # Default path: whole batch in one grid step, f32 MXU operands (strict check).
    out = jax.block_until_ready(
        disp_forward(x, conv_w, conv_b, bn_gamma, bn_beta, stride=stride))
    assert out.shape == (N, Cout, H, W)
    assert jnp.allclose(out, ref, atol=1e-5, rtol=1e-5), float(jnp.max(jnp.abs(out - ref)))

    # Multi-step fused path: batch blocked across the grid, VMEM-carried intermediate.
    out_blk = jax.block_until_ready(
        disp_forward(x, conv_w, conv_b, bn_gamma, bn_beta, stride=stride, batch_block=1))
    assert jnp.allclose(out_blk, ref, atol=1e-5, rtol=1e-5), float(jnp.max(jnp.abs(out_blk - ref)))

    # bf16 MXU operands (fast path on v5e/v6e/v7x), f32 accumulation + f32 epilogue.
    out_bf16 = jax.block_until_ready(
        disp_forward(x, conv_w, conv_b, bn_gamma, bn_beta, stride=stride,
                     matmul_dtype=jnp.bfloat16))
    assert jnp.allclose(out_bf16, ref, atol=2e-2), float(jnp.max(jnp.abs(out_bf16 - ref)))

    print("KERNEL_OK")
</pallas_src>

<mosaic_0001>
module attributes {stable_mosaic.version = 11 : i64} {
  func.func @kernel(%arg0: i32, %arg1: memref<2x4x18x18xf32, #tpu.memory_space<vmem>>, %arg2: memref<8x36xf32, #tpu.memory_space<vmem>>, %arg3: memref<1x8x1xf32, #tpu.memory_space<vmem>>, %arg4: memref<1x8x1xf32, #tpu.memory_space<vmem>>, %arg5: memref<2x8x256xf32, #tpu.memory_space<vmem>>, %arg6: memref<2x8x256xf32, #tpu.memory_space<vmem>>) attributes {dimension_semantics = [#tpu.dimension_semantics<arbitrary>], iteration_bounds = array<i64: 1>, scalar_prefetch = 0 : i64, scratch_operands = 1 : i64, tpu.core_type = #tpu.core_type<tc>, window_params = [{transform_indices = @transform_0, window_bounds = array<i64: 2, 4, 18, 18>}, {pipeline_mode = #tpu.pipeline_mode<synchronous>, transform_indices = @transform_1, window_bounds = array<i64: 8, 36>}, {pipeline_mode = #tpu.pipeline_mode<synchronous>, transform_indices = @transform_2, window_bounds = array<i64: 1, 8, 1>}, {pipeline_mode = #tpu.pipeline_mode<synchronous>, transform_indices = @transform_3, window_bounds = array<i64: 1, 8, 1>}, {pipeline_mode = #tpu.pipeline_mode<synchronous>, transform_indices = @transform_4, window_bounds = array<i64: 2, 8, 256>}]} {
    %c0 = arith.constant 0 : index
    %c0_0 = arith.constant 0 : index
    %c0_1 = arith.constant 0 : index
    %c0_2 = arith.constant 0 : index
    %0 = vector.load %arg1[%c0, %c0_0, %c0_1, %c0_2] : memref<2x4x18x18xf32, #tpu.memory_space<vmem>>, vector<1x4x16x16xf32>
    %1 = vector.shape_cast %0 : vector<1x4x16x16xf32> to vector<4x16x16xf32>
    %2 = vector.shape_cast %1 : vector<4x16x16xf32> to vector<4x256xf32>
    %c0_3 = arith.constant 0 : index
    %c0_4 = arith.constant 0 : index
    %c0_5 = arith.constant 0 : index
    %c1 = arith.constant 1 : index
    %3 = vector.load %arg1[%c0_3, %c0_4, %c0_5, %c1] : memref<2x4x18x18xf32, #tpu.memory_space<vmem>>, vector<1x4x16x16xf32>
    %4 = vector.shape_cast %3 : vector<1x4x16x16xf32> to vector<4x16x16xf32>
    %5 = vector.shape_cast %4 : vector<4x16x16xf32> to vector<4x256xf32>
    %c0_6 = arith.constant 0 : index
    %c0_7 = arith.constant 0 : index
    %c0_8 = arith.constant 0 : index
    %c2 = arith.constant 2 : index
    %6 = vector.load %arg1[%c0_6, %c0_7, %c0_8, %c2] : memref<2x4x18x18xf32, #tpu.memory_space<vmem>>, vector<1x4x16x16xf32>
    %7 = vector.shape_cast %6 : vector<1x4x16x16xf32> to vector<4x16x16xf32>
    %8 = vector.shape_cast %7 : vector<4x16x16xf32> to vector<4x256xf32>
    %c0_9 = arith.constant 0 : index
    %c0_10 = arith.constant 0 : index
    %c1_11 = arith.constant 1 : index
    %c0_12 = arith.constant 0 : index
    %9 = vector.load %arg1[%c0_9, %c0_10, %c1_11, %c0_12] : memref<2x4x18x18xf32, #tpu.memory_space<vmem>>, vector<1x4x16x16xf32>
    %10 = vector.shape_cast %9 : vector<1x4x16x16xf32> to vector<4x16x16xf32>
    %11 = vector.shape_cast %10 : vector<4x16x16xf32> to vector<4x256xf32>
    %c0_13 = arith.constant 0 : index
    %c0_14 = arith.constant 0 : index
    %c1_15 = arith.constant 1 : index
    %c1_16 = arith.constant 1 : index
    %12 = vector.load %arg1[%c0_13, %c0_14, %c1_15, %c1_16] : memref<2x4x18x18xf32, #tpu.memory_space<vmem>>, vector<1x4x16x16xf32>
    %13 = vector.shape_cast %12 : vector<1x4x16x16xf32> to vector<4x16x16xf32>
    %14 = vector.shape_cast %13 : vector<4x16x16xf32> to vector<4x256xf32>
    %c0_17 = arith.constant 0 : index
    %c0_18 = arith.constant 0 : index
    %c1_19 = arith.constant 1 : index
    %c2_20 = arith.constant 2 : index
    %15 = vector.load %arg1[%c0_17, %c0_18, %c1_19, %c2_20] : memref<2x4x18x18xf32, #tpu.memory_space<vmem>>, vector<1x4x16x16xf32>
    %16 = vector.shape_cast %15 : vector<1x4x16x16xf32> to vector<4x16x16xf32>
    %17 = vector.shape_cast %16 : vector<4x16x16xf32> to vector<4x256xf32>
    %c0_21 = arith.constant 0 : index
    %c0_22 = arith.constant 0 : index
    %c2_23 = arith.constant 2 : index
    %c0_24 = arith.constant 0 : index
    %18 = vector.load %arg1[%c0_21, %c0_22, %c2_23, %c0_24] : memref<2x4x18x18xf32, #tpu.memory_space<vmem>>, vector<1x4x16x16xf32>
    %19 = vector.shape_cast %18 : vector<1x4x16x16xf32> to vector<4x16x16xf32>
    %20 = vector.shape_cast %19 : vector<4x16x16xf32> to vector<4x256xf32>
    %c0_25 = arith.constant 0 : index
    %c0_26 = arith.constant 0 : index
    %c2_27 = arith.constant 2 : index
    %c1_28 = arith.constant 1 : index
    %21 = vector.load %arg1[%c0_25, %c0_26, %c2_27, %c1_28] : memref<2x4x18x18xf32, #tpu.memory_space<vmem>>, vector<1x4x16x16xf32>
    %22 = vector.shape_cast %21 : vector<1x4x16x16xf32> to vector<4x16x16xf32>
    %23 = vector.shape_cast %22 : vector<4x16x16xf32> to vector<4x256xf32>
    %c0_29 = arith.constant 0 : index
    %c0_30 = arith.constant 0 : index
    %c2_31 = arith.constant 2 : index
    %c2_32 = arith.constant 2 : index
    %24 = vector.load %arg1[%c0_29, %c0_30, %c2_31, %c2_32] : memref<2x4x18x18xf32, #tpu.memory_space<vmem>>, vector<1x4x16x16xf32>
    %25 = vector.shape_cast %24 : vector<1x4x16x16xf32> to vector<4x16x16xf32>
    %26 = vector.shape_cast %25 : vector<4x16x16xf32> to vector<4x256xf32>
    %27 = tpu.concatenate %2, %5, %8, %11, %14, %17, %20, %23, %26 in 0 : vector<4x256xf32>, vector<4x256xf32>, vector<4x256xf32>, vector<4x256xf32>, vector<4x256xf32>, vector<4x256xf32>, vector<4x256xf32>, vector<4x256xf32>, vector<4x256xf32> -> vector<36x256xf32>
    %c0_33 = arith.constant 0 : index
    %c0_34 = arith.constant 0 : index
    %28 = vector.load %arg2[%c0_33, %c0_34] : memref<8x36xf32, #tpu.memory_space<vmem>>, vector<8x36xf32>
    %cst = arith.constant dense<0.000000e+00> : vector<8x256xf32>
    %29 = tpu.matmul %28, %27, %cst {dimension_numbers = #tpu.dot_dimension_numbers<[1], [0], [0], [1], [0, 0, 1, 1], [], []>} : vector<8x36xf32>, vector<36x256xf32>, vector<8x256xf32> -> vector<8x256xf32>
    %c0_35 = arith.constant 0 : index
    %c0_36 = arith.constant 0 : index
    %c0_37 = arith.constant 0 : index
    %30 = vector.load %arg6[%c0_35, %c0_36, %c0_37] : memref<2x8x256xf32, #tpu.memory_space<vmem>>, vector<1x8x256xf32>
    %31 = vector.shape_cast %30 : vector<1x8x256xf32> to vector<8x256xf32>
    %32 = vector.shape_cast %29 : vector<8x256xf32> to vector<1x8x256xf32>
    tpu.vector_store %arg6[%c0_35, %c0_36, %c0_37], %32 {strides = array<i32>} : memref<2x8x256xf32, #tpu.memory_space<vmem>>, vector<1x8x256xf32>,
    %c1_38 = arith.constant 1 : index
    %c0_39 = arith.constant 0 : index
    %c0_40 = arith.constant 0 : index
    %c0_41 = arith.constant 0 : index
    %33 = vector.load %arg1[%c1_38, %c0_39, %c0_40, %c0_41] : memref<2x4x18x18xf32, #tpu.memory_space<vmem>>, vector<1x4x16x16xf32>
    %34 = vector.shape_cast %33 : vector<1x4x16x16xf32> to vector<4x16x16xf32>
    %35 = vector.shape_cast %34 : vector<4x16x16xf32> to vector<4x256xf32>
    %c1_42 = arith.constant 1 : index
    %c0_43 = arith.constant 0 : index
    %c0_44 = arith.constant 0 : index
    %c1_45 = arith.constant 1 : index
    %36 = vector.load %arg1[%c1_42, %c0_43, %c0_44, %c1_45] : memref<2x4x18x18xf32, #tpu.memory_space<vmem>>, vector<1x4x16x16xf32>
    %37 = vector.shape_cast %36 : vector<1x4x16x16xf32> to vector<4x16x16xf32>
    %38 = vector.shape_cast %37 : vector<4x16x16xf32> to vector<4x256xf32>
    %c1_46 = arith.constant 1 : index
    %c0_47 = arith.constant 0 : index
    %c0_48 = arith.constant 0 : index
    %c2_49 = arith.constant 2 : index
    %39 = vector.load %arg1[%c1_46, %c0_47, %c0_48, %c2_49] : memref<2x4x18x18xf32, #tpu.memory_space<vmem>>, vector<1x4x16x16xf32>
    %40 = vector.shape_cast %39 : vector<1x4x16x16xf32> to vector<4x16x16xf32>
    %41 = vector.shape_cast %40 : vector<4x16x16xf32> to vector<4x256xf32>
    %c1_50 = arith.constant 1 : index
    %c0_51 = arith.constant 0 : index
    %c1_52 = arith.constant 1 : index
    %c0_53 = arith.constant 0 : index
    %42 = vector.load %arg1[%c1_50, %c0_51, %c1_52, %c0_53] : memref<2x4x18x18xf32, #tpu.memory_space<vmem>>, vector<1x4x16x16xf32>
    %43 = vector.shape_cast %42 : vector<1x4x16x16xf32> to vector<4x16x16xf32>
    %44 = vector.shape_cast %43 : vector<4x16x16xf32> to vector<4x256xf32>
    %c1_54 = arith.constant 1 : index
    %c0_55 = arith.constant 0 : index
    %c1_56 = arith.constant 1 : index
    %c1_57 = arith.constant 1 : index
    %45 = vector.load %arg1[%c1_54, %c0_55, %c1_56, %c1_57] : memref<2x4x18x18xf32, #tpu.memory_space<vmem>>, vector<1x4x16x16xf32>
    %46 = vector.shape_cast %45 : vector<1x4x16x16xf32> to vector<4x16x16xf32>
    %47 = vector.shape_cast %46 : vector<4x16x16xf32> to vector<4x256xf32>
    %c1_58 = arith.constant 1 : index
    %c0_59 = arith.constant 0 : index
    %c1_60 = arith.constant 1 : index
    %c2_61 = arith.constant 2 : index
    %48 = vector.load %arg1[%c1_58, %c0_59, %c1_60, %c2_61] : memref<2x4x18x18xf32, #tpu.memory_space<vmem>>, vector<1x4x16x16xf32>
    %49 = vector.shape_cast %48 : vector<1x4x16x16xf32> to vector<4x16x16xf32>
    %50 = vector.shape_cast %49 : vector<4x16x16xf32> to vector<4x256xf32>
    %c1_62 = arith.constant 1 : index
    %c0_63 = arith.constant 0 : index
    %c2_64 = arith.constant 2 : index
    %c0_65 = arith.constant 0 : index
    %51 = vector.load %arg1[%c1_62, %c0_63, %c2_64, %c0_65] : memref<2x4x18x18xf32, #tpu.memory_space<vmem>>, vector<1x4x16x16xf32>
    %52 = vector.shape_cast %51 : vector<1x4x16x16xf32> to vector<4x16x16xf32>
    %53 = vector.shape_cast %52 : vector<4x16x16xf32> to vector<4x256xf32>
    %c1_66 = arith.constant 1 : index
    %c0_67 = arith.constant 0 : index
    %c2_68 = arith.constant 2 : index
    %c1_69 = arith.constant 1 : index
    %54 = vector.load %arg1[%c1_66, %c0_67, %c2_68, %c1_69] : memref<2x4x18x18xf32, #tpu.memory_space<vmem>>, vector<1x4x16x16xf32>
    %55 = vector.shape_cast %54 : vector<1x4x16x16xf32> to vector<4x16x16xf32>
    %56 = vector.shape_cast %55 : vector<4x16x16xf32> to vector<4x256xf32>
    %c1_70 = arith.constant 1 : index
    %c0_71 = arith.constant 0 : index
    %c2_72 = arith.constant 2 : index
    %c2_73 = arith.constant 2 : index
    %57 = vector.load %arg1[%c1_70, %c0_71, %c2_72, %c2_73] : memref<2x4x18x18xf32, #tpu.memory_space<vmem>>, vector<1x4x16x16xf32>
    %58 = vector.shape_cast %57 : vector<1x4x16x16xf32> to vector<4x16x16xf32>
    %59 = vector.shape_cast %58 : vector<4x16x16xf32> to vector<4x256xf32>
    %60 = tpu.concatenate %35, %38, %41, %44, %47, %50, %53, %56, %59 in 0 : vector<4x256xf32>, vector<4x256xf32>, vector<4x256xf32>, vector<4x256xf32>, vector<4x256xf32>, vector<4x256xf32>, vector<4x256xf32>, vector<4x256xf32>, vector<4x256xf32> -> vector<36x256xf32>
    %c0_74 = arith.constant 0 : index
    %c0_75 = arith.constant 0 : index
    %61 = vector.load %arg2[%c0_74, %c0_75] : memref<8x36xf32, #tpu.memory_space<vmem>>, vector<8x36xf32>
    %cst_76 = arith.constant dense<0.000000e+00> : vector<8x256xf32>
    %62 = tpu.matmul %61, %60, %cst_76 {dimension_numbers = #tpu.dot_dimension_numbers<[1], [0], [0], [1], [0, 0, 1, 1], [], []>} : vector<8x36xf32>, vector<36x256xf32>, vector<8x256xf32> -> vector<8x256xf32>
    %c1_77 = arith.constant 1 : index
    %c0_78 = arith.constant 0 : index
    %c0_79 = arith.constant 0 : index
    %63 = vector.load %arg6[%c1_77, %c0_78, %c0_79] : memref<2x8x256xf32, #tpu.memory_space<vmem>>, vector<1x8x256xf32>
    %64 = vector.shape_cast %63 : vector<1x8x256xf32> to vector<8x256xf32>
    %65 = vector.shape_cast %62 : vector<8x256xf32> to vector<1x8x256xf32>
    tpu.vector_store %arg6[%c1_77, %c0_78, %c0_79], %65 {strides = array<i32>} : memref<2x8x256xf32, #tpu.memory_space<vmem>>, vector<1x8x256xf32>,
    %c0_i32 = arith.constant 0 : i32
    %66 = arith.cmpi eq, %arg0, %c0_i32 : i32
    %67 = arith.extui %66 : i1 to i32
    %c0_i32_80 = arith.constant 0 : i32
    %68 = arith.cmpi ne, %67, %c0_i32_80 : i32
    scf.if %68 {
      %c0_81 = arith.constant 0 : index
      %c0_82 = arith.constant 0 : index
      %c0_83 = arith.constant 0 : index
      %69 = vector.load %arg6[%c0_81, %c0_82, %c0_83] : memref<2x8x256xf32, #tpu.memory_space<vmem>>, vector<2x8x256xf32>
      %cst_84 = arith.constant dense<0.000000e+00> : vector<2x8xf32>
      %70 = vector.multi_reduction <add>, %69, %cst_84 [2] : vector<2x8x256xf32> to vector<2x8xf32>
      %71 = vector.shape_cast %70 : vector<2x8xf32> to vector<2x8x1xf32>
      %cst_85 = arith.constant dense<0.000000e+00> : vector<8x1xf32>
      %72 = vector.multi_reduction <add>, %71, %cst_85 [0] : vector<2x8x1xf32> to vector<8x1xf32>
      %73 = vector.shape_cast %72 : vector<8x1xf32> to vector<1x8x1xf32>
      %cst_86 = arith.constant 0.001953125 : f32
      %74 = vector.broadcast %cst_86 : f32 to vector<1x8x1xf32>
      %75 = arith.mulf %73, %74 : vector<1x8x1xf32>
      %76 = vector.broadcast %75 : vector<1x8x1xf32> to vector<2x8x256xf32>
      %77 = arith.subf %69, %76 : vector<2x8x256xf32>
      %78 = arith.mulf %77, %77 : vector<2x8x256xf32>
      %cst_87 = arith.constant dense<0.000000e+00> : vector<2x8xf32>
      %79 = vector.multi_reduction <add>, %78, %cst_87 [2] : vector<2x8x256xf32> to vector<2x8xf32>
      %80 = vector.shape_cast %79 : vector<2x8xf32> to vector<2x8x1xf32>
      %cst_88 = arith.constant dense<0.000000e+00> : vector<8x1xf32>
      %81 = vector.multi_reduction <add>, %80, %cst_88 [0] : vector<2x8x1xf32> to vector<8x1xf32>
      %82 = vector.shape_cast %81 : vector<8x1xf32> to vector<1x8x1xf32>
      %cst_89 = arith.constant 0.001953125 : f32
      %83 = vector.broadcast %cst_89 : f32 to vector<1x8x1xf32>
      %84 = arith.mulf %82, %83 : vector<1x8x1xf32>
      %c0_90 = arith.constant 0 : index
      %c0_91 = arith.constant 0 : index
      %c0_92 = arith.constant 0 : index
      %85 = vector.load %arg3[%c0_90, %c0_91, %c0_92] : memref<1x8x1xf32, #tpu.memory_space<vmem>>, vector<1x8x1xf32>
      %cst_93 = arith.constant 9.99999974E-6 : f32
      %86 = vector.broadcast %cst_93 : f32 to vector<1x8x1xf32>
      %87 = arith.addf %84, %86 : vector<1x8x1xf32>
      %88 = math.rsqrt %87 : vector<1x8x1xf32>
      %89 = arith.mulf %85, %88 : vector<1x8x1xf32>
      %c0_94 = arith.constant 0 : index
      %c0_95 = arith.constant 0 : index
      %c0_96 = arith.constant 0 : index
      %90 = vector.load %arg4[%c0_94, %c0_95, %c0_96] : memref<1x8x1xf32, #tpu.memory_space<vmem>>, vector<1x8x1xf32>
      %91 = arith.mulf %75, %89 : vector<1x8x1xf32>
      %92 = arith.subf %90, %91 : vector<1x8x1xf32>
      %93 = vector.broadcast %89 : vector<1x8x1xf32> to vector<2x8x256xf32>
      %94 = arith.mulf %69, %93 : vector<2x8x256xf32>
      %95 = vector.broadcast %92 : vector<1x8x1xf32> to vector<2x8x256xf32>
      %96 = arith.addf %94, %95 : vector<2x8x256xf32>
      %97 = arith.negf %96 : vector<2x8x256xf32>
      %98 = math.exp %97 : vector<2x8x256xf32>
      %cst_97 = arith.constant 1.000000e+00 : f32
      %99 = vector.broadcast %cst_97 : f32 to vector<2x8x256xf32>
      %100 = arith.addf %99, %98 : vector<2x8x256xf32>
      %101 = arith.divf %99, %100 : vector<2x8x256xf32>
      %cst_98 = arith.constant 3.000000e-01 : f32
      %102 = vector.broadcast %cst_98 : f32 to vector<2x8x256xf32>
      %103 = arith.mulf %102, %101 : vector<2x8x256xf32>
      %c0_99 = arith.constant 0 : index
      %c0_100 = arith.constant 0 : index
      %c0_101 = arith.constant 0 : index
      %104 = vector.load %arg5[%c0_99, %c0_100, %c0_101] : memref<2x8x256xf32, #tpu.memory_space<vmem>>, vector<2x8x256xf32>
      tpu.vector_store %arg5[%c0_99, %c0_100, %c0_101], %103 {strides = array<i32>} : memref<2x8x256xf32, #tpu.memory_space<vmem>>, vector<2x8x256xf32>,
    } else {
    }
    return
  }
  func.func @transform_0(%arg0: i32) -> (i32, i32, i32, i32) {
    %c0_i32 = arith.constant 0 : i32
    %c0_i32_0 = arith.constant 0 : i32
    %c0_i32_1 = arith.constant 0 : i32
    %c0_i32_2 = arith.constant 0 : i32
    return %arg0, %c0_i32, %c0_i32_0, %c0_i32_1 : i32, i32, i32, i32
  }
  func.func @transform_1(%arg0: i32) -> (i32, i32) {
    %c0_i32 = arith.constant 0 : i32
    %c0_i32_0 = arith.constant 0 : i32
    %c0_i32_1 = arith.constant 0 : i32
    return %c0_i32, %c0_i32_0 : i32, i32
  }
  func.func @transform_2(%arg0: i32) -> (i32, i32, i32) {
    %c0_i32 = arith.constant 0 : i32
    %c0_i32_0 = arith.constant 0 : i32
    %c0_i32_1 = arith.constant 0 : i32
    %c0_i32_2 = arith.constant 0 : i32
    return %c0_i32, %c0_i32_0, %c0_i32_1 : i32, i32, i32
  }
  func.func @transform_3(%arg0: i32) -> (i32, i32, i32) {
    %c0_i32 = arith.constant 0 : i32
    %c0_i32_0 = arith.constant 0 : i32
    %c0_i32_1 = arith.constant 0 : i32
    %c0_i32_2 = arith.constant 0 : i32
    return %c0_i32, %c0_i32_0, %c0_i32_1 : i32, i32, i32
  }
  func.func @transform_4(%arg0: i32) -> (i32, i32, i32) {
    %c0_i32 = arith.constant 0 : i32
    %c0_i32_0 = arith.constant 0 : i32
    %c0_i32_1 = arith.constant 0 : i32
    %c0_i32_2 = arith.constant 0 : i32
    return %c0_i32, %c0_i32_0, %c0_i32_1 : i32, i32, i32
  }
}

</mosaic_0001>

<bundles_post_ra>
// kernel: disp_forward.1
= control target key start
LH: loop header
LB: loop body
LE: loop exit
PB: predicated region body
PF: predicated region fallthrough
CT: control target
= control target key end

     0   :  { %vm26_vm0 = vcmask 1047556   ;;  %v4840_v3 = vmov 1983009808   ;;  %v4841_v5 = vmov 1934713408   ;;  %s4842_s5 = smov 64   ;;  %s7844_s0 = inlined_call_operand.vmem [shape: f32[2,4,18,18], index: 0, kind: input, shape index: {}]   ;;  %s7845_s1 = inlined_call_operand.vmem [shape: f32[8,36], index: 1, kind: input, shape index: {}]   ;;  %s7846_s2 = inlined_call_operand.vmem [shape: f32[1,8,1], index: 2, kind: input, shape index: {}]   ;;  %s7847_s3 = inlined_call_operand.vmem [shape: f32[1,8,1], index: 3, kind: input, shape index: {}]   ;;  %s7848_s4 = inlined_call_operand.vmem [shape: f32[2,8,256], index: 4, kind: output, shape index: {}]  }
   0x1   :  { %v4880_v0 = vld [vmem:[%s7844_s0] sm:$0xff]  ;;  %v4885_v1 = vld [vmem:[%s7844_s0 + $0x8] sm:$0xff]  ;;  %v4890_v2 = vld [vmem:[%s7844_s0 + $0x18] sm:$0xff]  ;;  %v31_v4 = vunpack.c.l.s4 %v4840_v3  ;;  %v55_v6 = vunpack.c.l.s4 %v4841_v5  ;;  %s4843_s6 = smov 32   ;;  %s4844_s11 = smov 96   ;;  %vm194_vm1 = vcmask 130048  }
   0x2   :  { %v4895_v7 = vld [vmem:[%s7844_s0 + $0x20] sm:$0xff]  ;;  %v4900_v8 = vld [vmem:[%s7844_s0 + $0x30] sm:$0xff]  ;;  %v28_v9 = vrot.slane %v4880_v0, 4  ;;  %v40_v10 = vrot.slane %v4890_v2, 4  ;;  %v84_v11 = vrot.slane %v4885_v1, 4  ;;  %v4908_v12 = vld [vmem:[%s7844_s0 + $0x38] sm:$0xff] }
   0x3   :  { %v4913_v13 = vld [vmem:[%s7844_s0 + $0x48] sm:$0xff]  ;;  %v4918_v14 = vld [vmem:[%s7844_s0 + $0x50] sm:$0xff]  ;;  %v4920_v15 = vunpack.c.0.s8 %v31_v4  ;;  %v4922_v16 = vunpack.c.0.s8 %v55_v6  ;;  %v96_v17 = vrot.slane %v4895_v7, 4  ;;  %v25_v18 = vrot.slane %v4900_v8, 4  ;;  %s4845_s16 = smov 48   ;;  %s4846_s23 = smov 16  }
   0x4   :  { %v29_v19 = vsel %vm26_vm0, %v4900_v8, %v28_v9  ;;  %v41_v20 = vsel %vm26_vm0, %v4913_v13, %v40_v10  ;;  %v85_v21 = vsel %vm26_vm0, %v4908_v12, %v84_v11  ;;  %v38_v22 = vrot.slane %v4913_v13, 4  ;;  %s4847_s26 = smov 80   ;;  %s4848_s27 = smov 127  }
   0x5   :  { %7917 = vst [vmem:[#allocation3_spill] sm:$0xff] %v4920_v15  ;;  %v37_v23 = vperm.slane %v29_v19, %v4920_v15  ;;  %v49_v24 = vperm.slane %v41_v20, %v4920_v15  ;;  %v93_v25 = vperm.slane %v85_v21, %v4920_v15  ;;  %v97_v26 = vsel %vm26_vm0, %v4918_v14, %v96_v17  ;;  %v4983_v21 = vld [vmem:[%s7844_s0 + $0x31] sm:$0xff]  ;;  %s4849_s28 = smov 112   ;;  %s4850_s29 = smov 126  }
   0x6   :  { %7918 = vst [vmem:[#allocation4_spill] sm:$0xff] %v4922_v16  ;;  %v105_v27 = vperm.slane %v97_v26, %v4920_v15  ;;  %v27_v28 = vsel %vm26_vm0, %v25_v18, %v4880_v0  ;;  %v39_v29 = vsel %vm26_vm0, %v38_v22, %v4890_v2  ;;  %v82_v30 = vrot.slane %v4908_v12, 4  ;;  %v4988_v22 = vld [vmem:[%s7844_s0 + $0x39] sm:$0xff]  ;;  %v5001_v26 = vld [vmem:[%s7844_s0 + $0x49] sm:$0xff] }
   0x7   :  { %v62_v31 = vrot.slane %v49_v24, 4  ;;  %v64_v32 = vrot.slane %v37_v23, 4  ;;  %v33_v33 = vperm.slane %v27_v28, %v4920_v15  ;;  %v45_v35 = vperm.slane %v39_v29, %v4920_v15 }
   0x8   :  { %v118_v34 = vrot.slane %v105_v27, 4  ;;  %v83_v36 = vsel %vm26_vm0, %v82_v30, %v4885_v1  ;;  %v94_v37 = vrot.slane %v4918_v14, 4  ;;  %v120_v39 = vrot.slane %v93_v25, 4 }
   0x9   :  { %v63_v38 = vsel %vm26_vm0, %v62_v31, %v37_v23  ;;  %v52_v40 = vrot.slane %v33_v33, 4  ;;  %v89_v41 = vperm.slane %v83_v36, %v4920_v15  ;;  %v50_v44 = vrot.slane %v45_v35, 4 }
   0xa   :  { %v69_v42 = vperm.slane %v63_v38, %v4922_v16  ;;  %v119_v43 = vsel %vm26_vm0, %v118_v34, %v93_v25  ;;  %v95_v45 = vsel %vm26_vm0, %v94_v37, %v4895_v7  ;;  %v65_v58 = vsel %vm26_vm0, %v49_v24, %v64_v32  ;;  %v4996_v25 = vld [vmem:[%s7844_s0 + $0x1] sm:$0xff]  ;;  %v5015_v34 = vld [vmem:[%s7844_s0 + $0x51] sm:$0xff]  ;;  %v5023_v38 = vld [vmem:[%s7844_s0 + $0x19] sm:$0xff] }
   0xb   :  { %v125_v46 = vperm.slane %v119_v43, %v4922_v16  ;;  %v53_v47 = vsel %vm26_vm0, %v45_v35, %v52_v40  ;;  %v101_v48 = vperm.slane %v95_v45, %v4920_v15  ;;  %v108_v49 = vrot.slane %v89_v41, 4 }
   0xc   :  { %v61_v50 = vperm.slane %v53_v47, %v4922_v16  ;;  %v51_v51 = vsel %vm26_vm0, %v50_v44, %v33_v33  ;;  %v121_v60 = vsel %vm26_vm0, %v105_v27, %v120_v39  ;;  %v73_v5 = vperm.slane %v65_v58, %v4922_v16  ;;  %v5010_v33 = vld [vmem:[%s7844_s0 + $0x9] sm:$0xff]  ;;  %v5038_v44 = vld [vmem:[%s7844_s0 + $0x21] sm:$0xff] }
   0xd   :  { %v4064_v52 = vpack.i.bf16 %v125_v46, %v69_v42  ;;  %v106_v53 = vrot.slane %v101_v48, 4  ;;  %v109_v54 = vsel %vm26_vm0, %v101_v48, %v108_v49  ;;  %v4963_v57 = vperm.slane %v51_v51, %v4922_v16 }
   0xe   :  { %v117_v55 = vperm.slane %v109_v54, %v4922_v16  ;;  %v76_v56 = vrot.slane %v61_v50, 4  ;;  %v129_v6 = vperm.slane %v121_v60, %v4922_v16  ;;  %v134_v9 = vrot.slane %v125_v46, 4 }
   0xf   :  { %4065 = vrot.lane.b32.xlu1 %v4064_v52, %s4842_s5  ;;  %v107_v59 = vsel %vm26_vm0, %v106_v53, %v89_v41  ;;  %v74_v3 = vrot.slane %v4963_v57, 4  ;;  %v78_v10 = vrot.slane %v69_v42, 4  ;;  %v643_v23 = vrot.slane %v4983_v21, 4 }
  0x10   :  { %v132_v61 = vrot.slane %v117_v55, 4  ;;  %v4059_v62 = vpack.i.bf16 %v117_v55, %v61_v50  ;;  %v77_v63 = vsel %vm26_vm0, 0.0, %v76_v56  ;;  %v4972_v4 = vperm.slane %v107_v59, %v4922_v16 }
  0x11   :  { %v75_v18 = vsel %vm26_vm0, 0.0, %v74_v3  ;;  %v4069_v20 = vpack.i.bf16 %v129_v6, %v73_v5  ;;  %v79_v28 = vsel %vm26_vm0, 0.0, %v78_v10  ;;  %v135_v29 = vsel %vm26_vm0, 0.0, %v134_v9 }
  0x12   :  { %4060 = vrot.lane.b32.xlu0 %v4059_v62, %s4843_s6  ;;  %v133_v11 = vsel %vm26_vm0, 0.0, %v132_v61  ;;  %v130_v19 = vrot.slane %v4972_v4, 4  ;;  %v699_v30 = vrot.slane %v4988_v22, 4  ;;  %v80_v31 = vrot.slane %v73_v5, 4 }
  0x13   :  { %v4079_v17 = vpack.i.bf16 %v133_v11, %v77_v63  ;;  %4070 = vrot.lane.b32.xlu2 %v4069_v20, %s4844_s11  ;;  %v136_v32 = vrot.slane %v129_v6, 4  ;;  %v644_v35 = vsel %vm26_vm0, %v643_v23, %v4996_v25  ;;  %v655_v36 = vrot.slane %v5001_v26, 4 }
  0x14   :  { %v131_v24 = vsel %vm26_vm0, 0.0, %v130_v19  ;;  %v4084_v37 = vpack.i.bf16 %v135_v29, %v79_v28  ;;  %v700_v39 = vsel %vm26_vm0, %v699_v30, %v5010_v33  ;;  %v711_v40 = vrot.slane %v5015_v34, 4 }
  0x15   :  { %v4074_v27 = vpack.i.bf16 %v131_v24, %v75_v18  ;;  %v5031_v41 = vpack.i.bf16 %v4885_v1, %v4880_v0  ;;  %v81_v42 = vsel %vm26_vm0, 0.0, %v80_v31  ;;  %v137_v43 = vsel %vm26_vm0, 0.0, %v136_v32 }
  0x16   :  { %v650_v45 = vperm.slane %v644_v35, %v4920_v15  ;;  %v656_v46 = vsel %vm26_vm0, %v655_v36, %v5023_v38  ;;  %v706_v0 = vperm.slane %v700_v39, %v4920_v15  ;;  %v4089_v1 = vpack.i.bf16 %v137_v43, %v81_v42 }
  0x17   :  { %4080 = vrot.lane.b32.xlu1 %v4079_v17, %s4845_s16  ;;  %v712_v47 = vsel %vm26_vm0, %v711_v40, %v5038_v44  ;;  %v662_v48 = vperm.slane %v656_v46, %v4920_v15  ;;  %v4099_v50 = vpack.i.bf16 %v4895_v7, %v4890_v2  ;;  %v4109_v53 = vpack.i.bf16 %v4918_v14, %v4913_v13 }
  0x18   :  { %v669_v49 = vrot.slane %v650_v45, 4  ;;  %v718_v51 = vperm.slane %v712_v47, %v4920_v15  ;;  %v725_v52 = vrot.slane %v706_v0, 4  ;;  %v657_v54 = vrot.slane %v5023_v38, 4 }
  0x19   :  { %v667_v56 = vrot.slane %v662_v48, 4  ;;  %v713_v59 = vrot.slane %v5038_v44, 4  ;;  %v4104_v7 = vpack.i.bf16 %v4908_v12, %v4900_v8  ;;  %v645_v13 = vrot.slane %v4996_v25, 4 }
  0x1a   :  { %4075 = vrot.lane.b32.xlu0 %v4074_v27, %s4846_s23  ;;  %v670_v55 = vsel %vm26_vm0, %v662_v48, %v669_v49  ;;  %v723_v58 = vrot.slane %v718_v51, 4  ;;  %v726_v2 = vsel %vm26_vm0, %v718_v51, %v725_v52  ;;  %v658_v14 = vsel %vm26_vm0, %v5001_v26, %v657_v54 }
  0x1b   :  { %4085 = vrot.lane.b32.xlu2 %v4084_v37, %s4847_s26  ;;  %v678_v60 = vperm.slane %v670_v55, %v4922_v16  ;;  %v701_v61 = vrot.slane %v5010_v33, 4  ;;  %v734_v62 = vperm.slane %v726_v2, %v4922_v16  ;;  %v668_v63 = vsel %vm26_vm0, %v667_v56, %v650_v45 }
  0x1c   :  { %v724_v3 = vsel %vm26_vm0, %v723_v58, %v706_v0  ;;  %v714_v8 = vsel %vm26_vm0, %v5015_v34, %v713_v59  ;;  %v5075_v12 = vperm.slane %v668_v63, %v4922_v16  ;;  %v666_v9 = vperm.slane %v658_v14, %v4920_v15 }
  0x1d   :  { %v5078_v5 = vperm.slane %v724_v3, %v4922_v16  ;;  %v693_v6 = vrot.slane %v678_v60, 4  ;;  %v646_v10 = vsel %vm26_vm0, %v4983_v21, %v645_v13  ;;  %v702_v11 = vsel %vm26_vm0, %v4988_v22, %v701_v61 }
  0x1e   :  { %v691_v17 = vrot.slane %v5075_v12, 4  ;;  %v749_v19 = vrot.slane %v734_v62, 4  ;;  %v722_v20 = vperm.slane %v714_v8, %v4920_v15  ;;  %v654_v23 = vperm.slane %v646_v10, %v4920_v15 }
  0x1f   :  { %4095 = vrot.lane.b32.xlu1 %v5031_v41, %s4848_s27  ;;  %7919 = vst [vmem:[#allocation5_spill] sm:$0xff] %v5078_v5  ;;  %v747_v18 = vrot.slane %v5078_v5, 4  ;;  %v710_v24 = vperm.slane %v702_v11, %v4920_v15  ;;  %v694_v29 = vsel %vm26_vm0, 0.0, %v693_v6  ;;  %v679_v30 = vrot.slane %v666_v9, 4 }
  0x20   :  { %v692_v27 = vsel %vm26_vm0, 0.0, %v691_v17  ;;  %v750_v31 = vsel %vm26_vm0, 0.0, %v749_v19  ;;  %v735_v32 = vrot.slane %v722_v20, 4  ;;  %v681_v35 = vrot.slane %v654_v23, 4 }
  0x21   :  { %v748_v28 = vsel %vm26_vm0, 0.0, %v747_v18  ;;  %v737_v36 = vrot.slane %v710_v24, 4  ;;  %v4144_v39 = vpack.i.bf16 %v750_v31, %v694_v29  ;;  %v680_v40 = vsel %vm26_vm0, %v679_v30, %v654_v23 }
  0x22   :  { %4090 = vrot.lane.b32.xlu0 %v4089_v1, %s4849_s28  ;;  %v4134_v37 = vpack.i.bf16 %v748_v28, %v692_v27  ;;  %v736_v42 = vsel %vm26_vm0, %v735_v32, %v710_v24  ;;  %v682_v43 = vsel %vm26_vm0, %v666_v9, %v681_v35  ;;  %v686_v46 = vperm.slane %v680_v40, %v4922_v16 }
  0x23   :  { %4100 = vrot.lane.b32.xlu2 %v4099_v50, %s4848_s27  ;;  %v738_v45 = vsel %vm26_vm0, %v722_v20, %v737_v36  ;;  %v742_v0 = vperm.slane %v736_v42, %v4922_v16  ;;  %v690_v1 = vperm.slane %v682_v43, %v4922_v16  ;;  %v4139_v51 = vpack.i.bf16 %v734_v62, %v678_v60 }
  0x24   :  { %v695_v55 = vrot.slane %v686_v46, 4  ;;  %v4174_v2 = vpack.i.bf16 %v5038_v44, %v5023_v38  ;;  %v4179_v60 = vpack.i.bf16 %v4988_v22, %v4983_v21  ;;  %v4169_v13 = vpack.i.bf16 %v5010_v33, %v4996_v25 }
  0x25   :  { %v4149_v47 = vpack.i.bf16 %v742_v0, %v686_v46  ;;  %v697_v48 = vrot.slane %v690_v1, 4  ;;  %v751_v56 = vrot.slane %v742_v0, 4  ;;  %v4184_v38 = vpack.i.bf16 %v5015_v34, %v5001_v26 }
  0x26   :  { %v696_v59 = vsel %vm26_vm0, 0.0, %v695_v55  ;;  %vm196_vm2 = vcmask 261120   ;;  %vm198_vm3 = vcmask 392192   ;;  %vm200_vm4 = vcmask 523264  }
  0x27   :  { %4110 = vrot.lane.b32.xlu1 %v4109_v53, %s4848_s27  ;;  %v698_v52 = vsel %vm26_vm0, 0.0, %v697_v48  ;;  %vm202_vm5 = vcmask 654336   ;;  %vm204_vm6 = vcmask 785408   ;;  %vm206_vm7 = vcmask 916480  }
  0x28   :  { %vm1879_vm8 = vcmask 1043456   ;;  %vm1889_vm9 = vcmask 293888  }
  0x2a   :  { %4105 = vrot.lane.b32.xlu0 %v4104_v7, %s4848_s27 }
  0x2b   :  { %4125 = vrot.lane.b32.xlu2 %v4104_v7, %s4850_s29 }
  0x2f   :  { %4120 = vrot.lane.b32.xlu1 %v4099_v50, %s4850_s29 }
  0x32   :  { %4115 = vrot.lane.b32.xlu0 %v5031_v41, %s4850_s29  ;;  %v746_v41 = vperm.slane %v738_v45, %v4922_v16 }
  0x33   :  { %4135 = vrot.lane.b32.xlu2 %v4134_v37, %s4846_s23 }
  0x34   :  { %v753_v49 = vrot.slane %v746_v41, 4  ;;  %v4159_v50 = vpack.i.bf16 %v746_v41, %v690_v1 }
  0x36   :  { %v754_v54 = vsel %vm26_vm0, 0.0, %v753_v49 }
  0x37   :  { %4145 = vrot.lane.b32.xlu1 %v4144_v39, %s4845_s16  ;;  %v4164_v58 = vpack.i.bf16 %v754_v54, %v698_v52 }
  0x3a   :  { %4130 = vrot.lane.b32.xlu0 %v4109_v53, %s4850_s29  ;;  %v752_v53 = vsel %vm26_vm0, 0.0, %v751_v56 }
  0x3b   :  { %4150 = vrot.lane.b32.xlu2 %v4149_v47, %s4842_s5  ;;  %v4154_v7 = vpack.i.bf16 %v752_v53, %v696_v59 }
  0x3f   :  { %4160 = vrot.lane.b32.xlu1 %v4159_v50, %s4844_s11 }
  0x42   :  { %4140 = vrot.lane.b32.xlu0 %v4139_v51, %s4843_s6 }
  0x43   :  { %4165 = vrot.lane.b32.xlu2 %v4164_v58, %s4849_s28 }
  0x47   :  { %4175 = vrot.lane.b32.xlu1 %v4174_v2, %s4848_s27 }
  0x4a   :  { %4155 = vrot.lane.b32.xlu0 %v4154_v7, %s4847_s26 }
  0x4b   :  { %4180 = vrot.lane.b32.xlu2 %v4179_v60, %s4848_s27 }
  0x4f   :  { %4200 = vrot.lane.b32.xlu1 %v4179_v60, %s4850_s29 }
  0x52   :  { %4170 = vrot.lane.b32.xlu0 %v4169_v13, %s4848_s27 }
  0x53   :  { %4190 = vrot.lane.b32.xlu2 %v4169_v13, %s4850_s29 }
  0x5a   :  { %4185 = vrot.lane.b32.xlu0 %v4184_v38, %s4848_s27 }
  0x5b   :  { %4205 = vrot.lane.b32.xlu2 %v4184_v38, %s4850_s29 }
  0x62   :  { %4195 = vrot.lane.b32.xlu0 %v4174_v2, %s4850_s29 }
  0x6d   :  { %v5135_v21 = vpop.permute.xlu2 %4070 }
  0x75   :  { %v5137_v22 = vpop.permute.xlu2 %4085 }
  0x7d   :  { %v4101_v44 = vpop.permute.xlu2 %4100 }
  0x7e   :  { %v4103_v63 = vunpack.i.h.bf16 %v4101_v44  ;;  %v4102_v3 = vunpack.i.l.bf16 %v4101_v44 }
  0x80   :  { %v317_v9 = vrot.slane %v4103_v63, 4  ;;  %v261_v10 = vrot.slane %v4102_v3, 4 }
  0x81   :  { %v5139_v25 = vpop.permute.xlu1 %4065 }
  0x84   :  { %v5141_v33 = vpop.permute.xlu0 %4060 }
  0x85   :  { %v5147_v34 = vpop.permute.xlu2 %4125 }
  0x86   :  { %v4128_v47 = vunpack.i.h.bf16 %v5147_v34  ;;  %v4127_v48 = vunpack.i.l.bf16 %v5147_v34 }
  0x89   :  { %v5143_v14 = vpop.permute.xlu1 %4080 }
  0x8c   :  { %v5145_v61 = vpop.permute.xlu0 %4075 }
  0x8d   :  { %v5151_v19 = vpop.permute.xlu2 %4135 }
  0x91   :  { %v4096_v26 = vpop.permute.xlu1 %4095 }
  0x92   :  { %v4098_v8 = vunpack.i.h.bf16 %v4096_v26  ;;  %v4097_v6 = vunpack.i.l.bf16 %v4096_v26 }
  0x94   :  { %v5149_v62 = vpop.permute.xlu0 %4090  ;;  %v305_v20 = vrot.slane %v4098_v8, 4  ;;  %v249_v23 = vrot.slane %v4097_v6, 4 }
  0x95   :  { %7920 = vst [vmem:[#allocation6_spill] sm:$0xff] %v5149_v62  ;;  %v5177_v38 = vpop.permute.xlu2 %4150 }
  0x99   :  { %v4111_v11 = vpop.permute.xlu1 %4110 }
  0x9a   :  { %v4113_v17 = vunpack.i.h.bf16 %v4111_v11  ;;  %v4112_v18 = vunpack.i.l.bf16 %v4111_v11  ;;  %v453_v11 = vrot.slane %v4127_v48, 4 }
  0x9c   :  { %v318_v24 = vsel %vm26_vm0, %v4113_v17, %v317_v9  ;;  %v262_v27 = vsel %vm26_vm0, %v4112_v18, %v261_v10  ;;  %v4106_v28 = vpop.permute.xlu0 %4105  ;;  %v315_v35 = vrot.slane %v4113_v17, 4  ;;  %v259_v37 = vrot.slane %v4112_v18, 4 }
  0x9d   :  { %v326_v29 = vperm.slane %v318_v24, %v4920_v15  ;;  %v270_v30 = vperm.slane %v262_v27, %v4920_v15  ;;  %v4108_v31 = vunpack.i.h.bf16 %v4106_v28  ;;  %v4107_v32 = vunpack.i.l.bf16 %v4106_v28 }
  0x9e   :  { %v316_v49 = vsel %vm26_vm0, %v315_v35, %v4103_v63  ;;  %v260_v50 = vsel %vm26_vm0, %v259_v37, %v4102_v3  ;;  %v509_v10 = vrot.slane %v4128_v47, 4 }
  0x9f   :  { %v339_v36 = vrot.slane %v326_v29, 4  ;;  %v283_v39 = vrot.slane %v270_v30, 4  ;;  %v303_v40 = vrot.slane %v4108_v31, 4  ;;  %v306_v42 = vsel %vm26_vm0, %v4108_v31, %v305_v20 }
  0xa0   :  { %v247_v43 = vrot.slane %v4107_v32, 4  ;;  %v250_v45 = vsel %vm26_vm0, %v4107_v32, %v249_v23  ;;  %v314_v46 = vperm.slane %v306_v42, %v4920_v15  ;;  %v5196_v20 = vperm.slane %v316_v49, %v4920_v15 }
  0xa1   :  { %v258_v0 = vperm.slane %v250_v45, %v4920_v15  ;;  %v304_v1 = vsel %vm26_vm0, %v303_v40, %v4098_v8  ;;  %v4121_v53 = vpop.permute.xlu1 %4120  ;;  %v5199_v23 = vperm.slane %v260_v50, %v4920_v15  ;;  %v5225_v50 = vpop.permute.xlu2 %4165 }
  0xa2   :  { %v248_v41 = vsel %vm26_vm0, %v247_v43, %v4097_v6  ;;  %v341_v51 = vrot.slane %v314_v46, 4  ;;  %v5168_v54 = vperm.slane %v304_v1, %v4920_v15  ;;  %v340_v59 = vsel %vm26_vm0, %v339_v36, %v314_v46  ;;  %7921 = vst [vmem:[#allocation7_spill] sm:$0xff] %v5225_v50 }
  0xa3   :  { %v285_v52 = vrot.slane %v258_v0, 4  ;;  %v5171_v55 = vperm.slane %v248_v41, %v4920_v15  ;;  %v284_v58 = vsel %vm26_vm0, %v283_v39, %v258_v0  ;;  %v5189_v63 = vperm.slane %v340_v59, %v4922_v16 }
  0xa4   :  { %v4116_v56 = vpop.permute.xlu0 %4115  ;;  %v342_v13 = vsel %vm26_vm0, %v326_v29, %v341_v51  ;;  %v5186_v34 = vperm.slane %v284_v58, %v4922_v16  ;;  %v4123_v6 = vunpack.i.h.bf16 %v4121_v53  ;;  %v4122_v9 = vunpack.i.l.bf16 %v4121_v53 }
  0xa5   :  { %v4118_v2 = vunpack.i.h.bf16 %v4116_v56  ;;  %v4117_v7 = vunpack.i.l.bf16 %v4116_v56  ;;  %v286_v60 = vsel %vm26_vm0, %v270_v30, %v285_v52  ;;  %v5183_v26 = vperm.slane %v342_v13, %v4922_v16 }
  0xa6   :  { %v5180_v44 = vperm.slane %v286_v60, %v4922_v16  ;;  %v4214_v18 = vpack.i.bf16 %v5189_v63, %v5186_v34  ;;  %v273_v24 = vrot.slane %v5171_v55, 4  ;;  %v329_v27 = vrot.slane %v5168_v54, 4 }
  0xa7   :  { %v511_v3 = vrot.slane %v4118_v2, 4  ;;  %v455_v8 = vrot.slane %v4117_v7, 4  ;;  %v523_v30 = vrot.slane %v4123_v6, 4  ;;  %v467_v31 = vrot.slane %v4122_v9, 4 }
  0xa8   :  { %v4219_v17 = vpack.i.bf16 %v5183_v26, %v5180_v44  ;;  %4215 = vrot.lane.b32.xlu2 %v4214_v18, %s4842_s5  ;;  %v274_v32 = vsel %vm26_vm0, %v5199_v23, %v273_v24  ;;  %v330_v35 = vsel %vm26_vm0, %v5196_v20, %v329_v27  ;;  %v510_v36 = vsel %vm26_vm0, %v509_v10, %v4118_v2 }
  0xa9   :  { %v512_v28 = vsel %vm26_vm0, %v4128_v47, %v511_v3  ;;  %v456_v29 = vsel %vm26_vm0, %v4127_v48, %v455_v8  ;;  %v454_v37 = vsel %vm26_vm0, %v453_v11, %v4117_v7  ;;  %v5214_v39 = vperm.slane %v274_v32, %v4922_v16  ;;  %v5241_v8 = vpop.permute.xlu1 %4145 }
  0xaa   :  { %4220 = vrot.lane.b32.xlu1 %v4219_v17, %s4844_s11  ;;  %v5217_v40 = vperm.slane %v330_v35, %v4922_v16  ;;  %v520_v43 = vperm.slane %v512_v28, %v4920_v15  ;;  %v464_v45 = vperm.slane %v456_v29, %v4920_v15  ;;  %v5228_v51 = vperm.slane %v510_v36, %v4920_v15 }
  0xab   :  { %v5231_v52 = vperm.slane %v454_v37, %v4920_v15 }
  0xac   :  { %v4131_v42 = vpop.permute.xlu0 %4130  ;;  %v4209_v1 = vpack.i.bf16 %v5217_v40, %v5214_v39  ;;  %v491_v2 = vrot.slane %v464_v45, 4  ;;  %v547_v7 = vrot.slane %v520_v43, 4  ;;  %v535_v27 = vrot.slane %v5228_v51, 4 }
  0xad   :  { %v4133_v46 = vunpack.i.h.bf16 %v4131_v42  ;;  %v4132_v0 = vunpack.i.l.bf16 %v4131_v42 }
  0xae   :  { %4210 = vrot.lane.b32.xlu0 %v4209_v1, %s4843_s6 }
  0xaf   :  { %v521_v41 = vrot.slane %v4133_v46, 4  ;;  %v524_v47 = vsel %vm26_vm0, %v4133_v46, %v523_v30  ;;  %v465_v48 = vrot.slane %v4132_v0, 4  ;;  %v468_v49 = vsel %vm26_vm0, %v4132_v0, %v467_v31 }
  0xb0   :  { %v532_v56 = vperm.slane %v524_v47, %v4920_v15  ;;  %v476_v58 = vperm.slane %v468_v49, %v4920_v15 }
  0xb1   :  { %v522_v59 = vsel %vm26_vm0, %v521_v41, %v4123_v6  ;;  %v466_v53 = vsel %vm26_vm0, %v465_v48, %v4122_v9  ;;  %v479_v6 = vrot.slane %v5231_v52, 4  ;;  %v5287_v1 = vpop.permute.xlu1 %4160 }
  0xb2   :  { %v545_v60 = vrot.slane %v532_v56, 4  ;;  %v5239_v13 = vperm.slane %v466_v53, %v4920_v15  ;;  %v489_v3 = vrot.slane %v476_v58, 4  ;;  %v5244_v10 = vperm.slane %v522_v59, %v4920_v15 }
  0xb3   :  { %v492_v11 = vsel %vm26_vm0, %v476_v58, %v491_v2  ;;  %v548_v17 = vsel %vm26_vm0, %v532_v56, %v547_v7  ;;  %v327_v58 = vrot.slane %v5196_v20, 4  ;;  %v271_v59 = vrot.slane %v5199_v23, 4 }
  0xb4   :  { %v5249_v18 = vpop.permute.xlu0 %4140  ;;  %v5252_v9 = vperm.slane %v492_v11, %v4922_v16  ;;  %v5255_v24 = vperm.slane %v548_v17, %v4922_v16  ;;  %v490_v28 = vsel %vm26_vm0, %v489_v3, %v464_v45  ;;  %v546_v29 = vsel %vm26_vm0, %v545_v60, %v520_v43  ;;  %v4181_v45 = vpop.permute.xlu2 %4180 }
  0xb5   :  { %v5263_v31 = vperm.slane %v490_v28, %v4922_v16  ;;  %v5266_v32 = vperm.slane %v546_v29, %v4922_v16  ;;  %v480_v35 = vsel %vm26_vm0, %v5239_v13, %v479_v6  ;;  %v536_v37 = vsel %vm26_vm0, %v5244_v10, %v535_v27 }
  0xb6   :  { %v4234_v30 = vpack.i.bf16 %v5255_v24, %v5252_v9  ;;  %v5271_v36 = vperm.slane %v480_v35, %v4922_v16  ;;  %v5279_v43 = vperm.slane %v536_v37, %v4922_v16  ;;  %v4183_v47 = vunpack.i.h.bf16 %v4181_v45 }
  0xb7   :  { %v4229_v42 = vpack.i.bf16 %v5266_v32, %v5263_v31  ;;  %v4182_v48 = vunpack.i.l.bf16 %v4181_v45  ;;  %v272_v27 = vsel %vm26_vm0, %v271_v59, %v5171_v55  ;;  %v328_v28 = vsel %vm26_vm0, %v327_v58, %v5168_v54 }
  0xb8   :  { %4235 = vrot.lane.b32.xlu0 %v4234_v30, %s4844_s11  ;;  %v4224_v46 = vpack.i.bf16 %v5279_v43, %v5271_v36  ;;  %v913_v7 = vrot.slane %v4183_v47, 4  ;;  %v477_v29 = vrot.slane %v5239_v13, 4  ;;  %v299_v30 = vrot.slane %v5186_v34, 4 }
  0xb9   :  { %4230 = vrot.lane.b32.xlu1 %v4229_v42, %s4842_s5  ;;  %v4176_v56 = vpop.permute.xlu1 %4175  ;;  %v857_v60 = vrot.slane %v4182_v48, 4  ;;  %v533_v55 = vrot.slane %v5244_v10, 4  ;;  %v355_v54 = vrot.slane %v5189_v63, 4  ;;  %v5308_v13 = vperm.slane %v272_v27, %v4922_v16 }
  0xba   :  { %4225 = vrot.lane.b32.xlu2 %v4224_v46, %s4843_s6  ;;  %v4178_v17 = vunpack.i.h.bf16 %v4176_v56  ;;  %v4177_v6 = vunpack.i.l.bf16 %v4176_v56 }
  0xbc   :  { %v5285_v0 = vpop.permute.xlu0 %4155  ;;  %v5289_v41 = vpop.permute.xlu2 %4190  ;;  %v927_v42 = vrot.slane %v4178_v17, 4  ;;  %v871_v45 = vrot.slane %v4177_v6, 4 }
  0xc1   :  { %v5315_v59 = vpop.permute.xlu1 %4200 }
  0xc4   :  { %v4171_v49 = vpop.permute.xlu0 %4170  ;;  %v5303_v46 = vpop.permute.xlu2 %4205 }
  0xc5   :  { %v4173_v53 = vunpack.i.h.bf16 %v4171_v49  ;;  %v4172_v2 = vunpack.i.l.bf16 %v4171_v49  ;;  %v7849_v63 = vunpack.i.h.bf16 %v5303_v46 }
  0xc7   :  { %v915_v3 = vrot.slane %v4173_v53, 4  ;;  %v859_v11 = vrot.slane %v4172_v2, 4  ;;  %v914_v35 = vsel %vm26_vm0, %v913_v7, %v4173_v53  ;;  %v858_v37 = vsel %vm26_vm0, %v857_v60, %v4172_v2 }
  0xc8   :  { %v5318_v53 = vperm.slane %v914_v35, %v4920_v15  ;;  %v5321_v10 = vperm.slane %v858_v37, %v4920_v15  ;;  %v478_v2 = vsel %vm26_vm0, %v477_v29, %v5231_v52 }
  0xc9   :  { %v916_v20 = vsel %vm26_vm0, %v4183_v47, %v915_v3  ;;  %v860_v23 = vsel %vm26_vm0, %v4182_v48, %v859_v11  ;;  %v5311_v47 = vperm.slane %v328_v28, %v4922_v16 }
  0xca   :  { %v924_v34 = vperm.slane %v916_v20, %v4920_v15  ;;  %v868_v48 = vperm.slane %v860_v23, %v4920_v15 }
  0xcb   :  { %7922 = vst [vmem:[#allocation8_spill] sm:$0xff] %v5311_v47 }
  0xcc   :  { %v4186_v49 = vpop.permute.xlu0 %4185  ;;  %v951_v52 = vrot.slane %v924_v34, 4 }
  0xcd   :  { %v4188_v56 = vunpack.i.h.bf16 %v4186_v49  ;;  %v4187_v58 = vunpack.i.l.bf16 %v4186_v49  ;;  %v895_v49 = vrot.slane %v868_v48, 4 }
  0xcf   :  { %v925_v7 = vrot.slane %v4188_v56, 4  ;;  %v928_v60 = vsel %vm26_vm0, %v4188_v56, %v927_v42  ;;  %v869_v3 = vrot.slane %v4187_v58, 4  ;;  %v872_v11 = vsel %vm26_vm0, %v4187_v58, %v871_v45 }
  0xd0   :  { %v936_v27 = vperm.slane %v928_v60, %v4920_v15  ;;  %v880_v28 = vperm.slane %v872_v11, %v4920_v15  ;;  %v939_v58 = vrot.slane %v5318_v53, 4  ;;  %v883_v60 = vrot.slane %v5321_v10, 4 }
  0xd1   :  { %v926_v35 = vsel %vm26_vm0, %v925_v7, %v4178_v17  ;;  %v870_v37 = vsel %vm26_vm0, %v869_v3, %v4177_v6  ;;  %v1131_v3 = vrot.slane %v7849_v63, 4  ;;  %v353_v63 = vrot.slane %v5217_v40, 4 }
  0xd2   :  { %v5335_v29 = vperm.slane %v926_v35, %v4920_v15  ;;  %v949_v42 = vrot.slane %v936_v27, 4  ;;  %v5338_v45 = vperm.slane %v870_v37, %v4920_v15  ;;  %v893_v56 = vrot.slane %v880_v28, 4 }
  0xd3   :  { %v896_v11 = vsel %vm26_vm0, %v880_v28, %v895_v49  ;;  %v952_v17 = vsel %vm26_vm0, %v936_v27, %v951_v52  ;;  %v7925_v35 = vunpack.i.h.bf16 %v5315_v59  ;;  %v7926_v40 = vunpack.i.l.bf16 %v5315_v59 }
  0xd4   :  { %v5345_v6 = vperm.slane %v896_v11, %v4922_v16  ;;  %v5348_v7 = vperm.slane %v952_v17, %v4922_v16  ;;  %v5353_v37 = vpop.permute.xlu0 %4195  ;;  %v894_v23 = vsel %vm26_vm0, %v893_v56, %v868_v48  ;;  %v950_v20 = vsel %vm26_vm0, %v949_v42, %v924_v34 }
  0xd5   :  { %v884_v27 = vsel %vm26_vm0, %v5338_v45, %v883_v60  ;;  %v940_v28 = vsel %vm26_vm0, %v5335_v29, %v939_v58  ;;  %v5364_v52 = vperm.slane %v894_v23, %v4922_v16  ;;  %v5367_v11 = vperm.slane %v950_v20, %v4922_v16 }
  0xd6   :  { %v4249_v49 = vpack.i.bf16 %v5348_v7, %v5345_v6  ;;  %v5370_v17 = vperm.slane %v884_v27, %v4922_v16  ;;  %v5373_v34 = vperm.slane %v940_v28, %v4922_v16  ;;  %v7923_v48 = vunpack.i.l.bf16 %v5303_v46 }
  0xd7   :  { %v4198_v56 = vunpack.i.h.bf16 %v5353_v37  ;;  %v4197_v58 = vunpack.i.l.bf16 %v5353_v37  ;;  %v4244_v23 = vpack.i.bf16 %v5367_v11, %v5364_v52  ;;  %v300_v20 = vsel %vm26_vm0, 0.0, %v299_v30 }
  0xd8   :  { %v1075_v42 = vrot.slane %v7923_v48, 4  ;;  %4250 = vrot.lane.b32.xlu0 %v4249_v49, %s4844_s11  ;;  %v356_v60 = vsel %vm26_vm0, 0.0, %v355_v54  ;;  %v297_v27 = vrot.slane %v5214_v39, 4  ;;  %v4239_v28 = vpack.i.bf16 %v5373_v34, %v5370_v17 }
  0xd9   :  { %v4193_v48 = vunpack.i.h.bf16 %v5289_v41  ;;  %v534_v37 = vsel %vm26_vm0, %v533_v55, %v5228_v51  ;;  %4245 = vrot.lane.b32.xlu1 %v4244_v23, %s4842_s5  ;;  %v4192_v49 = vunpack.i.l.bf16 %v5289_v41  ;;  %v295_v30 = vrot.slane %v5308_v13, 4 }
  0xda   :  { %v351_v54 = vrot.slane %v5311_v47, 4  ;;  %v5396_v39 = vperm.slane %v478_v2, %v4922_v16  ;;  %4240 = vrot.lane.b32.xlu2 %v4239_v28, %s4843_s6  ;;  %v1119_v62 = vrot.slane %v7925_v35, 4  ;;  %v1063_v50 = vrot.slane %v7926_v40, 4 }
  0xdb   :  { %v1132_v51 = vsel %vm26_vm0, %v1131_v3, %v4198_v56  ;;  %v1076_v55 = vsel %vm26_vm0, %v1075_v42, %v4197_v58  ;;  %v503_v41 = vrot.slane %v5271_v36, 4  ;;  %v559_v23 = vrot.slane %v5279_v43, 4 }
  0xdc   :  { %7924 = vst [vmem:[#allocation9_spill] sm:$0xff] %v5396_v39  ;;  %v5408_v47 = vperm.slane %v534_v37, %v4922_v16  ;;  %v4264_v2 = vpack.i.bf16 %v356_v60, %v300_v20  ;;  %v298_v28 = vsel %vm26_vm0, 0.0, %v297_v27  ;;  %v354_v5 = vsel %vm26_vm0, 0.0, %v353_v63 }
  0xdd   :  { %v296_v35 = vsel %vm26_vm0, 0.0, %v295_v30  ;;  %v352_v40 = vsel %vm26_vm0, 0.0, %v351_v54  ;;  %v5415_v3 = vperm.slane %v1132_v51, %v4920_v15  ;;  %v5418_v42 = vperm.slane %v1076_v55, %v4920_v15 }
  0xde   :  { %7927 = vst [vmem:[#allocation10_spill] sm:$0xff] %v5408_v47  ;;  %v1121_v36 = vrot.slane %v4193_v48, 4  ;;  %v1120_v43 = vsel %vm26_vm0, %v1119_v62, %v4193_v48  ;;  %v1064_v37 = vsel %vm26_vm0, %v1063_v50, %v4192_v49  ;;  %v501_v20 = vrot.slane %v5396_v39, 4 }
  0xdf   :  { %v4259_v63 = vpack.i.bf16 %v354_v5, %v298_v28  ;;  %v504_v60 = vsel %vm26_vm0, 0.0, %v503_v41  ;;  %v560_v27 = vsel %vm26_vm0, 0.0, %v559_v23  ;;  %v557_v30 = vrot.slane %v5408_v47, 4 }
  0xe0   :  { %4265 = vrot.lane.b32.xlu0 %v4264_v2, %s4847_s26  ;;  %v4254_v54 = vpack.i.bf16 %v352_v40, %v296_v35  ;;  %v301_v51 = vrot.slane %v5180_v44, 4  ;;  %v357_v55 = vrot.slane %v5183_v26, 4  ;;  %v5431_v62 = vperm.slane %v1120_v43, %v4920_v15 }
  0xe1   :  { %4260 = vrot.lane.b32.xlu1 %v4259_v63, %s4845_s16  ;;  %v1070_v50 = vperm.slane %v1064_v37, %v4920_v15  ;;  %v1143_v5 = vrot.slane %v5415_v3, 4  ;;  %v1087_v48 = vrot.slane %v5418_v42, 4  ;;  %v1065_v41 = vrot.slane %v4192_v49, 4 }
  0xe2   :  { %4255 = vrot.lane.b32.xlu2 %v4254_v54, %s4846_s23  ;;  %v4279_v23 = vpack.i.bf16 %v560_v27, %v504_v60  ;;  %v502_v2 = vsel %vm26_vm0, 0.0, %v501_v20  ;;  %v7928_v44 = vunpack.i.h.bf16 %v5315_v59  ;;  %v1133_v28 = vrot.slane %v4198_v56, 4 }
  0xe3   :  { %v1077_v35 = vrot.slane %v4197_v58, 4  ;;  %v558_v40 = vsel %vm26_vm0, 0.0, %v557_v30  ;;  %v881_v43 = vrot.slane %v5338_v45, 4  ;;  %v1145_v37 = vrot.slane %v5431_v62, 4 }
  0xe4   :  { %v1122_v26 = vsel %vm26_vm0, %v7928_v44, %v1121_v36  ;;  %v302_v63 = vsel %vm26_vm0, 0.0, %v301_v51  ;;  %v358_v49 = vsel %vm26_vm0, 0.0, %v357_v55  ;;  %v937_v60 = vrot.slane %v5335_v29, 4 }
  0xe5   :  { %v507_v20 = vrot.slane %v5252_v9, 4  ;;  %v1088_v27 = vsel %vm26_vm0, %v1087_v48, %v1070_v50  ;;  %v1144_v56 = vsel %vm26_vm0, %v1143_v5, %v5431_v62  ;;  %v4274_v58 = vpack.i.bf16 %v558_v40, %v502_v2 }
  0xe6   :  { %v907_v36 = vrot.slane %v5370_v17, 4  ;;  %v963_v45 = vrot.slane %v5373_v34, 4  ;;  %v563_v30 = vrot.slane %v5255_v24, 4  ;;  %v7929_v54 = vunpack.i.h.bf16 %v5303_v46 }
  0xe7   :  { %v7930_v29 = vunpack.i.l.bf16 %v5303_v46  ;;  %v505_v55 = vrot.slane %v5263_v31, 4  ;;  %v561_v62 = vrot.slane %v5266_v32, 4  ;;  %v4269_v5 = vpack.i.bf16 %v358_v49, %v302_v63 }
  0xe8   :  { %v1134_v51 = vsel %vm26_vm0, %v7929_v54, %v1133_v28  ;;  %4280 = vrot.lane.b32.xlu0 %v4279_v23, %s4845_s16  ;;  %v5464_v17 = vperm.slane %v1088_v27, %v4922_v16  ;;  %v5467_v24 = vperm.slane %v1144_v56, %v4922_v16  ;;  %v882_v34 = vsel %vm26_vm0, %v881_v43, %v5321_v10 }
  0xe9   :  { %v1078_v9 = vsel %vm26_vm0, %v7930_v29, %v1077_v35  ;;  %v7931_v46 = vunpack.i.l.bf16 %v5315_v59  ;;  %v1089_v2 = vrot.slane %v1070_v50, 4  ;;  %4275 = vrot.lane.b32.xlu1 %v4274_v58, %s4846_s23  ;;  %v508_v31 = vsel %vm26_vm0, 0.0, %v507_v20 }
  0xea   :  { %v938_v32 = vsel %vm26_vm0, %v937_v60, %v5318_v53  ;;  %v1142_v23 = vperm.slane %v1134_v51, %v4920_v15  ;;  %v1086_v44 = vperm.slane %v1078_v9, %v4920_v15  ;;  %4270 = vrot.lane.b32.xlu2 %v4269_v5, %s4849_s28  ;;  %v908_v10 = vsel %vm26_vm0, 0.0, %v907_v36 }
  0xeb   :  { %v1066_v48 = vsel %vm26_vm0, %v7931_v46, %v1065_v41  ;;  %v964_v59 = vsel %vm26_vm0, 0.0, %v963_v45  ;;  %v564_v41 = vsel %vm26_vm0, 0.0, %v563_v30  ;;  %v506_v50 = vsel %vm26_vm0, 0.0, %v505_v55 }
  0xec   :  { %v562_v28 = vsel %vm26_vm0, 0.0, %v561_v62  ;;  %v5487_v35 = vperm.slane %v882_v34, %v4922_v16  ;;  %v1111_v53 = vrot.slane %v5464_v17, 4  ;;  %v1167_v40 = vrot.slane %v5467_v24, 4 }
  0xed   :  { %v5492_v43 = vperm.slane %v938_v32, %v4922_v16  ;;  %v1130_v63 = vperm.slane %v1122_v26, %v4920_v15  ;;  %v1074_v49 = vperm.slane %v1066_v48, %v4920_v15  ;;  %v4299_v60 = vpack.i.bf16 %v964_v59, %v908_v10 }
  0xee   :  { %7932 = vst [vmem:[#allocation11_spill] sm:$0xff] %v5487_v35  ;;  %v4289_v20 = vpack.i.bf16 %v564_v41, %v508_v31  ;;  %v4284_v27 = vpack.i.bf16 %v562_v28, %v506_v50  ;;  %v1099_v56 = vrot.slane %v1086_v44, 4  ;;  %v1155_v58 = vrot.slane %v1142_v23, 4  ;;  %v5534_v50 = vld [vmem:[%s7844_s0 + $0x2] sm:$0xff]  ;;  %v5539_v28 = vld [vmem:[%s7844_s0 + $0xa] sm:$0xff] }
  0xef   :  { %7933 = vst [vmem:[#allocation12_spill] sm:$0xff] %v5492_v43  ;;  %v905_v36 = vrot.slane %v5487_v35, 4  ;;  %v909_v45 = vrot.slane %v5364_v52, 4  ;;  %v1090_v30 = vsel %vm26_vm0, %v5418_v42, %v1089_v2  ;;  %v1146_v54 = vsel %vm26_vm0, %v5415_v3, %v1145_v37 }
  0xf0   :  { %4300 = vrot.lane.b32.xlu0 %v4299_v60, %s4845_s16  ;;  %v1112_v26 = vsel %vm26_vm0, 0.0, %v1111_v53  ;;  %v1168_v51 = vsel %vm26_vm0, 0.0, %v1167_v40  ;;  %v961_v29 = vrot.slane %v5492_v43, 4  ;;  %v965_v9 = vrot.slane %v5367_v11, 4 }
  0xf1   :  { %v1157_v55 = vrot.slane %v1130_v63, 4  ;;  %v1101_v62 = vrot.slane %v1074_v49, 4  ;;  %4290 = vrot.lane.b32.xlu1 %v4289_v20, %s4849_s28  ;;  %v1100_v52 = vsel %vm26_vm0, %v1099_v56, %v1074_v49  ;;  %v1156_v42 = vsel %vm26_vm0, %v1155_v58, %v1130_v63  ;;  %v5551_v63 = vld [vmem:[%s7844_s0 + $0x32] sm:$0xff]  ;;  %v5556_v49 = vld [vmem:[%s7844_s0 + $0x3a] sm:$0xff] }
  0xf2   :  { %4285 = vrot.lane.b32.xlu2 %v4284_v27, %s4847_s26  ;;  %v5512_v3 = vperm.slane %v1090_v30, %v4922_v16  ;;  %v5515_v37 = vperm.slane %v1146_v54, %v4922_v16  ;;  %v4314_v5 = vpack.i.bf16 %v1168_v51, %v1112_v26  ;;  %v906_v34 = vsel %vm26_vm0, 0.0, %v905_v36  ;;  %v5570_v27 = vld [vmem:[%s7844_s0 + $0x4a] sm:$0xff]  ;;  %v5575_v56 = vld [vmem:[%s7844_s0 + $0x52] sm:$0xff] }
  0xf3   :  { %v962_v11 = vsel %vm26_vm0, 0.0, %v961_v29  ;;  %v910_v46 = vsel %vm26_vm0, 0.0, %v909_v45  ;;  %v966_v48 = vsel %vm26_vm0, 0.0, %v965_v9  ;;  %v5522_v2 = vperm.slane %v1100_v52, %v4922_v16 }
  0xf4   :  { %v5525_v31 = vperm.slane %v1156_v42, %v4922_v16  ;;  %v1102_v32 = vsel %vm26_vm0, %v1086_v44, %v1101_v62  ;;  %v1113_v10 = vrot.slane %v5512_v3, 4  ;;  %v1169_v59 = vrot.slane %v5515_v37, 4 }
  0xf5   :  { %v1158_v41 = vsel %vm26_vm0, %v1142_v23, %v1157_v55  ;;  %v4294_v53 = vpack.i.bf16 %v962_v11, %v906_v34  ;;  %v4304_v44 = vpack.i.bf16 %v966_v48, %v910_v46  ;;  %v911_v40 = vrot.slane %v5345_v6, 4  ;;  %v5546_v23 = vld [vmem:[%s7844_s0 + $0x1a] sm:$0xff]  ;;  %v5565_v6 = vld [vmem:[%s7844_s0 + $0x22] sm:$0xff] }
  0xf6   :  { %v967_v60 = vrot.slane %v5348_v7, 4  ;;  %v5560_v20 = vperm.slane %v1102_v32, %v4922_v16  ;;  %v1253_v7 = vrot.slane %v5551_v63, 4  ;;  %v1309_v58 = vrot.slane %v5556_v49, 4 }
  0xf7   :  { %v4329_v36 = vpack.i.bf16 %v5525_v31, %v5522_v2  ;;  %v1166_v45 = vperm.slane %v1158_v41, %v4922_v16  ;;  %v1265_v30 = vrot.slane %v5570_v27, 4  ;;  %v1321_v54 = vrot.slane %v5575_v56, 4 }
  0xf8   :  { %4315 = vrot.lane.b32.xlu0 %v4314_v5, %s4846_s23  ;;  %v1114_v26 = vsel %vm26_vm0, 0.0, %v1113_v10  ;;  %v1170_v51 = vsel %vm26_vm0, 0.0, %v1169_v59  ;;  %v1254_v29 = vsel %vm26_vm0, %v1253_v7, %v5534_v50  ;;  %v1310_v9 = vsel %vm26_vm0, %v1309_v58, %v5539_v28 }
  0xf9   :  { %4295 = vrot.lane.b32.xlu1 %v4294_v53, %s4846_s23  ;;  %v1260_v55 = vperm.slane %v1254_v29, %v4920_v15  ;;  %v1266_v62 = vsel %vm26_vm0, %v1265_v30, %v5546_v23  ;;  %v1316_v52 = vperm.slane %v1310_v9, %v4920_v15  ;;  %v1322_v42 = vsel %vm26_vm0, %v1321_v54, %v5565_v6 }
  0xfa   :  { %4305 = vrot.lane.b32.xlu2 %v4304_v44, %s4847_s26  ;;  %v912_v5 = vsel %vm26_vm0, 0.0, %v911_v40  ;;  %v968_v34 = vsel %vm26_vm0, 0.0, %v967_v60  ;;  %v1117_v11 = vrot.slane %v5560_v20, 4  ;;  %v1272_v46 = vperm.slane %v1266_v62, %v4920_v15 }
  0xfb   :  { %v1328_v48 = vperm.slane %v1322_v42, %v4920_v15  ;;  %v1279_v32 = vrot.slane %v1260_v55, 4  ;;  %v1335_v10 = vrot.slane %v1316_v52, 4  ;;  %v4324_v59 = vpack.i.bf16 %v1170_v51, %v1114_v26 }
  0xfc   :  { %v1173_v41 = vrot.slane %v1166_v45, 4  ;;  %v4309_v53 = vpack.i.bf16 %v968_v34, %v912_v5  ;;  %v1118_v58 = vsel %vm26_vm0, 0.0, %v1117_v11  ;;  %v1277_v54 = vrot.slane %v1272_v46, 4 }
  0xfd   :  { %v1280_v44 = vsel %vm26_vm0, %v1272_v46, %v1279_v32  ;;  %v1336_v7 = vsel %vm26_vm0, %v1328_v48, %v1335_v10  ;;  %v1267_v26 = vrot.slane %v5546_v23, 4  ;;  %v1333_v51 = vrot.slane %v1328_v48, 4 }
  0xfe   :  { %v1288_v40 = vperm.slane %v1280_v44, %v4922_v16  ;;  %v1344_v60 = vperm.slane %v1336_v7, %v4922_v16  ;;  %v1174_v30 = vsel %vm26_vm0, 0.0, %v1173_v41  ;;  %v1311_v9 = vrot.slane %v5539_v28, 4 }
  0xff   :  { %v1323_v62 = vrot.slane %v5565_v6, 4  ;;  %v4319_v42 = vpack.i.bf16 %v5515_v37, %v5512_v3  ;;  %v4339_v5 = vpack.i.bf16 %v1166_v45, %v5560_v20  ;;  %v4344_v11 = vpack.i.bf16 %v1174_v30, %v1118_v58 }
 0x100   :  { %4330 = vrot.lane.b32.xlu0 %v4329_v36, %s4842_s5  ;;  %v1255_v36 = vrot.slane %v5534_v50, 4  ;;  %v1303_v29 = vrot.slane %v1288_v40, 4  ;;  %v1359_v34 = vrot.slane %v1344_v60, 4  ;;  %v1115_v32 = vrot.slane %v5522_v2, 4 }
 0x101   :  { %4310 = vrot.lane.b32.xlu1 %v4309_v53, %s4849_s28  ;;  %v1171_v46 = vrot.slane %v5525_v31, 4  ;;  %v1278_v48 = vsel %vm26_vm0, %v1277_v54, %v1260_v55  ;;  %v1268_v41 = vsel %vm26_vm0, %v5570_v27, %v1267_v26  ;;  %v1312_v3 = vsel %vm26_vm0, %v5556_v49, %v1311_v9 }
 0x102   :  { %4325 = vrot.lane.b32.xlu2 %v4324_v59, %s4845_s16  ;;  %v1256_v10 = vsel %vm26_vm0, %v5551_v63, %v1255_v36  ;;  %v1334_v37 = vsel %vm26_vm0, %v1333_v51, %v1316_v52  ;;  %v1304_v2 = vsel %vm26_vm0, 0.0, %v1303_v29  ;;  %v1320_v31 = vperm.slane %v1312_v3, %v4920_v15 }
 0x103   :  { %v1264_v59 = vperm.slane %v1256_v10, %v4920_v15  ;;  %v1324_v20 = vsel %vm26_vm0, %v5575_v56, %v1323_v62  ;;  %v1360_v45 = vsel %vm26_vm0, 0.0, %v1359_v34  ;;  %v1276_v55 = vperm.slane %v1268_v41, %v4920_v15 }
 0x104   :  { %v1332_v53 = vperm.slane %v1324_v20, %v4920_v15  ;;  %v1347_v7 = vrot.slane %v1320_v31, 4  ;;  %v5641_v52 = vperm.slane %v1278_v48, %v4922_v16  ;;  %v5644_v58 = vperm.slane %v1334_v37, %v4922_v16 }
 0x105   :  { %v1291_v44 = vrot.slane %v1264_v59, 4  ;;  %v1116_v30 = vsel %vm26_vm0, 0.0, %v1115_v32  ;;  %v1172_v54 = vsel %vm26_vm0, 0.0, %v1171_v46  ;;  %v4359_v36 = vpack.i.bf16 %v1360_v45, %v1304_v2 }
 0x106   :  { %v1289_v26 = vrot.slane %v1276_v55, 4  ;;  %v1345_v51 = vrot.slane %v1332_v53, 4  ;;  %v1348_v9 = vsel %vm26_vm0, %v1332_v53, %v1347_v7  ;;  %v1301_v62 = vrot.slane %v5641_v52, 4 }
 0x107   :  { %v1292_v29 = vsel %vm26_vm0, %v1276_v55, %v1291_v44  ;;  %v4334_v34 = vpack.i.bf16 %v1172_v54, %v1116_v30  ;;  %v1356_v32 = vperm.slane %v1348_v9, %v4922_v16  ;;  %v4389_v55 = vpack.i.bf16 %v5565_v6, %v5546_v23 }
 0x108   :  { %4345 = vrot.lane.b32.xlu0 %v4344_v11, %s4849_s28  ;;  %v1300_v11 = vperm.slane %v1292_v29, %v4922_v16  ;;  %v1290_v46 = vsel %vm26_vm0, %v1289_v26, %v1264_v59  ;;  %v1346_v10 = vsel %vm26_vm0, %v1345_v51, %v1320_v31  ;;  %v1302_v48 = vsel %vm26_vm0, 0.0, %v1301_v62  ;;  %v5677_v26 = vpop.permute.xlu2 %4215 }
 0x109   :  { %4320 = vrot.lane.b32.xlu1 %v4319_v42, %s4843_s6  ;;  %v1357_v42 = vrot.slane %v5644_v58, 4  ;;  %v1363_v7 = vrot.slane %v1356_v32, 4  ;;  %v4384_v30 = vpack.i.bf16 %v5539_v28, %v5534_v50  ;;  %7934 = vst [vmem:[#allocation13_spill] sm:$0xff] %v5677_v26  ;;  %v4399_v29 = vpack.i.bf16 %v5575_v56, %v5570_v27 }
 0x10a   :  { %4340 = vrot.lane.b32.xlu2 %v4339_v5, %s4844_s11  ;;  %v4354_v5 = vpack.i.bf16 %v1344_v60, %v1288_v40  ;;  %v1296_v40 = vperm.slane %v1290_v46, %v4922_v16  ;;  %v1352_v60 = vperm.slane %v1346_v10, %v4922_v16  ;;  %v4374_v3 = vpack.i.bf16 %v1356_v32, %v1300_v11 }
 0x10b   :  { %v1358_v41 = vsel %vm26_vm0, 0.0, %v1357_v42  ;;  %v1307_v44 = vrot.slane %v1300_v11, 4  ;;  %v4394_v62 = vpack.i.bf16 %v5556_v49, %v5551_v63 }
 0x10c   :  { %v4349_v37 = vpack.i.bf16 %v1358_v41, %v1302_v48  ;;  %v1305_v2 = vrot.slane %v1296_v40, 4  ;;  %v1361_v20 = vrot.slane %v1352_v60, 4  ;;  %v4364_v53 = vpack.i.bf16 %v1352_v60, %v1296_v40 }
 0x10d   :  { %v1308_v54 = vsel %vm26_vm0, 0.0, %v1307_v44 }
 0x10e   :  { %v1306_v59 = vsel %vm26_vm0, 0.0, %v1305_v2  ;;  %v1362_v31 = vsel %vm26_vm0, 0.0, %v1361_v20 }
 0x10f   :  { %v4369_v45 = vpack.i.bf16 %v1362_v31, %v1306_v59 }
 0x110   :  { %4360 = vrot.lane.b32.xlu0 %v4359_v36, %s4845_s16  ;;  %v1364_v36 = vsel %vm26_vm0, 0.0, %v1363_v7 }
 0x111   :  { %4335 = vrot.lane.b32.xlu1 %v4334_v34, %s4847_s26  ;;  %v4379_v51 = vpack.i.bf16 %v1364_v36, %v1308_v54 }
 0x112   :  { %4355 = vrot.lane.b32.xlu2 %v4354_v5, %s4843_s6 }
 0x114   :  { %v5683_v9 = vpop.permute.xlu2 %4225 }
 0x115   :  { %7935 = vst [vmem:[#allocation14_spill] sm:$0xff] %v5683_v9 }
 0x118   :  { %4375 = vrot.lane.b32.xlu0 %v4374_v3, %s4844_s11 }
 0x119   :  { %4350 = vrot.lane.b32.xlu1 %v4349_v37, %s4846_s23 }
 0x11a   :  { %4370 = vrot.lane.b32.xlu2 %v4369_v45, %s4847_s26 }
 0x11c   :  { %v5692_v34 = vpop.permute.xlu1 %4220 }
 0x11d   :  { %7937 = vst [vmem:[#allocation16_spill] sm:$0xff] %v5692_v34 }
 0x120   :  { %4390 = vrot.lane.b32.xlu0 %v4389_v55, %s4848_s27  ;;  %v5690_v5 = vpop.permute.xlu0 %4210 }
 0x121   :  { %4365 = vrot.lane.b32.xlu1 %v4364_v53, %s4842_s5 }
 0x122   :  { %4385 = vrot.lane.b32.xlu2 %v4384_v30, %s4848_s27 }
 0x129   :  { %4380 = vrot.lane.b32.xlu1 %v4379_v51, %s4849_s28 }
 0x12a   :  { %4400 = vrot.lane.b32.xlu2 %v4399_v29, %s4848_s27  ;;  %v5696_v32 = vpop.permute.xlu0 %4235 }
 0x12b   :  { %7938 = vst [vmem:[#allocation17_spill] sm:$0xff] %v5696_v32  ;;  %v5698_v46 = vpop.permute.xlu1 %4230 }
 0x12c   :  { %7939 = vst [vmem:[#allocation18_spill] sm:$0xff] %v5698_v46 }
 0x131   :  { %4395 = vrot.lane.b32.xlu1 %v4394_v62, %s4848_s27 }
 0x134   :  { %v5688_v42 = vpop.permute.xlu2 %4240 }
 0x135   :  { %7936 = vst [vmem:[#allocation15_spill] sm:$0xff] %v5688_v42 }
 0x13c   :  { %v5694_v11 = vpop.permute.xlu2 %4255 }
 0x144   :  { %v5700_v10 = vpop.permute.xlu2 %4270 }
 0x145   :  { %7940 = vst [vmem:[#allocation19_spill] sm:$0xff] %v5700_v10 }
 0x14a   :  { %v5702_v48 = vpop.permute.xlu0 %4250 }
 0x14b   :  { %7941 = vst [vmem:[#allocation20_spill] sm:$0xff] %v5702_v48  ;;  %v5704_v41 = vpop.permute.xlu1 %4245 }
 0x14c   :  { %7942 = vst [vmem:[#allocation21_spill] sm:$0xff] %v5704_v41  ;;  %v5706_v40 = vpop.permute.xlu2 %4285 }
 0x14d   :  { %7943 = vst [vmem:[#allocation22_spill] sm:$0xff] %v5706_v40 }
 0x152   :  { %v5708_v60 = vpop.permute.xlu0 %4265 }
 0x153   :  { %7944 = vst [vmem:[#allocation23_spill] sm:$0xff] %v5708_v60  ;;  %v5710_v3 = vpop.permute.xlu1 %4260 }
 0x154   :  { %v5714_v2 = vpop.permute.xlu2 %4305 }
 0x155   :  { %7946 = vst [vmem:[#allocation25_spill] sm:$0xff] %v5714_v2 }
 0x15a   :  { %v5712_v37 = vpop.permute.xlu0 %4280 }
 0x15b   :  { %7945 = vst [vmem:[#allocation24_spill] sm:$0xff] %v5712_v37  ;;  %v5716_v20 = vpop.permute.xlu1 %4275 }
 0x15c   :  { %v4326_v45 = vpop.permute.xlu2 %4325 }
 0x15d   :  { %v4328_v2 = vunpack.i.h.bf16 %v4326_v45  ;;  %v4327_v40 = vunpack.i.l.bf16 %v4326_v45 }
 0x162   :  { %v5718_v59 = vpop.permute.xlu0 %4300 }
 0x163   :  { %7947 = vst [vmem:[#allocation26_spill] sm:$0xff] %v5718_v59  ;;  %v5720_v31 = vpop.permute.xlu1 %4290 }
 0x164   :  { %7948 = vst [vmem:[#allocation27_spill] sm:$0xff] %v5720_v31  ;;  %v5724_v44 = vpop.permute.xlu2 %4340 }
 0x16a   :  { %v4316_v55 = vpop.permute.xlu0 %4315 }
 0x16b   :  { %v5722_v53 = vpop.permute.xlu1 %4295  ;;  %v4318_v51 = vunpack.i.h.bf16 %v4316_v55  ;;  %v4317_v29 = vunpack.i.l.bf16 %v4316_v55 }
 0x16c   :  { %v4356_v54 = vpop.permute.xlu2 %4355 }
 0x16d   :  { %v1238_v48 = vsel %vm194_vm1, %v5467_v24, %v4318_v51  ;;  %v1231_v31 = vsel %vm194_vm1, %v5464_v17, %v4317_v29 }
 0x172   :  { %v4331_v7 = vpop.permute.xlu0 %4330 }
 0x173   :  { %v5726_v30 = vpop.permute.xlu1 %4310  ;;  %v4333_v41 = vunpack.i.h.bf16 %v4331_v7  ;;  %v4332_v46 = vunpack.i.l.bf16 %v4331_v7  ;;  %v4357_v7 = vunpack.i.l.bf16 %v4356_v54 }
 0x174   :  { %7949 = vst [vmem:[#allocation28_spill] sm:$0xff] %v5726_v30  ;;  %v5736_v32 = vpop.permute.xlu2 %4370 }
 0x17a   :  { %v5728_v36 = vpop.permute.xlu0 %4345 }
 0x17b   :  { %v4321_v62 = vpop.permute.xlu1 %4320 }
 0x17c   :  { %v4323_v43 = vunpack.i.h.bf16 %v4321_v62  ;;  %v4322_v47 = vunpack.i.l.bf16 %v4321_v62  ;;  %v5747_v45 = vpop.permute.xlu2 %4385 }
 0x17e   :  { %v1239_v10 = vsel %vm196_vm2, %v1238_v48, %v4323_v43  ;;  %v1232_v30 = vsel %vm196_vm2, %v1231_v31, %v4322_v47 }
 0x17f   :  { %v1233_v62 = vsel %vm198_vm3, %v1232_v30, %v4327_v40  ;;  %v1240_v34 = vsel %vm198_vm3, %v1239_v10, %v4328_v2  ;;  %v4342_v40 = vunpack.i.l.bf16 %v5724_v44  ;;  %v4347_v10 = vunpack.i.l.bf16 %v5728_v36 }
 0x180   :  { %v1234_v43 = vsel %vm200_vm4, %v1233_v62, %v4332_v46  ;;  %v1241_v47 = vsel %vm200_vm4, %v1240_v34, %v4333_v41  ;;  %v4358_v2 = vunpack.i.h.bf16 %v4356_v54 }
 0x182   :  { %v4361_v55 = vpop.permute.xlu0 %4360 }
 0x183   :  { %v4336_v24 = vpop.permute.xlu1 %4335  ;;  %v4363_v29 = vunpack.i.h.bf16 %v4361_v55  ;;  %v4362_v62 = vunpack.i.l.bf16 %v4361_v55 }
 0x184   :  { %v4338_v51 = vunpack.i.h.bf16 %v4336_v24  ;;  %v4337_v17 = vunpack.i.l.bf16 %v4336_v24 }
 0x186   :  { %v1235_v48 = vsel %vm202_vm5, %v1234_v43, %v4337_v17  ;;  %v5744_v31 = vsel %vm202_vm5, %v1241_v47, %v4338_v51 }
 0x187   :  { %v1236_v24 = vsel %vm204_vm6, %v1235_v48, %v4342_v40 }
 0x188   :  { %v5754_v51 = vsel %vm206_vm7, %v1236_v24, %v4347_v10  ;;  %v4401_v10 = vpop.permute.xlu2 %4400 }
 0x189   :  { %7950 = vst [vmem:[#allocation29_spill] sm:$0xff] %v5754_v51 }
 0x18a   :  { %v5750_v46 = vpop.permute.xlu0 %4375 }
 0x18b   :  { %v4351_v30 = vpop.permute.xlu1 %4350 }
 0x18c   :  { %v4353_v34 = vunpack.i.h.bf16 %v4351_v30  ;;  %v4352_v41 = vunpack.i.l.bf16 %v4351_v30 }
 0x18e   :  { %v1428_v17 = vsel %vm194_vm1, %v5644_v58, %v4353_v34  ;;  %v1421_v43 = vsel %vm194_vm1, %v5641_v52, %v4352_v41  ;;  %v4403_v41 = vunpack.i.h.bf16 %v4401_v10 }
 0x18f   :  { %v1422_v54 = vsel %vm196_vm2, %v1421_v43, %v4357_v7  ;;  %v1429_v47 = vsel %vm196_vm2, %v1428_v17, %v4358_v2  ;;  %v4372_v7 = vunpack.i.l.bf16 %v5736_v32  ;;  %v4402_v2 = vunpack.i.l.bf16 %v4401_v10 }
 0x190   :  { %v1423_v60 = vsel %vm198_vm3, %v1422_v54, %v4362_v62  ;;  %v1430_v30 = vsel %vm198_vm3, %v1429_v47, %v4363_v29  ;;  %v4377_v62 = vunpack.i.l.bf16 %v5750_v46  ;;  %v1535_v54 = vrot.slane %v4403_v41, 4 }
 0x191   :  { %v1479_v47 = vrot.slane %v4402_v2, 4  ;;  %v4387_v10 = vunpack.i.l.bf16 %v5747_v45 }
 0x192   :  { %v4391_v59 = vpop.permute.xlu0 %4390 }
 0x193   :  { %v4366_v55 = vpop.permute.xlu1 %4365  ;;  %v4393_v34 = vunpack.i.h.bf16 %v4391_v59  ;;  %v4392_v52 = vunpack.i.l.bf16 %v4391_v59 }
 0x194   :  { %v4368_v48 = vunpack.i.h.bf16 %v4366_v55  ;;  %v4367_v40 = vunpack.i.l.bf16 %v4366_v55 }
 0x195   :  { %v1537_v17 = vrot.slane %v4393_v34, 4  ;;  %v1481_v29 = vrot.slane %v4392_v52, 4  ;;  %v1536_v51 = vsel %vm26_vm0, %v1535_v54, %v4393_v34  ;;  %v1480_v37 = vsel %vm26_vm0, %v1479_v47, %v4392_v52 }
 0x196   :  { %v1424_v24 = vsel %vm200_vm4, %v1423_v60, %v4367_v40  ;;  %v5766_v58 = vsel %vm200_vm4, %v1430_v30, %v4368_v48  ;;  %v4388_v40 = vunpack.i.h.bf16 %v5747_v45 }
 0x197   :  { %v1425_v55 = vsel %vm202_vm5, %v1424_v24, %v4372_v7  ;;  %v1538_v30 = vsel %vm26_vm0, %v4403_v41, %v1537_v17  ;;  %v1482_v59 = vsel %vm26_vm0, %v4402_v2, %v1481_v29  ;;  %v1542_v7 = vperm.slane %v1536_v51, %v4920_v15 }
 0x198   :  { %v1426_v60 = vsel %vm204_vm6, %v1425_v55, %v4377_v62  ;;  %v1546_v26 = vperm.slane %v1538_v30, %v4920_v15  ;;  %v1490_v24 = vperm.slane %v1482_v59, %v4920_v15  ;;  %v1486_v41 = vperm.slane %v1480_v37, %v4920_v15 }
 0x199   :  { %v1525_v17 = vrot.slane %v4388_v40, 4  ;;  %v1469_v29 = vrot.slane %v4387_v10, 4  ;;  %v1547_v59 = vrot.slane %v1542_v7, 4 }
 0x19a   :  { %v1559_v42 = vrot.slane %v1546_v26, 4  ;;  %v1503_v34 = vrot.slane %v1490_v24, 4  ;;  %v1491_v51 = vrot.slane %v1486_v41, 4 }
 0x19b   :  { %v5770_v43 = vpop.permute.xlu1 %4380 }
 0x19c   :  { %v4382_v48 = vunpack.i.l.bf16 %v5770_v43 }
 0x19e   :  { %v5786_v2 = vsel %vm206_vm7, %v1426_v60, %v4382_v48 }
 0x1a3   :  { %v4396_v62 = vpop.permute.xlu1 %4395 }
 0x1a4   :  { %v4398_v55 = vunpack.i.h.bf16 %v4396_v62  ;;  %v4397_v45 = vunpack.i.l.bf16 %v4396_v62 }
 0x1a6   :  { %v1523_v54 = vrot.slane %v4398_v55, 4  ;;  %v1467_v52 = vrot.slane %v4397_v45, 4  ;;  %v1470_v47 = vsel %vm26_vm0, %v4397_v45, %v1469_v29  ;;  %v1526_v30 = vsel %vm26_vm0, %v4398_v55, %v1525_v17 }
 0x1a7   :  { %v1478_v37 = vperm.slane %v1470_v47, %v4920_v15  ;;  %v1534_v9 = vperm.slane %v1526_v30, %v4920_v15 }
 0x1a8   :  { %v1468_v60 = vsel %vm26_vm0, %v1467_v52, %v4387_v10  ;;  %v1524_v48 = vsel %vm26_vm0, %v1523_v54, %v4388_v40 }
 0x1a9   :  { %v1474_v62 = vperm.slane %v1468_v60, %v4920_v15  ;;  %v1530_v35 = vperm.slane %v1524_v48, %v4920_v15  ;;  %v1504_v39 = vsel %vm26_vm0, %v1503_v34, %v1478_v37  ;;  %v1560_v29 = vsel %vm26_vm0, %v1559_v42, %v1534_v9 }
 0x1aa   :  { %v1510_v34 = vperm.slane %v1504_v39, %v4922_v16  ;;  %v1566_v42 = vperm.slane %v1560_v29, %v4922_v16  ;;  %v1505_v60 = vrot.slane %v1478_v37, 4  ;;  %v1561_v48 = vrot.slane %v1534_v9, 4 }
 0x1ab   :  { %v1493_v45 = vrot.slane %v1474_v62, 4  ;;  %v1549_v17 = vrot.slane %v1530_v35, 4  ;;  %v1492_v55 = vsel %vm26_vm0, %v1491_v51, %v1474_v62  ;;  %v1548_v47 = vsel %vm26_vm0, %v1547_v59, %v1530_v35 }
 0x1ac   :  { %v5801_v30 = vperm.slane %v1492_v55, %v4922_v16  ;;  %v5804_v10 = vperm.slane %v1548_v47, %v4922_v16  ;;  %v1575_v29 = vrot.slane %v1566_v42, 4  ;;  %v1506_v9 = vsel %vm26_vm0, %v1490_v24, %v1505_v60 }
 0x1ad   :  { %v1494_v40 = vsel %vm26_vm0, %v1486_v41, %v1493_v45  ;;  %v1550_v54 = vsel %vm26_vm0, %v1542_v7, %v1549_v17  ;;  %v1519_v17 = vrot.slane %v1510_v34, 4  ;;  %v1562_v37 = vsel %vm26_vm0, %v1546_v26, %v1561_v48 }
 0x1ae   :  { %v1502_v52 = vperm.slane %v1494_v40, %v4922_v16  ;;  %v1558_v51 = vperm.slane %v1550_v54, %v4922_v16  ;;  %v1515_v35 = vrot.slane %v5801_v30, 4  ;;  %v1571_v59 = vrot.slane %v5804_v10, 4 }
 0x1af   :  { %v4343_v26 = vunpack.i.h.bf16 %v5724_v44  ;;  %v4348_v60 = vunpack.i.h.bf16 %v5728_v36  ;;  %v4373_v44 = vunpack.i.h.bf16 %v5736_v32  ;;  %v4378_v36 = vunpack.i.h.bf16 %v5750_v46 }
 0x1b0   :  { %v4409_v62 = vpack.i.bf16 %v1558_v51, %v1502_v52  ;;  %v1516_v55 = vsel %vm26_vm0, 0.0, %v1515_v35  ;;  %v1572_v41 = vsel %vm26_vm0, 0.0, %v1571_v59  ;;  %v1517_v7 = vrot.slane %v1502_v52, 4 }
 0x1b1   :  { %v4404_v45 = vpack.i.bf16 %v1572_v41, %v1516_v55  ;;  %v1573_v39 = vrot.slane %v1558_v51, 4  ;;  %v1520_v35 = vsel %vm26_vm0, 0.0, %v1519_v17  ;;  %v1576_v52 = vsel %vm26_vm0, 0.0, %v1575_v29 }
 0x1b2   :  { %4410 = vrot.lane.b32.xlu1 %v4409_v62, %s4843_s6  ;;  %v1518_v47 = vsel %vm26_vm0, 0.0, %v1517_v7  ;;  %v1514_v51 = vperm.slane %v1506_v9, %v4922_v16  ;;  %v1570_v59 = vperm.slane %v1562_v37, %v4922_v16  ;;  %v4424_v62 = vpack.i.bf16 %v1576_v52, %v1520_v35 }
 0x1b3   :  { %4405 = vrot.lane.b32.xlu0 %v4404_v45, %s4846_s23  ;;  %v1574_v40 = vsel %vm26_vm0, 0.0, %v1573_v39  ;;  %v4419_v55 = vpack.i.bf16 %v1566_v42, %v1510_v34  ;;  %v1243_v34 = vsel %vm204_vm6, %v5744_v31, %v4343_v26 }
 0x1b4   :  { %v4414_v54 = vpack.i.bf16 %v1574_v40, %v1518_v47  ;;  %v1521_v41 = vrot.slane %v1514_v51, 4  ;;  %v1577_v7 = vrot.slane %v1570_v59, 4  ;;  %v4429_v24 = vpack.i.bf16 %v1570_v59, %v1514_v51 }
 0x1b5   :  { %v5837_v42 = vsel %vm206_vm7, %v1243_v34, %v4348_v60 }
 0x1b6   :  { %4415 = vrot.lane.b32.xlu2 %v4414_v54, %s4845_s16  ;;  %v1522_v48 = vsel %vm26_vm0, 0.0, %v1521_v41  ;;  %v1578_v45 = vsel %vm26_vm0, 0.0, %v1577_v7  ;;  %7951 = vst [vmem:[#allocation30_spill] sm:$0xff] %v5837_v42  ;;  %v7981_v42 = vunpack.i.l.bf16 %v5137_v22 }
 0x1b7   :  { %v4434_v39 = vpack.i.bf16 %v1578_v45, %v1522_v48 }
 0x1ba   :  { %4425 = vrot.lane.b32.xlu1 %v4424_v62, %s4847_s26 }
 0x1bb   :  { %4420 = vrot.lane.b32.xlu0 %v4419_v55, %s4842_s5 }
 0x1be   :  { %4430 = vrot.lane.b32.xlu2 %v4429_v24, %s4844_s11 }
 0x1c2   :  { %1649 = vrot.lane.b32.xlu1 %v5534_v50, %s4850_s29  ;;  %v1432_v50 = vsel %vm202_vm5, %v5766_v58, %v4373_v44 }
 0x1c3   :  { %4435 = vrot.lane.b32.xlu0 %v4434_v39, %s4849_s28  ;;  %v1433_v31 = vsel %vm204_vm6, %v1432_v50, %v4378_v36 }
 0x1c6   :  { %1651 = vrot.lane.b32.xlu2 %v5539_v28, %s4850_s29  ;;  %v4383_v28 = vunpack.i.h.bf16 %v5770_v43 }
 0x1ca   :  { %1655 = vrot.lane.b32.xlu1 %v5565_v6, %s4850_s29  ;;  %v5861_v6 = vsel %vm206_vm7, %v1433_v31, %v4383_v28 }
 0x1cb   :  { %1653 = vrot.lane.b32.xlu0 %v5546_v23, %s4850_s29 }
 0x1ce   :  { %1657 = vrot.lane.b32.xlu2 %v5551_v63, %s4850_s29 }
 0x1d2   :  { %1661 = vrot.lane.b32.xlu1 %v5570_v27, %s4850_s29 }
 0x1d3   :  { %1659 = vrot.lane.b32.xlu0 %v5556_v49, %s4850_s29 }
 0x1d6   :  { %1663 = vrot.lane.b32.xlu2 %v5575_v56, %s4850_s29 }
 0x210   :  { %v4416_v23 = vpop.permute.xlu2 %4415 }
 0x211   :  { %v4418_v47 = vunpack.i.h.bf16 %v4416_v23  ;;  %v4417_v27 = vunpack.i.l.bf16 %v4416_v23 }
 0x218   :  { %v5865_v32 = vpop.permute.xlu2 %4430 }
 0x219   :  { %v4432_v60 = vunpack.i.l.bf16 %v5865_v32 }
 0x220   :  { %v5875_v52 = vpop.permute.xlu2 %1651 }
 0x224   :  { %v4411_v63 = vpop.permute.xlu1 %4410 }
 0x225   :  { %v4406_v46 = vpop.permute.xlu0 %4405  ;;  %v4413_v43 = vunpack.i.h.bf16 %v4411_v63  ;;  %v4412_v29 = vunpack.i.l.bf16 %v4411_v63 }
 0x226   :  { %v4408_v58 = vunpack.i.h.bf16 %v4406_v46  ;;  %v4407_v17 = vunpack.i.l.bf16 %v4406_v46 }
 0x228   :  { %v1642_v49 = vsel %vm194_vm1, %v5804_v10, %v4408_v58  ;;  %v1635_v40 = vsel %vm194_vm1, %v5801_v30, %v4407_v17  ;;  %v1658_v45 = vpop.permute.xlu2 %1657 }
 0x229   :  { %v1643_v9 = vsel %vm196_vm2, %v1642_v49, %v4413_v43  ;;  %v1636_v56 = vsel %vm196_vm2, %v1635_v40, %v4412_v29  ;;  %v1673_v36 = vrot.slane %v1658_v45, 4 }
 0x22a   :  { %v1637_v37 = vsel %vm198_vm3, %v1636_v56, %v4417_v27  ;;  %v1644_v54 = vsel %vm198_vm3, %v1643_v9, %v4418_v47 }
 0x22c   :  { %v4426_v35 = vpop.permute.xlu1 %4425 }
 0x22d   :  { %v4421_v51 = vpop.permute.xlu0 %4420  ;;  %v4428_v55 = vunpack.i.h.bf16 %v4426_v35  ;;  %v4427_v41 = vunpack.i.l.bf16 %v4426_v35 }
 0x22e   :  { %v4423_v59 = vunpack.i.h.bf16 %v4421_v51  ;;  %v4422_v62 = vunpack.i.l.bf16 %v4421_v51 }
 0x230   :  { %v1638_v10 = vsel %vm200_vm4, %v1637_v37, %v4422_v62  ;;  %v1645_v30 = vsel %vm200_vm4, %v1644_v54, %v4423_v59  ;;  %v1664_v58 = vpop.permute.xlu2 %1663 }
 0x231   :  { %v1639_v7 = vsel %vm202_vm5, %v1638_v10, %v4427_v41  ;;  %v5881_v26 = vsel %vm202_vm5, %v1645_v30, %v4428_v55  ;;  %v1741_v47 = vrot.slane %v1664_v58, 4 }
 0x232   :  { %v1640_v34 = vsel %vm204_vm6, %v1639_v7, %v4432_v60 }
 0x234   :  { %v1650_v24 = vpop.permute.xlu1 %1649 }
 0x235   :  { %v5884_v48 = vpop.permute.xlu0 %4435  ;;  %v1675_v23 = vrot.slane %v1650_v24, 4  ;;  %v1674_v46 = vsel %vm26_vm0, %v1673_v36, %v1650_v24 }
 0x236   :  { %v4437_v39 = vunpack.i.l.bf16 %v5884_v48  ;;  %v1680_v29 = vperm.slane %v1674_v46, %v4920_v15 }
 0x237   :  { %v1676_v43 = vsel %vm26_vm0, %v1658_v45, %v1675_v23 }
 0x238   :  { %v1641_v31 = vsel %vm206_vm7, %v1640_v34, %v4437_v39  ;;  %v1699_v35 = vrot.slane %v1680_v29, 4 }
 0x239   :  { %v1875_v28 = vrot.slane %v1641_v31, 4 }
 0x23b   :  { %v5891_v63 = vsel %vm1879_vm8, %v5786_v2, %v1875_v28  ;;  %v1684_v2 = vperm.slane %v1676_v43, %v4920_v15 }
 0x23c   :  { %v1656_v44 = vpop.permute.xlu1 %1655 }
 0x23d   :  { %v1654_v50 = vpop.permute.xlu0 %1653  ;;  %v1742_v51 = vsel %vm26_vm0, %v1741_v47, %v1656_v44  ;;  %v1743_v60 = vrot.slane %v1656_v44, 4  ;;  %v1711_v43 = vrot.slane %v1684_v2, 4 }
 0x23e   :  { %v1687_v17 = vrot.slane %v1654_v50, 4  ;;  %v1748_v7 = vperm.slane %v1742_v51, %v4920_v15 }
 0x23f   :  { %v1744_v46 = vsel %vm26_vm0, %v1664_v58, %v1743_v60  ;;  %v5929_v58 = vld [vmem:[%s7844_s0 + $0x90] sm:$0xff]  ;;  %v5975_v60 = vld [vmem:[%s7844_s0 + $0x80] sm:$0xff] }
 0x240   :  { %v1753_v31 = vrot.slane %v1748_v7, 4 }
 0x244   :  { %v1662_v27 = vpop.permute.xlu1 %1661 }
 0x245   :  { %v1685_v49 = vrot.slane %v1662_v27, 4  ;;  %v1688_v40 = vsel %vm26_vm0, %v1662_v27, %v1687_v17  ;;  %v1660_v9 = vpop.permute.xlu0 %1659  ;;  %v1731_v17 = vrot.slane %v5875_v52, 4  ;;  %v1752_v27 = vperm.slane %v1744_v46, %v4920_v15 }
 0x246   :  { %v1696_v56 = vperm.slane %v1688_v40, %v4920_v15  ;;  %v1729_v37 = vrot.slane %v1660_v9, 4 }
 0x247   :  { %v1686_v54 = vsel %vm26_vm0, %v1685_v49, %v1654_v50  ;;  %v1732_v49 = vsel %vm26_vm0, %v1660_v9, %v1731_v17  ;;  %v5943_v9 = vld [vmem:[%s7844_s0 + $0x60] sm:$0xff] }
 0x248   :  { %v1692_v59 = vperm.slane %v1686_v54, %v4920_v15  ;;  %v1709_v62 = vrot.slane %v1696_v56, 4  ;;  %v1730_v41 = vsel %vm26_vm0, %v1729_v37, %v5875_v52  ;;  %v1712_v40 = vsel %vm26_vm0, %v1696_v56, %v1711_v43  ;;  %v5934_v52 = vld [vmem:[%s7844_s0 + $0x98] sm:$0xff]  ;;  %v5948_v56 = vld [vmem:[%s7844_s0 + $0xa8] sm:$0xff]  ;;  %v5953_v54 = vld [vmem:[%s7844_s0 + $0xb0] sm:$0xff] }
 0x249   :  { %v1736_v39 = vperm.slane %v1730_v41, %v4920_v15  ;;  %v2006_v51 = vrot.slane %v5934_v52, 4  ;;  %v1962_v41 = vrot.slane %v5948_v56, 4 }
 0x24a   :  { %v1697_v55 = vrot.slane %v1692_v59, 4  ;;  %v1700_v10 = vsel %vm26_vm0, %v1692_v59, %v1699_v35  ;;  %v1710_v30 = vsel %vm26_vm0, %v1709_v62, %v1684_v2  ;;  %v1950_v35 = vrot.slane %v5929_v58, 4  ;;  %v5961_v59 = vld [vmem:[%s7844_s0 + $0x68] sm:$0xff] }
 0x24b   :  { %v1708_v24 = vperm.slane %v1700_v10, %v4922_v16  ;;  %v1716_v34 = vperm.slane %v1710_v30, %v4922_v16  ;;  %v1754_v47 = vsel %vm26_vm0, %v1753_v31, %v1736_v39  ;;  %v1740_v62 = vperm.slane %v1732_v49, %v4920_v15 }
 0x24c   :  { %v1698_v45 = vsel %vm26_vm0, %v1697_v55, %v1680_v29  ;;  %v5938_v2 = vperm.slane %v1754_v47, %v4922_v16  ;;  %v1720_v55 = vperm.slane %v1712_v40, %v4922_v16  ;;  %v2018_v10 = vrot.slane %v5953_v54, 4 }
 0x24d   :  { %1790 = vrot.lane.b32.xlu1 %v1708_v24, %s4843_s6  ;;  %v1723_v36 = vrot.slane %v1708_v24, 4  ;;  %v5913_v50 = vperm.slane %v1698_v45, %v4922_v16  ;;  %v1725_v44 = vrot.slane %v1716_v34, 4  ;;  %v1755_v30 = vrot.slane %v1736_v39, 4  ;;  %v5970_v24 = vld [vmem:[%s7844_s0 + $0x78] sm:$0xff] }
 0x24e   :  { %v1951_v45 = vsel %vm26_vm0, %v1950_v35, %v5943_v9  ;;  %v1777_v31 = vrot.slane %v5938_v2, 4  ;;  %v2007_v39 = vsel %vm26_vm0, %v2006_v51, %v5961_v59  ;;  %v1963_v46 = vsel %vm26_vm0, %v1962_v41, %v5970_v24 }
 0x24f   :  { %v1724_v28 = vsel %vm26_vm0, 0.0, %v1723_v36  ;;  %v1721_v23 = vrot.slane %v5913_v50, 4  ;;  %v1726_v37 = vsel %vm26_vm0, 0.0, %v1725_v44  ;;  %v1765_v36 = vrot.slane %v1752_v27, 4 }
 0x250   :  { %1794 = vrot.lane.b32.xlu2 %v1724_v28, %s4845_s16  ;;  %v2019_v44 = vsel %vm26_vm0, %v2018_v10, %v5975_v60  ;;  %v1756_v17 = vsel %vm26_vm0, %v1748_v7, %v1755_v30  ;;  %v2013_v43 = vperm.slane %v2007_v39, %v4920_v15  ;;  %v1778_v47 = vsel %vm26_vm0, 0.0, %v1777_v31 }
 0x251   :  { %v1722_v29 = vsel %vm26_vm0, 0.0, %v1721_v23  ;;  %v1766_v28 = vsel %vm26_vm0, %v1765_v36, %v1740_v62  ;;  %v1957_v23 = vperm.slane %v1951_v45, %v4920_v15  ;;  %v1969_v40 = vperm.slane %v1963_v46, %v4920_v15 }
 0x252   :  { %1786 = vrot.lane.b32.xlu0 %v1722_v29, %s4846_s23  ;;  %v1767_v29 = vrot.slane %v1740_v62, 4  ;;  %v1772_v49 = vperm.slane %v1766_v28, %v4922_v16  ;;  %v1764_v35 = vperm.slane %v1756_v17, %v4922_v16  ;;  %v1964_v51 = vrot.slane %v5970_v24, 4 }
 0x253   :  { %v1976_v41 = vrot.slane %v1957_v23, 4  ;;  %v1974_v7 = vrot.slane %v1969_v40, 4  ;;  %v2032_v30 = vrot.slane %v2013_v43, 4  ;;  %v2020_v62 = vrot.slane %v5975_v60, 4 }
 0x254   :  { %v1781_v45 = vrot.slane %v1772_v49, 4  ;;  %v1768_v36 = vsel %vm26_vm0, %v1752_v27, %v1767_v29  ;;  %v1952_v39 = vrot.slane %v5943_v9, 4  ;;  %v1965_v28 = vsel %vm26_vm0, %v5948_v56, %v1964_v51 }
 0x255   :  { %1802 = vrot.lane.b32.xlu1 %v1726_v37, %s4847_s26  ;;  %v2025_v37 = vperm.slane %v2019_v44, %v4920_v15  ;;  %v1977_v31 = vsel %vm26_vm0, %v1969_v40, %v1976_v41  ;;  %v2008_v44 = vrot.slane %v5961_v59, 4  ;;  %v1975_v17 = vsel %vm26_vm0, %v1974_v7, %v1957_v23 }
 0x256   :  { %v1776_v27 = vperm.slane %v1768_v36, %v4922_v16  ;;  %v2021_v29 = vsel %vm26_vm0, %v5953_v54, %v2020_v62  ;;  %v1782_v40 = vsel %vm26_vm0, 0.0, %v1781_v45  ;;  %v1779_v51 = vrot.slane %v1764_v35, 4 }
 0x257   :  { %v2030_v10 = vrot.slane %v2025_v37, 4  ;;  %v2033_v46 = vsel %vm26_vm0, %v2025_v37, %v2032_v30  ;;  %v6019_v37 = vperm.slane %v1975_v17, %v4922_v16  ;;  %v1985_v23 = vperm.slane %v1977_v31, %v4922_v16 }
 0x258   :  { %1806 = vrot.lane.b32.xlu2 %v1720_v55, %s4844_s11  ;;  %v1973_v7 = vperm.slane %v1965_v28, %v4920_v15  ;;  %v1783_v62 = vrot.slane %v1776_v27, 4  ;;  %v4438_v17 = vunpack.i.h.bf16 %v5884_v48 }
 0x259   :  { %7952 = vst [vmem:[#allocation31_spill] sm:$0xff] %v6019_v37 }
 0x25a   :  { %1798 = vrot.lane.b32.xlu0 %v1716_v34, %s4842_s5  ;;  %v1727_v34 = vrot.slane %v1720_v55, 4 }
 0x25c   :  { %v1728_v55 = vsel %vm26_vm0, 0.0, %v1727_v34  ;;  %v4433_v34 = vunpack.i.h.bf16 %v5865_v32  ;;  %v2041_v32 = vperm.slane %v2033_v46, %v4922_v16 }
 0x25d   :  { %1814 = vrot.lane.b32.xlu1 %v1778_v47, %s4846_s23  ;;  %v2031_v47 = vsel %vm26_vm0, %v2030_v10, %v2013_v43  ;;  %v1953_v43 = vsel %vm26_vm0, %v5929_v58, %v1952_v39  ;;  %v1998_v10 = vrot.slane %v6019_v37, 4  ;;  %v2000_v39 = vrot.slane %v1985_v23, 4 }
 0x25e   :  { %v6022_v41 = vperm.slane %v2031_v47, %v4922_v16  ;;  %v1647_v31 = vsel %vm204_vm6, %v5881_v26, %v4433_v34  ;;  %v2056_v28 = vrot.slane %v2041_v32, 4  ;;  %v1961_v46 = vperm.slane %v1953_v43, %v4920_v15 }
 0x25f   :  { %v1999_v45 = vsel %vm26_vm0, 0.0, %v1998_v10  ;;  %v1986_v47 = vrot.slane %v1973_v7, 4  ;;  %v2001_v26 = vsel %vm26_vm0, 0.0, %v2000_v39  ;;  %v4298_v37 = vunpack.i.h.bf16 %v5722_v53 }
 0x260   :  { %1818 = vrot.lane.b32.xlu2 %v1764_v35, %s4843_s6  ;;  %7953 = vst [vmem:[#allocation32_spill] sm:$0xff] %v6022_v41  ;;  %v2029_v35 = vperm.slane %v2021_v29, %v4920_v15  ;;  %v2054_v30 = vrot.slane %v6022_v41, 4  ;;  %v2057_v34 = vsel %vm26_vm0, 0.0, %v2056_v28  ;;  %v7980_v41 = vld [vmem:[#allocation29_spill] sm:$0xff] }
 0x262   :  { %1810 = vrot.lane.b32.xlu0 %v1728_v55, %s4849_s28  ;;  %v1780_v55 = vsel %vm26_vm0, 0.0, %v1779_v51  ;;  %v2055_v36 = vsel %vm26_vm0, 0.0, %v2054_v30  ;;  %v2042_v29 = vrot.slane %v2029_v35, 4  ;;  %v1988_v51 = vrot.slane %v1961_v46, 4 }
 0x263   :  { %v4439_v30 = vpack.i.bf16 %v2055_v36, %v1999_v45  ;;  %v4449_v45 = vpack.i.bf16 %v2057_v34, %v2001_v26  ;;  %v6085_v26 = vpack.i.bf16 %v5961_v59, %v5943_v9  ;;  %v4142_v9 = vunpack.i.l.bf16 %v5249_v18 }
 0x264   :  { %v1989_v48 = vsel %vm26_vm0, %v1973_v7, %v1988_v51 }
 0x265   :  { %1826 = vrot.lane.b32.xlu1 %v1772_v49, %s4842_s5  ;;  %v2009_v49 = vsel %vm26_vm0, %v5934_v52, %v2008_v44  ;;  %7957 = vst [vmem:[#allocation36_spill] sm:$0xff] %v6085_v26 }
 0x266   :  { %v2017_v44 = vperm.slane %v2009_v49, %v4920_v15  ;;  %v1648_v49 = vsel %vm206_vm7, %v1647_v31, %v4438_v17  ;;  %v1997_v31 = vperm.slane %v1989_v48, %v4922_v16  ;;  %v4444_v17 = vpack.i.bf16 %v2041_v32, %v1985_v23 }
 0x267   :  { %v6074_v23 = vpack.i.bf16 %v5975_v60, %v5970_v24  ;;  %v6079_v32 = vpack.i.bf16 %v5934_v52, %v5929_v58  ;;  %v6093_v24 = vpack.i.bf16 %v5953_v54, %v5948_v56  ;;  %v4137_v52 = vunpack.i.l.bf16 %v5151_v19 }
 0x268   :  { %1830 = vrot.lane.b32.xlu2 %v1782_v40, %s4847_s26  ;;  %v1784_v40 = vsel %vm26_vm0, 0.0, %v1783_v62  ;;  %v2044_v10 = vrot.slane %v2017_v44, 4  ;;  %v2043_v43 = vsel %vm26_vm0, %v2042_v29, %v2017_v44  ;;  %v1876_v62 = vrot.slane %v1648_v49, 4 }
 0x269   :  { %v2049_v39 = vperm.slane %v2043_v43, %v4922_v16  ;;  %7955 = vst [vmem:[#allocation34_spill] sm:$0xff] %v6074_v23  ;;  %v811_v34 = vsel %vm194_vm1, %v5075_v12, %v4137_v52  ;;  %v4147_v54 = vunpack.i.l.bf16 %v5241_v8  ;;  %v4257_v49 = vunpack.i.l.bf16 %v5694_v11  ;;  %v7959_v52 = vld [vmem:[#allocation9_spill] sm:$0xff]  ;;  %v7966_v12 = vld [vmem:[#allocation24_spill] sm:$0xff]  ;;  %v7970_v43 = vld [vmem:[#allocation18_spill] sm:$0xff] }
 0x26a   :  { %1822 = vrot.lane.b32.xlu0 %v1780_v55, %s4845_s16  ;;  %v1987_v55 = vsel %vm26_vm0, %v1986_v47, %v1961_v46  ;;  %v2045_v15 = vsel %vm26_vm0, %v2029_v35, %v2044_v10  ;;  %v6059_v28 = vsel %vm1879_vm8, %v5861_v6, %v1876_v62  ;;  %v2004_v35 = vrot.slane %v1997_v31, 4  ;;  %7956 = vst [vmem:[#allocation35_spill] sm:$0xff] %v6079_v32 }
 0x26b   :  { %v1993_v36 = vperm.slane %v1987_v55, %v4922_v16  ;;  %7954 = vst [vmem:[#allocation33_spill] sm:$0xff] %v6059_v28  ;;  %v2053_v7 = vperm.slane %v2045_v15, %v4922_v16  ;;  %v4077_v55 = vunpack.i.l.bf16 %v5145_v61  ;;  %v4067_v62 = vunpack.i.l.bf16 %v5139_v25 }
 0x26c   :  { %7958 = vst [vmem:[#allocation37_spill] sm:$0xff] %v6093_v24  ;;  %v4232_v56 = vunpack.i.l.bf16 %v7970_v43  ;;  %v1869_v28 = vrot.slane %v7980_v41, 4 }
 0x26d   :  { %1838 = vrot.lane.b32.xlu1 %v1784_v40, %s4849_s28  ;;  %v4454_v46 = vpack.i.bf16 %v2049_v39, %v1993_v36  ;;  %v2060_v44 = vrot.slane %v2053_v7, 4  ;;  %v2002_v47 = vrot.slane %v1993_v36, 4  ;;  %v4464_v29 = vpack.i.bf16 %v2053_v7, %v1997_v31 }
 0x26e   :  { %v2005_v40 = vsel %vm26_vm0, 0.0, %v2004_v35  ;;  %v812_v36 = vsel %vm196_vm2, %v811_v34, %v4142_v9  ;;  %v4277_v31 = vunpack.i.l.bf16 %v5716_v20  ;;  %v4297_v7 = vunpack.i.l.bf16 %v5722_v53  ;;  %v7960_v34 = vld [vmem:[#allocation11_spill] sm:$0xff] }
 0x26f   :  { %v2061_v6 = vsel %vm26_vm0, 0.0, %v2060_v44  ;;  %v2003_v51 = vsel %vm26_vm0, 0.0, %v2002_v47  ;;  %v195_v44 = vsel %vm194_vm1, %v4963_v57, %v4077_v55  ;;  %v813_v47 = vsel %vm198_vm3, %v812_v36, %v4147_v54  ;;  %v7961_v54 = vld [vmem:[#allocation14_spill] sm:$0xff] }
 0x270   :  { %4440 = vrot.lane.b32.xlu2 %v4439_v30, %s4846_s23  ;;  %v4469_v10 = vpack.i.bf16 %v2061_v6, %v2005_v40  ;;  %v4262_v40 = vunpack.i.l.bf16 %v5710_v3  ;;  %v4082_v6 = vunpack.i.l.bf16 %v5143_v14  ;;  %v4212_v57 = vunpack.i.l.bf16 %v5690_v5 }
 0x271   :  { %v621_v9 = vsel %vm194_vm1, %v7959_v52, %v4277_v31  ;;  %v1025_v55 = vsel %vm194_vm1, %v7960_v34, %v4297_v7  ;;  %v7964_v52 = vld [vmem:[#allocation13_spill] sm:$0xff]  ;;  %v4143_v34 = vunpack.i.h.bf16 %v5249_v18  ;;  %v4263_v53 = vunpack.i.h.bf16 %v5710_v3 }
 0x272   :  { %1834 = vrot.lane.b32.xlu0 %v1776_v27, %s4844_s11  ;;  %v2058_v27 = vrot.slane %v2049_v39, 4  ;;  %v4062_v39 = vunpack.i.l.bf16 %v5141_v33  ;;  %v4217_v35 = vunpack.i.l.bf16 %v7964_v52 }
 0x274   :  { %v2059_v15 = vsel %vm26_vm0, 0.0, %v2058_v27  ;;  %v4157_v27 = vunpack.i.l.bf16 %v5285_v0 }
 0x275   :  { %4450 = vrot.lane.b32.xlu1 %v4449_v45, %s4845_s16  ;;  %v4459_v30 = vpack.i.bf16 %v2059_v15, %v2003_v51  ;;  %v4078_v45 = vunpack.i.h.bf16 %v5145_v61  ;;  %v4152_v61 = vunpack.i.l.bf16 %v5177_v38 }
 0x277   :  { %v6129_v51 = vsel %vm194_vm1, %v4972_v4, %v4078_v45  ;;  %v814_v4 = vsel %vm200_vm4, %v813_v47, %v4152_v61  ;;  %v7962_v45 = vld [vmem:[#allocation15_spill] sm:$0xff] }
 0x278   :  { %4455 = vrot.lane.b32.xlu2 %v4454_v46, %s4842_s5  ;;  %v4242_v36 = vunpack.i.l.bf16 %v7962_v45 }
 0x27a   :  { %4445 = vrot.lane.b32.xlu0 %v4444_v17, %s4843_s6  ;;  %v4138_v17 = vunpack.i.h.bf16 %v5151_v19  ;;  %v1026_v61 = vsel %vm196_vm2, %v1025_v55, %v4242_v36  ;;  %v7969_v55 = vld [vmem:[#allocation23_spill] sm:$0xff] }
 0x27b   :  { %v7977_v36 = vld [vmem:[#allocation27_spill] sm:$0xff] }
 0x27d   :  { %4465 = vrot.lane.b32.xlu1 %v4464_v29, %s4844_s11  ;;  %v415_v29 = vsel %vm194_vm1, %v5308_v13, %v4257_v49  ;;  %v4162_v13 = vunpack.i.l.bf16 %v5287_v1  ;;  %v4227_v49 = vunpack.i.l.bf16 %v7961_v54 }
 0x27e   :  { %v416_v48 = vsel %vm196_vm2, %v415_v29, %v4212_v57  ;;  %v7965_v29 = vld [vmem:[#allocation7_spill] sm:$0xff] }
 0x27f   :  { %v622_v7 = vsel %vm196_vm2, %v621_v9, %v4227_v49  ;;  %v4167_v57 = vunpack.i.l.bf16 %v7965_v29  ;;  %v4267_v49 = vunpack.i.l.bf16 %v7969_v55 }
 0x280   :  { %4470 = vrot.lane.b32.xlu2 %v4469_v10, %s4849_s28 }
 0x282   :  { %4460 = vrot.lane.b32.xlu0 %v4459_v30, %s4847_s26  ;;  %v197_v30 = vsel %vm196_vm2, %v195_v44, %v4062_v39  ;;  %v815_v39 = vsel %vm202_vm5, %v814_v4, %v4157_v27  ;;  %v417_v44 = vsel %vm198_vm3, %v416_v48, %v4262_v40  ;;  %v7968_v48 = vld [vmem:[#allocation6_spill] sm:$0xff] }
 0x283   :  { %v199_v47 = vsel %vm198_vm3, %v197_v30, %v4082_v6  ;;  %v816_v9 = vsel %vm204_vm6, %v815_v39, %v4162_v13  ;;  %v4148_v13 = vunpack.i.h.bf16 %v5241_v8 }
 0x284   :  { %v817_v39 = vsel %vm206_vm7, %v816_v9, %v4167_v57  ;;  %v7976_v9 = vld [vmem:[#allocation19_spill] sm:$0xff] }
 0x285   :  { %4480 = vrot.lane.b32.xlu1 %v6074_v23, %s4848_s27  ;;  %v4292_v23 = vunpack.i.l.bf16 %v7977_v36 }
 0x288   :  { %4485 = vrot.lane.b32.xlu2 %v6079_v32, %s4848_s27  ;;  %v7971_v32 = vld [vmem:[#allocation21_spill] sm:$0xff] }
 0x289   :  { %v4247_v40 = vunpack.i.l.bf16 %v7971_v32 }
 0x28a   :  { %4475 = vrot.lane.b32.xlu0 %v6085_v26, %s4848_s27  ;;  %v7979_v26 = vld [vmem:[#allocation20_spill] sm:$0xff] }
 0x28b   :  { %v4252_v16 = vunpack.i.l.bf16 %v7979_v26 }
 0x292   :  { %4490 = vrot.lane.b32.xlu0 %v6093_v24, %s4848_s27 }
 0x2aa   :  { %v1795_v58 = vpop.permute.xlu2 %1794 }
 0x2b2   :  { %v6098_v60 = vpop.permute.xlu2 %1806 }
 0x2ba   :  { %v6132_v19 = vpop.permute.xlu2 %1818 }
 0x2bf   :  { %v1791_v59 = vpop.permute.xlu1 %1790 }
 0x2c4   :  { %v1787_v46 = vpop.permute.xlu0 %1786 }
 0x2c5   :  { %v1841_v15 = vsel %vm194_vm1, %v5913_v50, %v1787_v46  ;;  %v7963_v50 = vld [vmem:[#allocation5_spill] sm:$0xff] }
 0x2c6   :  { %v818_v46 = vsel %vm194_vm1, %v7963_v50, %v4138_v17  ;;  %v1842_v31 = vsel %vm196_vm2, %v1841_v15, %v1791_v59  ;;  %v4282_v17 = vunpack.i.l.bf16 %v7966_v12  ;;  %v7967_v50 = vld [vmem:[#allocation26_spill] sm:$0xff]  ;;  %v418_v59 = vsel %vm200_vm4, %v417_v44, %v4217_v35 }
 0x2c7   :  { %v1803_v10 = vpop.permute.xlu1 %1802  ;;  %v4302_v27 = vunpack.i.l.bf16 %v7967_v50  ;;  %v1843_v15 = vsel %vm198_vm3, %v1842_v31, %v1795_v58  ;;  %v201_v35 = vsel %vm200_vm4, %v199_v47, %v4067_v62  ;;  %v819_v58 = vsel %vm196_vm2, %v818_v46, %v4143_v34  ;;  %v7972_v31 = vld [vmem:[#allocation16_spill] sm:$0xff]  ;;  %v7974_v47 = vld [vmem:[#allocation22_spill] sm:$0xff]  ;;  %v7975_v34 = vld [vmem:[#allocation25_spill] sm:$0xff] }
 0x2c8   :  { %v623_v30 = vsel %vm198_vm3, %v622_v7, %v4282_v17  ;;  %v419_v44 = vsel %vm202_vm5, %v418_v59, %v4267_v49  ;;  %v6176_v7 = vpop.permute.xlu2 %1830  ;;  %v4258_v46 = vunpack.i.h.bf16 %v5694_v11  ;;  %v4287_v8 = vunpack.i.l.bf16 %v7974_v47 }
 0x2c9   :  { %v1027_v18 = vsel %vm198_vm3, %v1026_v61, %v4302_v27  ;;  %v4222_v61 = vunpack.i.l.bf16 %v7972_v31  ;;  %v4307_v57 = vunpack.i.l.bf16 %v7975_v34  ;;  %v4272_v59 = vunpack.i.l.bf16 %v7976_v9 }
 0x2ca   :  { %v1028_v27 = vsel %vm200_vm4, %v1027_v18, %v4247_v40  ;;  %v4278_v49 = vunpack.i.h.bf16 %v5716_v20 }
 0x2cb   :  { %v1029_v11 = vsel %vm202_vm5, %v1028_v27, %v4307_v57  ;;  %v7982_v27 = vld [vmem:[#allocation8_spill] sm:$0xff] }
 0x2cc   :  { %v1799_v4 = vpop.permute.xlu0 %1798  ;;  %v1030_v57 = vsel %vm204_vm6, %v1029_v11, %v4252_v16 }
 0x2cd   :  { %v1844_v6 = vsel %vm200_vm4, %v1843_v15, %v1799_v4  ;;  %v624_v4 = vsel %vm200_vm4, %v623_v30, %v4232_v56  ;;  %v7973_v15 = vld [vmem:[#allocation17_spill] sm:$0xff] }
 0x2ce   :  { %v1845_v17 = vsel %vm202_vm5, %v1844_v6, %v1803_v10  ;;  %v4237_v62 = vunpack.i.l.bf16 %v7973_v15  ;;  %v420_v10 = vsel %vm204_vm6, %v419_v44, %v4222_v61  ;;  %v7978_v6 = vld [vmem:[#allocation28_spill] sm:$0xff]  ;;  %v625_v30 = vsel %vm202_vm5, %v624_v4, %v4287_v8 }
 0x2cf   :  { %v1815_v24 = vpop.permute.xlu1 %1814  ;;  %v4312_v40 = vunpack.i.l.bf16 %v7978_v6  ;;  %v1846_v56 = vsel %vm204_vm6, %v1845_v17, %v6098_v60  ;;  %v820_v44 = vsel %vm198_vm3, %v819_v58, %v4148_v13  ;;  %v1863_v61 = vrot.slane %v817_v39, 4  ;;  %v7983_v13 = vld [vmem:[#allocation10_spill] sm:$0xff] }
 0x2d0   :  { %v203_v60 = vsel %vm202_vm5, %v201_v35, %v7981_v42  ;;  %v421_v17 = vsel %vm206_vm7, %v420_v10, %v4272_v59  ;;  %v422_v4 = vsel %vm194_vm1, %v7982_v27, %v4258_v46  ;;  %v626_v41 = vsel %vm204_vm6, %v625_v30, %v4237_v62  ;;  %v7984_v59 = vld [vmem:[#allocation12_spill] sm:$0xff]  ;;  %v6219_v62 = vpop.permute.xlu2 %4440 }
 0x2d1   :  { %v4213_v58 = vunpack.i.h.bf16 %v5690_v5  ;;  %v628_v39 = vsel %vm194_vm1, %v7983_v13, %v4278_v49  ;;  %v1031_v42 = vsel %vm206_vm7, %v1030_v57, %v4312_v40  ;;  %v627_v35 = vsel %vm206_vm7, %v626_v41, %v4292_v23 }
 0x2d2   :  { %v4228_v46 = vunpack.i.h.bf16 %v7961_v54  ;;  %v1032_v3 = vsel %vm194_vm1, %v7984_v59, %v4298_v37  ;;  %v1884_v16 = vsel %vm1879_vm8, %v1031_v42, %v1869_v28  ;;  %v1857_v10 = vrot.slane %v421_v17, 4 }
 0x2d3   :  { %v4158_v5 = vunpack.i.h.bf16 %v5285_v0  ;;  %v4243_v49 = vunpack.i.h.bf16 %v7962_v45  ;;  %v1848_v40 = vsel %vm194_vm1, %v5938_v2, %v1815_v24  ;;  %v1882_v37 = vsel %vm1879_vm8, %v627_v35, %v1863_v61 }
 0x2d4   :  { %v1811_v18 = vpop.permute.xlu0 %1810  ;;  %v629_v54 = vsel %vm196_vm2, %v628_v39, %v4228_v46  ;;  %v7985_v28 = vunpack.i.l.bf16 %v5135_v21  ;;  %v4218_v0 = vunpack.i.h.bf16 %v7964_v52  ;;  %v4283_v45 = vunpack.i.h.bf16 %v7966_v12 }
 0x2d5   :  { %v1847_v20 = vsel %vm206_vm7, %v1846_v56, %v1811_v18  ;;  %v1033_v56 = vsel %vm196_vm2, %v1032_v3, %v4243_v49  ;;  %v7986_v2 = vunpack.i.l.bf16 %v7968_v48  ;;  %v7987_v30 = vunpack.i.h.bf16 %v5141_v33 }
 0x2d6   :  { %4011 = vmatpush.msk.msra.mxu0 %vm1879_vm8, %v1847_v20  ;;  %v205_v18 = vsel %vm204_vm6, %v203_v60, %v7985_v28  ;;  %v4303_v61 = vunpack.i.h.bf16 %v7967_v50  ;;  %v1849_v52 = vsel %vm196_vm2, %v1848_v40, %v6132_v19  ;;  %v4163_v60 = vunpack.i.h.bf16 %v5287_v1 }
 0x2d7   :  { %v1827_v8 = vpop.permute.xlu1 %1826  ;;  %v207_v24 = vsel %vm206_vm7, %v205_v18, %v7986_v2  ;;  %v209_v20 = vsel %vm196_vm2, %v6129_v51, %v7987_v30  ;;  %v7988_v33 = vunpack.i.h.bf16 %v5177_v38  ;;  %v4233_v50 = vunpack.i.h.bf16 %v7970_v43 }
 0x2d8   :  { %1911 = vmatpush.msra.mxu0 %v5891_v63  ;;  %v423_v63 = vsel %vm196_vm2, %v422_v4, %v4213_v58  ;;  %v1880_v12 = vsel %vm1879_vm8, %v207_v24, %v1857_v10  ;;  %v630_v4 = vsel %vm198_vm3, %v629_v54, %v4283_v45  ;;  %v1034_v19 = vsel %vm198_vm3, %v1033_v56, %v4303_v61 }
 0x2d9   :  { %v424_v23 = vsel %vm198_vm3, %v423_v63, %v4263_v53  ;;  %v821_v51 = vsel %vm200_vm4, %v820_v44, %v7988_v33  ;;  %v4268_v53 = vunpack.i.h.bf16 %v7969_v55  ;;  %v4073_v57 = vunpack.i.h.bf16 %v5135_v21  ;;  %v7991_v63 = vld [vmem:[#allocation30_spill] sm:$0xff] }
 0x2da   :  { %1912 = vmatpush.msra.mxu0 %v1884_v16  ;;  %v425_v17 = vsel %vm200_vm4, %v424_v23, %v4218_v0  ;;  %v822_v1 = vsel %vm202_vm5, %v821_v51, %v4158_v5  ;;  %v4248_v41 = vunpack.i.h.bf16 %v7971_v32  ;;  %v7989_v58 = vunpack.i.h.bf16 %v5143_v14  ;;  %v7992_v0 = vld [vmem:[#allocation33_spill] sm:$0xff] }
 0x2db   :  { %v4088_v38 = vunpack.i.h.bf16 %v5137_v22  ;;  %v631_v43 = vsel %vm200_vm4, %v630_v4, %v4233_v50  ;;  %v426_v55 = vsel %vm202_vm5, %v425_v17, %v4268_v53  ;;  %v4168_v42 = vunpack.i.h.bf16 %v7965_v29  ;;  %v4456_v22 = vpop.permute.xlu2 %4455 }
 0x2dc   :  { %v1823_v11 = vpop.permute.xlu0 %1822  ;;  %1913 = vmatpush.msra.mxu0 %v1882_v37  ;;  %v210_v13 = vsel %vm198_vm3, %v209_v20, %v7989_v58  ;;  %v4223_v21 = vunpack.i.h.bf16 %v7972_v31  ;;  %v4288_v35 = vunpack.i.h.bf16 %v7974_v47  ;;  %v1035_v32 = vsel %vm200_vm4, %v1034_v19, %v4248_v41  ;;  %v7993_v20 = vld [vmem:[#allocation32_spill] sm:$0xff] }
 0x2dd   :  { %v1850_v27 = vsel %vm198_vm3, %v1849_v52, %v1823_v11  ;;  %v4238_v14 = vunpack.i.h.bf16 %v7973_v15  ;;  %v4308_v46 = vunpack.i.h.bf16 %v7975_v34  ;;  %v7990_v59 = vunpack.i.h.bf16 %v5139_v25  ;;  %v7994_v52 = vld [vmem:[#allocation31_spill] sm:$0xff] }
 0x2de   :  { %1914 = vmatpush.msra.mxu0 %v1880_v12  ;;  %v1851_v44 = vsel %vm200_vm4, %v1850_v27, %v1827_v8  ;;  %v823_v8 = vsel %vm204_vm6, %v822_v1, %v4163_v60  ;;  %v4293_v16 = vunpack.i.h.bf16 %v7977_v36  ;;  %v632_v47 = vsel %vm202_vm5, %v631_v43, %v4288_v35 }
 0x2df   :  { %v1839_v39 = vpop.permute.xlu1 %1838  ;;  %v211_v3 = vsel %vm200_vm4, %v210_v13, %v7990_v59  ;;  %v1852_v29 = vsel %vm202_vm5, %v1851_v44, %v6176_v7  ;;  %v427_v10 = vsel %vm204_vm6, %v426_v55, %v4223_v21  ;;  %v4273_v15 = vunpack.i.h.bf16 %v7976_v9 }
 0x2e0   :  { %v4313_v34 = vunpack.i.h.bf16 %v7978_v6  ;;  %v1036_v25 = vsel %vm202_vm5, %v1035_v32, %v4308_v46  ;;  %v4253_v49 = vunpack.i.h.bf16 %v7979_v26  ;;  %v1870_v40 = vrot.slane %v7991_v63, 4 }
 0x2e1   :  { %v824_v7 = vsel %vm206_vm7, %v823_v8, %v4168_v42  ;;  %v4093_v23 = vunpack.i.h.bf16 %v7968_v48  ;;  %v633_v9 = vsel %vm204_vm6, %v632_v47, %v4238_v14  ;;  %v212_v6 = vsel %vm202_vm5, %v211_v3, %v4088_v38 }
 0x2e2   :  { %v428_v54 = vsel %vm206_vm7, %v427_v10, %v4273_v15  ;;  %v4443_v37 = vunpack.i.h.bf16 %v6219_v62  ;;  %v4442_v26 = vunpack.i.l.bf16 %v6219_v62  ;;  %v1037_v28 = vsel %vm204_vm6, %v1036_v25, %v4253_v49 }
 0x2e3   :  { %v634_v18 = vsel %vm206_vm7, %v633_v9, %v4293_v16  ;;  %v1038_v48 = vsel %vm206_vm7, %v1037_v28, %v4313_v34  ;;  %v1864_v56 = vrot.slane %v824_v7, 4  ;;  %v213_v2 = vsel %vm204_vm6, %v212_v6, %v4073_v57  ;;  %v6308_v53 = vpop.permute.xlu2 %4470 }
 0x2e4   :  { %v1835_v31 = vpop.permute.xlu0 %1834  ;;  %v1885_v11 = vsel %vm1879_vm8, %v1038_v48, %v1870_v40  ;;  %v1858_v24 = vrot.slane %v428_v54, 4  ;;  %v214_v62 = vsel %vm206_vm7, %v213_v2, %v4093_v23  ;;  %v2125_v61 = vsel %vm194_vm1, %v7993_v20, %v4443_v37 }
 0x2e5   :  { %v1853_v5 = vsel %vm204_vm6, %v1852_v29, %v1835_v31  ;;  %v1883_v30 = vsel %vm1879_vm8, %v634_v18, %v1864_v56  ;;  %v2118_v12 = vsel %vm194_vm1, %v7994_v52, %v4442_v26  ;;  %v4458_v4 = vunpack.i.h.bf16 %v4456_v22 }
 0x2e6   :  { %v1854_v36 = vsel %vm206_vm7, %v1853_v5, %v1839_v39  ;;  %v4457_v33 = vunpack.i.l.bf16 %v4456_v22  ;;  %v1881_v19 = vsel %vm1879_vm8, %v214_v62, %v1858_v24 }
 0x2e7   :  { %4013 = vmatpush.msk.msra.mxu1 %vm1879_vm8, %v1854_v36  ;;  %v4451_v45 = vpop.permute.xlu1 %4450  ;;  %v7995_v36 = vld [vmem:[#allocation3_spill] sm:$0xff] }
 0x2e8   :  { %v4453_v17 = vunpack.i.h.bf16 %v4451_v45  ;;  %v4452_v27 = vunpack.i.l.bf16 %v4451_v45 }
 0x2e9   :  { %1931 = vmatpush.msra.mxu1 %v7992_v0 }
 0x2eb   :  { %1932 = vmatpush.msra.mxu1 %v1885_v11  ;;  %v4486_v35 = vpop.permute.xlu2 %4485 }
 0x2ec   :  { %v4446_v60 = vpop.permute.xlu0 %4445  ;;  %v4488_v32 = vunpack.i.h.bf16 %v4486_v35  ;;  %v4487_v14 = vunpack.i.l.bf16 %v4486_v35 }
 0x2ed   :  { %v4448_v51 = vunpack.i.h.bf16 %v4446_v60  ;;  %v4447_v50 = vunpack.i.l.bf16 %v4446_v60  ;;  %1933 = vmatpush.msra.mxu1 %v1883_v30 }
 0x2ee   :  { %v2220_v8 = vrot.slane %v4488_v32, 4  ;;  %v2164_v59 = vrot.slane %v4487_v14, 4 }
 0x2ef   :  { %v2126_v57 = vsel %vm196_vm2, %v2125_v61, %v4448_v51  ;;  %v2119_v1 = vsel %vm196_vm2, %v2118_v12, %v4447_v50  ;;  %1934 = vmatpush.msra.mxu1 %v1881_v19  ;;  %v6317_v39 = vpop.permute.xlu1 %4465 }
 0x2f0   :  { %v2120_v41 = vsel %vm198_vm3, %v2119_v1, %v4452_v27  ;;  %v2127_v58 = vsel %vm198_vm3, %v2126_v57, %v4453_v17  ;;  %v7996_v27 = vld [vmem:[#allocation4_spill] sm:$0xff] }
 0x2f1   :  { %v2121_v13 = vsel %vm200_vm4, %v2120_v41, %v4457_v33  ;;  %v2128_v38 = vsel %vm200_vm4, %v2127_v58, %v4458_v4 }
 0x2f4   :  { %v4461_v44 = vpop.permute.xlu0 %4460 }
 0x2f5   :  { %v4463_v43 = vunpack.i.h.bf16 %v4461_v44  ;;  %v4462_v55 = vunpack.i.l.bf16 %v4461_v44 }
 0x2f7   :  { %v6320_v42 = vsel %vm202_vm5, %v2121_v13, %v4462_v55  ;;  %v6323_v21 = vsel %vm202_vm5, %v2128_v38, %v4463_v43  ;;  %v4481_v22 = vpop.permute.xlu1 %4480 }
 0x2f8   :  { %v4483_v29 = vunpack.i.h.bf16 %v4481_v22  ;;  %v4482_v31 = vunpack.i.l.bf16 %v4481_v22 }
 0x2fa   :  { %v2234_v15 = vrot.slane %v4483_v29, 4  ;;  %v2178_v34 = vrot.slane %v4482_v31, 4 }
 0x2fc   :  { %v4476_v46 = vpop.permute.xlu0 %4475 }
 0x2fd   :  { %v4478_v3 = vunpack.i.h.bf16 %v4476_v46  ;;  %v4477_v16 = vunpack.i.l.bf16 %v4476_v46 }
 0x2ff   :  { %v2221_v47 = vsel %vm26_vm0, %v2220_v8, %v4478_v3  ;;  %v2165_v10 = vsel %vm26_vm0, %v2164_v59, %v4477_v16  ;;  %v2222_v5 = vrot.slane %v4478_v3, 4  ;;  %v2166_v25 = vrot.slane %v4477_v16, 4 }
 0x300   :  { %v2227_v63 = vperm.slane %v2221_v47, %v7995_v36  ;;  %v2171_v40 = vperm.slane %v2165_v10, %v7995_v36 }
 0x301   :  { %v2223_v26 = vsel %vm26_vm0, %v4488_v32, %v2222_v5  ;;  %v2167_v28 = vsel %vm26_vm0, %v4487_v14, %v2166_v25 }
 0x302   :  { %v2246_v48 = vrot.slane %v2227_v63, 4  ;;  %v2190_v45 = vrot.slane %v2171_v40, 4  ;;  %v2231_v20 = vperm.slane %v2223_v26, %v7995_v36  ;;  %v2175_v61 = vperm.slane %v2167_v28, %v7995_v36  ;;  %v6400_v28 = vld [vmem:[%s7844_s0 + $0x82] sm:$0xff] }
 0x304   :  { %v4491_v49 = vpop.permute.xlu0 %4490  ;;  %v2258_v43 = vrot.slane %v2231_v20, 4  ;;  %v2202_v14 = vrot.slane %v2175_v61, 4 }
 0x305   :  { %v4493_v7 = vunpack.i.h.bf16 %v4491_v49  ;;  %v4492_v23 = vunpack.i.l.bf16 %v4491_v49 }
 0x307   :  { %v2232_v9 = vrot.slane %v4493_v7, 4  ;;  %v2235_v6 = vsel %vm26_vm0, %v4493_v7, %v2234_v15  ;;  %v2176_v54 = vrot.slane %v4492_v23, 4  ;;  %v2179_v37 = vsel %vm26_vm0, %v4492_v23, %v2178_v34  ;;  %v6384_v23 = vld [vmem:[%s7844_s0 + $0x7a] sm:$0xff] }
 0x308   :  { %v2243_v18 = vperm.slane %v2235_v6, %v7995_v36  ;;  %v2187_v0 = vperm.slane %v2179_v37, %v7995_v36 }
 0x309   :  { %v2233_v56 = vsel %vm26_vm0, %v2232_v9, %v4483_v29  ;;  %v2177_v11 = vsel %vm26_vm0, %v2176_v54, %v4482_v31  ;;  %v3184_v54 = vrot.slane %v6384_v23, 4 }
 0x30a   :  { %v2239_v2 = vperm.slane %v2233_v56, %v7995_v36  ;;  %v2256_v24 = vrot.slane %v2243_v18, 4  ;;  %v2183_v30 = vperm.slane %v2177_v11, %v7995_v36  ;;  %v2200_v62 = vrot.slane %v2187_v0, 4 }
 0x30b   :  { %v2203_v29 = vsel %vm26_vm0, %v2187_v0, %v2202_v14  ;;  %v2259_v31 = vsel %vm26_vm0, %v2243_v18, %v2258_v43  ;;  %v4031_v43 = vld [vmem:[%s7844_s0 + $0x62] sm:$0xff]  ;;  %v4036_v14 = vld [vmem:[%s7844_s0 + $0x9a] sm:$0xff] }
 0x30c   :  { %v2244_v52 = vrot.slane %v2239_v2, 4  ;;  %v2188_v12 = vrot.slane %v2183_v30, 4  ;;  %v2191_v60 = vsel %vm26_vm0, %v2183_v30, %v2190_v45  ;;  %v2247_v17 = vsel %vm26_vm0, %v2239_v2, %v2246_v48  ;;  %v7997_v2 = vld [vmem:[#allocation36_spill] sm:$0xff] }
 0x30d   :  { %v2199_v4 = vperm.slane %v2191_v60, %v7996_v27  ;;  %v2255_v33 = vperm.slane %v2247_v17, %v7996_v27  ;;  %v2201_v51 = vsel %vm26_vm0, %v2200_v62, %v2175_v61  ;;  %v2257_v50 = vsel %vm26_vm0, %v2256_v24, %v2231_v20  ;;  %v4029_v62 = vld [vmem:[%s7844_s0 + $0xa9] sm:$0xff]  ;;  %v4030_v20 = vld [vmem:[%s7844_s0 + $0xb1] sm:$0xff]  ;;  %v4025_v17 = vld [vmem:[%s7844_s0 + $0x79] sm:$0xff] }
 0x30e   :  { %v2189_v19 = vsel %vm26_vm0, %v2188_v12, %v2171_v40  ;;  %v2245_v57 = vsel %vm26_vm0, %v2244_v52, %v2227_v63  ;;  %v2207_v1 = vperm.slane %v2201_v51, %v7996_v27  ;;  %v2263_v41 = vperm.slane %v2257_v50, %v7996_v27  ;;  %v6375_v63 = vld [vmem:[%s7844_s0 + $0xaa] sm:$0xff]  ;;  %v4038_v40 = vld [vmem:[%s7844_s0 + $0xb2] sm:$0xff] }
 0x30f   :  { %v4499_v58 = vpack.i.bf16 %v2255_v33, %v2199_v4  ;;  %v2214_v13 = vrot.slane %v2199_v4, 4  ;;  %v2270_v38 = vrot.slane %v2255_v33, 4  ;;  %v6352_v44 = vperm.slane %v2189_v19, %v7996_v27  ;;  %v7998_v61 = vld [vmem:[#allocation34_spill] sm:$0xff]  ;;  %v4026_v4 = vld [vmem:[%s7844_s0 + $0x81] sm:$0xff] }
 0x310   :  { %v6355_v55 = vperm.slane %v2245_v57, %v7996_v27  ;;  %v2216_v35 = vrot.slane %v2207_v1, 4  ;;  %v2272_v32 = vrot.slane %v2263_v41, 4  ;;  %v2211_v5 = vperm.slane %v2203_v29, %v7996_v27  ;;  %v7999_v57 = vld [vmem:[#allocation37_spill] sm:$0xff] }
 0x311   :  { %4500 = vrot.lane.b32.xlu2 %v4499_v58, %s4843_s6  ;;  %v2215_v46 = vsel %vm26_vm0, 0.0, %v2214_v13  ;;  %v2271_v22 = vsel %vm26_vm0, 0.0, %v2270_v38  ;;  %v2212_v8 = vrot.slane %v6352_v44, 4  ;;  %v2267_v25 = vperm.slane %v2259_v31, %v7996_v27  ;;  %v4035_v13 = vld [vmem:[%s7844_s0 + $0x92] sm:$0xff]  ;;  %v8002_v38 = vld [vmem:[#allocation35_spill] sm:$0xff] }
 0x312   :  { %v4504_v59 = vpack.i.bf16 %v2271_v22, %v2215_v46  ;;  %v2268_v3 = vrot.slane %v6355_v55, 4  ;;  %v2217_v10 = vsel %vm26_vm0, 0.0, %v2216_v35  ;;  %v2273_v15 = vsel %vm26_vm0, 0.0, %v2272_v32 }
 0x313   :  { %v2213_v16 = vsel %vm26_vm0, 0.0, %v2212_v8  ;;  %v4514_v49 = vpack.i.bf16 %v2273_v15, %v2217_v10  ;;  %v3238_v7 = vrot.slane %v4038_v40, 4  ;;  %v3182_v9 = vrot.slane %v6375_v63, 4  ;;  %v4028_v10 = vld [vmem:[%s7844_s0 + $0x99] sm:$0xff] }
 0x314   :  { %4505 = vrot.lane.b32.xlu0 %v4504_v59, %s4845_s16  ;;  %v2269_v47 = vsel %vm26_vm0, 0.0, %v2268_v3  ;;  %v4519_v6 = vpack.i.bf16 %v2267_v25, %v2211_v5  ;;  %v6395_v26 = vsel %vm26_vm0, %v6375_v63, %v3184_v54  ;;  %v4509_v18 = vpack.i.bf16 %v2263_v41, %v2207_v1  ;;  %v4032_v59 = vld [vmem:[%s7844_s0 + $0x6a] sm:$0xff] }
 0x315   :  { %v4494_v34 = vpack.i.bf16 %v2269_v47, %v2213_v16  ;;  %v6390_v37 = vsel %vm26_vm0, %v3182_v9, %v6384_v23  ;;  %v6404_v0 = vsel %vm26_vm0, %v3238_v7, %v6400_v28  ;;  %v3240_v48 = vrot.slane %v6400_v28, 4  ;;  %v4027_v47 = vld [vmem:[%s7844_s0 + $0x91] sm:$0xff]  ;;  %v4023_v9 = vld [vmem:[%s7844_s0 + $0x61] sm:$0xff] }
 0x316   :  { %v2218_v45 = vrot.slane %v2211_v5, 4  ;;  %v2274_v56 = vrot.slane %v2267_v25, 4  ;;  %v2628_v52 = vrot.slane %v4030_v20, 4  ;;  %v2572_v12 = vrot.slane %v4029_v62, 4 }
 0x317   :  { %4495 = vrot.lane.b32.xlu1 %v4494_v34, %s4846_s23  ;;  %v6409_v11 = vsel %vm26_vm0, %v4038_v40, %v3240_v48  ;;  %v4549_v33 = vpack.i.bf16 %v4038_v40, %v6375_v63  ;;  %v2630_v50 = vrot.slane %v4026_v4, 4  ;;  %v2574_v1 = vrot.slane %v4025_v17, 4 }
 0x318   :  { %v2219_v24 = vsel %vm26_vm0, 0.0, %v2218_v45  ;;  %v2275_v30 = vsel %vm26_vm0, 0.0, %v2274_v56  ;;  %v6432_v51 = vsel %vm26_vm0, %v2628_v52, %v4026_v4  ;;  %v6435_v19 = vsel %vm26_vm0, %v2572_v12, %v4025_v17 }
 0x319   :  { %4515 = vrot.lane.b32.xlu2 %v4514_v49, %s4847_s26  ;;  %v4524_v60 = vpack.i.bf16 %v2275_v30, %v2219_v24  ;;  %v6440_v41 = vsel %vm26_vm0, %v4030_v20, %v2630_v50  ;;  %v6443_v58 = vsel %vm26_vm0, %v4029_v62, %v2574_v1  ;;  %v3170_v35 = vrot.slane %v4035_v13, 4 }
 0x31a   :  { %8000 = vst [vmem:[#allocation9_spill] sm:$0xff] %v6440_v41  ;;  %v4554_v32 = vpack.i.bf16 %v4030_v20, %v4029_v62  ;;  %v3172_v46 = vrot.slane %v4031_v43, 4  ;;  %v4467_v22 = vunpack.i.l.bf16 %v6317_v39  ;;  %v3226_v3 = vrot.slane %v4036_v14, 4 }
 0x31b   :  { %8001 = vst [vmem:[#allocation11_spill] sm:$0xff] %v6443_v58  ;;  %v6460_v8 = vsel %vm26_vm0, %v3170_v35, %v4031_v43  ;;  %v4472_v16 = vunpack.i.l.bf16 %v6308_v53  ;;  %v3228_v31 = vrot.slane %v4032_v59, 4  ;;  %v2616_v34 = vrot.slane %v4028_v10, 4 }
 0x31c   :  { %4520 = vrot.lane.b32.xlu0 %v4519_v6, %s4844_s11  ;;  %v6467_v29 = vsel %vm26_vm0, %v4035_v13, %v3172_v46  ;;  %v6476_v15 = vsel %vm26_vm0, %v3226_v3, %v4032_v59  ;;  %v2560_v5 = vrot.slane %v4027_v47, 4  ;;  %v4564_v49 = vpack.i.bf16 %v4036_v14, %v4035_v13  ;;  %v4024_v6 = vld [vmem:[%s7844_s0 + $0x69] sm:$0xff] }
 0x31d   :  { %v6480_v25 = vsel %vm26_vm0, %v4036_v14, %v3228_v31  ;;  %v6496_v54 = vsel %vm26_vm0, %v2616_v34, %v4024_v6  ;;  %v2562_v48 = vrot.slane %v4023_v9, 4  ;;  %v4559_v45 = vpack.i.bf16 %v6400_v28, %v6384_v23 }
 0x31e   :  { %v4473_v24 = vunpack.i.h.bf16 %v6308_v53  ;;  %v4574_v30 = vpack.i.bf16 %v4026_v4, %v4025_v17  ;;  %v4584_v53 = vpack.i.bf16 %v4032_v59, %v4031_v43 }
 0x31f   :  { %4510 = vrot.lane.b32.xlu1 %v4509_v18, %s4842_s5  ;;  %v2618_v18 = vrot.slane %v4024_v6, 4  ;;  %v6508_v56 = vsel %vm26_vm0, %v4027_v47, %v2562_v48 }
 0x320   :  { %8005 = vst [vmem:[#allocation5_spill] sm:$0xff] %v6508_v56 }
 0x321   :  { %4530 = vrot.lane.b32.xlu2 %v7997_v2, %s4850_s29  ;;  %v4468_v2 = vunpack.i.h.bf16 %v6317_v39  ;;  %v4599_v39 = vpack.i.bf16 %v4024_v6, %v4023_v9 }
 0x323   :  { %v2130_v62 = vsel %vm204_vm6, %v6323_v21, %v4468_v2 }
 0x324   :  { %4535 = vrot.lane.b32.xlu0 %v7998_v61, %s4850_s29  ;;  %v6522_v20 = vsel %vm206_vm7, %v2130_v62, %v4473_v24 }
 0x325   :  { %8006 = vst [vmem:[#allocation13_spill] sm:$0xff] %v6522_v20 }
 0x327   :  { %4525 = vrot.lane.b32.xlu1 %v4524_v60, %s4849_s28 }
 0x329   :  { %4545 = vrot.lane.b32.xlu2 %v7999_v57, %s4850_s29 }
 0x32c   :  { %4550 = vrot.lane.b32.xlu0 %v4549_v33, %s4848_s27 }
 0x32f   :  { %4540 = vrot.lane.b32.xlu1 %v8002_v38, %s4850_s29 }
 0x331   :  { %3580 = vrot.lane.b32.xlu2 %v4038_v40, %s4850_s29  ;;  %v2123_v40 = vsel %vm204_vm6, %v6320_v42, %v4467_v22  ;;  %v6499_v42 = vsel %vm26_vm0, %v2560_v5, %v4023_v9 }
 0x332   :  { %v6485_v7 = vsel %vm206_vm7, %v2123_v40, %v4472_v16 }
 0x333   :  { %8003 = vst [vmem:[#allocation14_spill] sm:$0xff] %v6485_v7 }
 0x334   :  { %4555 = vrot.lane.b32.xlu0 %v4554_v32, %s4850_s29 }
 0x337   :  { %3578 = vrot.lane.b32.xlu1 %v6375_v63, %s4850_s29  ;;  %v6503_v63 = vsel %vm26_vm0, %v4028_v10, %v2618_v18 }
 0x338   :  { %8004 = vst [vmem:[#allocation15_spill] sm:$0xff] %v6503_v63 }
 0x339   :  { %4565 = vrot.lane.b32.xlu2 %v4564_v49, %s4848_s27 }
 0x33c   :  { %3570 = vrot.lane.b32.xlu0 %v6384_v23, %s4850_s29  ;;  %v4579_v23 = vpack.i.bf16 %v4028_v10, %v4027_v47 }
 0x33f   :  { %4560 = vrot.lane.b32.xlu1 %v4559_v45, %s4848_s27 }
 0x341   :  { %3574 = vrot.lane.b32.xlu2 %v4035_v13, %s4850_s29 }
 0x344   :  { %3576 = vrot.lane.b32.xlu0 %v4036_v14, %s4850_s29 }
 0x347   :  { %3572 = vrot.lane.b32.xlu1 %v6400_v28, %s4850_s29 }
 0x349   :  { %4575 = vrot.lane.b32.xlu2 %v4574_v30, %s4850_s29 }
 0x34c   :  { %4580 = vrot.lane.b32.xlu0 %v4579_v23, %s4850_s29 }
 0x34f   :  { %4570 = vrot.lane.b32.xlu1 %v4554_v32, %s4848_s27 }
 0x351   :  { %3566 = vrot.lane.b32.xlu2 %v4031_v43, %s4850_s29 }
 0x354   :  { %3568 = vrot.lane.b32.xlu0 %v4032_v59, %s4850_s29 }
 0x357   :  { %4585 = vrot.lane.b32.xlu1 %v4584_v53, %s4848_s27 }
 0x359   :  { %4595 = vrot.lane.b32.xlu2 %v4579_v23, %s4848_s27 }
 0x35c   :  { %4600 = vrot.lane.b32.xlu0 %v4599_v39, %s4850_s29 }
 0x35f   :  { %4590 = vrot.lane.b32.xlu1 %v4574_v30, %s4848_s27 }
 0x367   :  { %4605 = vrot.lane.b32.xlu1 %v4599_v39, %s4848_s27 }
 0x36b   :  { %v4501_v21 = vpop.permute.xlu2 %4500 }
 0x36c   :  { %v4503_v33 = vunpack.i.h.bf16 %v4501_v21  ;;  %v4502_v50 = vunpack.i.l.bf16 %v4501_v21 }
 0x373   :  { %v4516_v28 = vpop.permute.xlu2 %4515 }
 0x374   :  { %v4518_v10 = vunpack.i.h.bf16 %v4516_v28 }
 0x37b   :  { %v4531_v61 = vpop.permute.xlu2 %4530 }
 0x383   :  { %v4546_v52 = vpop.permute.xlu2 %4545 }
 0x384   :  { %v4548_v59 = vunpack.i.h.bf16 %v4546_v52  ;;  %v4547_v3 = vunpack.i.l.bf16 %v4546_v52  ;;  %v4532_v52 = vunpack.i.l.bf16 %v4531_v61 }
 0x386   :  { %v4506_v12 = vpop.permute.xlu0 %4505  ;;  %v2438_v49 = vrot.slane %v4548_v59, 4  ;;  %v2382_v40 = vrot.slane %v4547_v3, 4 }
 0x387   :  { %v4508_v1 = vunpack.i.h.bf16 %v4506_v12  ;;  %v4507_v13 = vunpack.i.l.bf16 %v4506_v12 }
 0x389   :  { %v4496_v60 = vpop.permute.xlu1 %4495 }
 0x38a   :  { %v4498_v17 = vunpack.i.h.bf16 %v4496_v60  ;;  %v4497_v4 = vunpack.i.l.bf16 %v4496_v60 }
 0x38b   :  { %v6534_v57 = vpop.permute.xlu2 %3580 }
 0x38c   :  { %v2339_v38 = vsel %vm194_vm1, %v6355_v55, %v4498_v17  ;;  %v2332_v43 = vsel %vm194_vm1, %v6352_v44, %v4497_v4  ;;  %v4517_v55 = vunpack.i.l.bf16 %v4516_v28  ;;  %v4533_v28 = vunpack.i.h.bf16 %v4531_v61 }
 0x38d   :  { %v2340_v35 = vsel %vm196_vm2, %v2339_v38, %v4503_v33  ;;  %v2333_v32 = vsel %vm196_vm2, %v2332_v43, %v4502_v50  ;;  %v2372_v17 = vrot.slane %v4532_v52, 4  ;;  %v6582_v61 = vperm.slane %v6390_v37, %v7995_v36 }
 0x38e   :  { %v6542_v14 = vpop.permute.xlu0 %4520  ;;  %v2334_v46 = vsel %vm198_vm3, %v2333_v32, %v4507_v13  ;;  %v2341_v22 = vsel %vm198_vm3, %v2340_v35, %v4508_v1  ;;  %v2428_v60 = vrot.slane %v4533_v28, 4 }
 0x38f   :  { %8007 = vst [vmem:[#allocation7_spill] sm:$0xff] %v6542_v14 }
 0x391   :  { %v4511_v16 = vpop.permute.xlu1 %4510 }
 0x392   :  { %v4513_v31 = vunpack.i.h.bf16 %v4511_v16  ;;  %v4512_v47 = vunpack.i.l.bf16 %v4511_v16  ;;  %v6595_v16 = vperm.slane %v6404_v0, %v7995_v36 }
 0x393   :  { %v6546_v34 = vpop.permute.xlu2 %4565 }
 0x394   :  { %v2335_v44 = vsel %vm200_vm4, %v2334_v46, %v4512_v47  ;;  %v2342_v5 = vsel %vm200_vm4, %v2341_v22, %v4513_v31  ;;  %v6599_v31 = vperm.slane %v6460_v8, %v7995_v36 }
 0x395   :  { %v6551_v9 = vsel %vm202_vm5, %v2335_v44, %v4517_v55  ;;  %v6554_v6 = vsel %vm202_vm5, %v2342_v5, %v4518_v10  ;;  %v6603_v55 = vperm.slane %v6476_v15, %v7995_v36 }
 0x396   :  { %8008 = vst [vmem:[#allocation24_spill] sm:$0xff] %v6551_v9  ;;  %v4536_v18 = vpop.permute.xlu0 %4535 }
 0x397   :  { %8009 = vst [vmem:[#allocation26_spill] sm:$0xff] %v6554_v6  ;;  %v4538_v48 = vunpack.i.h.bf16 %v4536_v18  ;;  %v4537_v45 = vunpack.i.l.bf16 %v4536_v18 }
 0x399   :  { %v6557_v2 = vsel %vm26_vm0, %v2438_v49, %v4538_v48  ;;  %v2440_v24 = vrot.slane %v4538_v48, 4  ;;  %v6560_v30 = vsel %vm26_vm0, %v2382_v40, %v4537_v45  ;;  %v2384_v62 = vrot.slane %v4537_v45, 4  ;;  %v6562_v23 = vpop.permute.xlu1 %4525 }
 0x39a   :  { %8010 = vst [vmem:[#allocation6_spill] sm:$0xff] %v6562_v23  ;;  %v3250_v40 = vrot.slane %v6595_v16, 4 }
 0x39b   :  { %v6565_v53 = vsel %vm26_vm0, %v4548_v59, %v2440_v24  ;;  %v6568_v39 = vsel %vm26_vm0, %v4547_v3, %v2384_v62  ;;  %v3575_v21 = vpop.permute.xlu2 %3574  ;;  %v3194_v3 = vrot.slane %v6582_v61, 4 }
 0x39c   :  { %v3590_v37 = vrot.slane %v3575_v21, 4  ;;  %v3251_v24 = vsel %vm26_vm0, %v3250_v40, %v6603_v55  ;;  %v6712_v40 = vperm.slane %v6565_v53, %v7995_v36 }
 0x39d   :  { %v3195_v0 = vsel %vm26_vm0, %v3194_v3, %v6599_v31 }
 0x39e   :  { %v6570_v12 = vpop.permute.xlu0 %4550  ;;  %8014 = vst [vmem:[#allocation16_spill] sm:$0xff] %v6712_v40 }
 0x3a1   :  { %v4541_v4 = vpop.permute.xlu1 %4540 }
 0x3a2   :  { %v4543_v33 = vunpack.i.h.bf16 %v4541_v4  ;;  %v4542_v50 = vunpack.i.l.bf16 %v4541_v4  ;;  %v6637_v4 = vperm.slane %v6395_v26, %v7995_v36 }
 0x3a3   :  { %v6572_v1 = vpop.permute.xlu2 %4575 }
 0x3a4   :  { %v2426_v13 = vrot.slane %v4543_v33, 4  ;;  %v6575_v38 = vsel %vm26_vm0, %v4543_v33, %v2428_v60  ;;  %v2370_v43 = vrot.slane %v4542_v50, 4  ;;  %v6578_v35 = vsel %vm26_vm0, %v4542_v50, %v2372_v17 }
 0x3a5   :  { %v6630_v60 = vperm.slane %v3195_v0, %v7996_v27  ;;  %v6633_v17 = vperm.slane %v3251_v24, %v7996_v27  ;;  %v6641_v33 = vperm.slane %v6432_v51, %v7995_v36  ;;  %v6645_v50 = vperm.slane %v6435_v19, %v7995_v36 }
 0x3a6   :  { %v6585_v32 = vsel %vm26_vm0, %v2426_v13, %v4533_v28  ;;  %v6588_v46 = vsel %vm26_vm0, %v2370_v43, %v4532_v52  ;;  %v6590_v22 = vpop.permute.xlu0 %4555  ;;  %v6658_v51 = vperm.slane %v6409_v11, %v7995_v36  ;;  %v6673_v11 = vperm.slane %v6480_v25, %v7995_v36 }
 0x3a7   :  { %8011 = vst [vmem:[#allocation23_spill] sm:$0xff] %v6630_v60  ;;  %v3218_v3 = vrot.slane %v6630_v60, 4  ;;  %v3274_v26 = vrot.slane %v6633_v17, 4  ;;  %v6705_v25 = vperm.slane %v6560_v30, %v7995_v36  ;;  %v4552_v30 = vunpack.i.l.bf16 %v6570_v12 }
 0x3a8   :  { %8012 = vst [vmem:[#allocation18_spill] sm:$0xff] %v6633_v17  ;;  %v6727_v53 = vperm.slane %v6575_v38, %v7995_v36 }
 0x3a9   :  { %v3579_v59 = vpop.permute.xlu1 %3578  ;;  %v3219_v24 = vsel %vm26_vm0, 0.0, %v3218_v3 }
 0x3aa   :  { %v3602_v44 = vrot.slane %v3579_v59, 4  ;;  %8017 = vst [vmem:[#allocation25_spill] sm:$0xff] %v6727_v53 }
 0x3ab   :  { %v3567_v47 = vpop.permute.xlu2 %3566 }
 0x3ac   :  { %v3592_v10 = vrot.slane %v3567_v47, 4  ;;  %v3591_v8 = vsel %vm26_vm0, %v3590_v37, %v3567_v47 }
 0x3ad   :  { %v6621_v62 = vperm.slane %v3591_v8, %v7995_v36  ;;  %v6677_v8 = vperm.slane %v6496_v54, %v7995_v36  ;;  %v3658_v54 = vrot.slane %v6534_v57, 4 }
 0x3ae   :  { %v6606_v5 = vsel %vm26_vm0, %v3575_v21, %v3592_v10  ;;  %v3571_v49 = vpop.permute.xlu0 %3570 }
 0x3af   :  { %v3603_v18 = vsel %vm26_vm0, %v3602_v44, %v3571_v49  ;;  %v3604_v48 = vrot.slane %v3571_v49, 4  ;;  %v6666_v44 = vperm.slane %v6467_v29, %v7995_v36  ;;  %v7884_v49 = vunpack.i.h.bf16 %v6546_v34 }
 0x3b0   :  { %v6614_v45 = vperm.slane %v3603_v18, %v7995_v36  ;;  %v6681_v18 = vperm.slane %v6499_v42, %v7995_v36  ;;  %v4577_v29 = vunpack.i.l.bf16 %v6572_v1 }
 0x3b1   :  { %v6616_v15 = vpop.permute.xlu1 %4560  ;;  %v6624_v21 = vsel %vm26_vm0, %v3579_v59, %v3604_v48  ;;  %v7885_v48 = vunpack.i.l.bf16 %v6546_v34  ;;  %v3440_v37 = vrot.slane %v7884_v49, 4 }
 0x3b2   :  { %v3614_v28 = vrot.slane %v6614_v45, 4  ;;  %v2994_v10 = vrot.slane %v4577_v29, 4 }
 0x3b4   :  { %v3615_v52 = vsel %vm26_vm0, %v3614_v28, %v6621_v62  ;;  %v3275_v28 = vsel %vm26_vm0, 0.0, %v3274_v26  ;;  %v6701_v26 = vperm.slane %v6557_v2, %v7995_v36  ;;  %v4553_v2 = vunpack.i.h.bf16 %v6570_v12 }
 0x3b5   :  { %v6650_v43 = vperm.slane %v3615_v52, %v7996_v27  ;;  %v4558_v52 = vunpack.i.h.bf16 %v6590_v22  ;;  %v4624_v42 = vpack.i.bf16 %v3275_v28, %v3219_v24  ;;  %v4557_v24 = vunpack.i.l.bf16 %v6590_v22 }
 0x3b6   :  { %v6647_v13 = vpop.permute.xlu0 %3576  ;;  %v6737_v22 = vperm.slane %v6585_v32, %v7995_v36  ;;  %v3452_v17 = vrot.slane %v4553_v2, 4  ;;  %v6748_v32 = vperm.slane %v6588_v46, %v7995_v36 }
 0x3b7   :  { %8013 = vst [vmem:[#allocation21_spill] sm:$0xff] %v6650_v43  ;;  %v3638_v59 = vrot.slane %v6650_v43, 4  ;;  %v3048_v60 = vrot.slane %v4558_v52, 4  ;;  %v3396_v43 = vrot.slane %v4552_v30, 4  ;;  %v2992_v49 = vrot.slane %v4557_v24, 4 }
 0x3b8   :  { %v3646_v12 = vrot.slane %v6647_v13, 4 }
 0x3b9   :  { %v6661_v47 = vpop.permute.xlu1 %3572  ;;  %v3639_v0 = vsel %vm26_vm0, 0.0, %v3638_v59  ;;  %v4578_v59 = vunpack.i.h.bf16 %v6572_v1  ;;  %v6716_v1 = vperm.slane %v6568_v39, %v7995_v36  ;;  %v6731_v39 = vperm.slane %v6578_v35, %v7995_v36 }
 0x3ba   :  { %3703 = vrot.lane.b32.xlu1 %v3639_v0, %s4846_s23  ;;  %v3384_v0 = vrot.slane %v7885_v48, 4  ;;  %v4562_v35 = vunpack.i.l.bf16 %v6616_v15  ;;  %v2995_v48 = vsel %vm26_vm0, %v4557_v24, %v2994_v10  ;;  %v2993_v24 = vsel %vm26_vm0, %v2992_v49, %v4577_v29 }
 0x3bb   :  { %8015 = vst [vmem:[#allocation17_spill] sm:$0xff] %v6716_v1  ;;  %v3050_v19 = vrot.slane %v4578_v59, 4  ;;  %v3049_v41 = vsel %vm26_vm0, %v3048_v60, %v4578_v59  ;;  %v6770_v60 = vperm.slane %v2995_v48, %v7995_v36  ;;  %v8018_v59 = vrot.slane %v6645_v50, 4 }
 0x3bc   :  { %v3397_v46 = vsel %vm26_vm0, %v3396_v43, %v4562_v35  ;;  %v8019_v43 = vrot.slane %v6641_v33, 4  ;;  %v3398_v58 = vrot.slane %v4562_v35, 4  ;;  %v6797_v6 = vperm.slane %v2993_v24, %v7995_v36 }
 0x3bd   :  { %v3051_v56 = vsel %vm26_vm0, %v4558_v52, %v3050_v19  ;;  %v4563_v19 = vunpack.i.h.bf16 %v6616_v15  ;;  %v3403_v20 = vperm.slane %v3397_v46, %v7995_v36 }
 0x3be   :  { %v6697_v3 = vpop.permute.xlu0 %4580  ;;  %v6760_v63 = vperm.slane %v3051_v56, %v7995_v36  ;;  %v6776_v56 = vsel %vm26_vm0, %v8018_v59, %v6681_v18  ;;  %v3399_v24 = vsel %vm26_vm0, %v4552_v30, %v3398_v58  ;;  %v6821_v58 = vperm.slane %v6624_v21, %v7995_v36 }
 0x3bf   :  { %v3453_v23 = vsel %vm26_vm0, %v3452_v17, %v4563_v19  ;;  %v3408_v9 = vrot.slane %v3403_v20, 4  ;;  %v3004_v17 = vrot.slane %v6797_v6, 4  ;;  %v6831_v7 = vperm.slane %v3399_v24, %v7995_v36 }
 0x3c0   :  { %v3459_v30 = vperm.slane %v3453_v23, %v7995_v36  ;;  %v8020_v23 = vunpack.i.l.bf16 %v6697_v3  ;;  %v6847_v24 = vperm.slane %v6606_v5, %v7995_v36 }
 0x3c1   :  { %v6722_v28 = vpop.permute.xlu1 %4570 }
 0x3c2   :  { %8016 = vst [vmem:[#allocation22_spill] sm:$0xff] %v6722_v28  ;;  %4625 = vrot.lane.b32.xlu1 %v4624_v42, %s4846_s23  ;;  %v3659_v42 = vsel %vm26_vm0, %v3658_v54, %v6661_v47  ;;  %v6782_v54 = vsel %vm26_vm0, %v8019_v43, %v6677_v8  ;;  %v2980_v53 = vrot.slane %v8020_v23, 4 }
 0x3c3   :  { %v6790_v59 = vperm.slane %v3659_v42, %v7995_v36  ;;  %v6932_v1 = vperm.slane %v6782_v54, %v7996_v27  ;;  %v8032_v54 = vunpack.i.l.bf16 %v6722_v28 }
 0x3c5   :  { %8028 = vst [vmem:[#allocation29_spill] sm:$0xff] %v6932_v1 }
 0x3c6   :  { %v6752_v38 = vpop.permute.xlu0 %3568 }
 0x3c7   :  { %v3647_v52 = vsel %vm26_vm0, %v3646_v12, %v6752_v38  ;;  %v6785_v12 = vperm.slane %v3049_v41, %v7995_v36 }
 0x3c8   :  { %v6766_v10 = vperm.slane %v3647_v52, %v7995_v36  ;;  %v3454_v52 = vrot.slane %v4563_v19, 4  ;;  %v3616_v19 = vrot.slane %v6621_v62, 4  ;;  %v3660_v62 = vrot.slane %v6661_v47, 4 }
 0x3c9   :  { %v4586_v15 = vpop.permute.xlu1 %4585 }
 0x3ca   :  { %v3672_v49 = vrot.slane %v6766_v10, 4  ;;  %v4588_v29 = vunpack.i.h.bf16 %v4586_v15  ;;  %v4587_v48 = vunpack.i.l.bf16 %v4586_v15 }
 0x3cc   :  { %v3441_v43 = vsel %vm26_vm0, %v3440_v37, %v4588_v29  ;;  %v3385_v41 = vsel %vm26_vm0, %v3384_v0, %v4587_v48  ;;  %v3673_v46 = vsel %vm26_vm0, %v6790_v59, %v3672_v49  ;;  %v3455_v0 = vsel %vm26_vm0, %v4553_v2, %v3454_v52 }
 0x3cd   :  { %v3447_v15 = vperm.slane %v3441_v43, %v7995_v36  ;;  %v3391_v35 = vperm.slane %v3385_v41, %v7995_v36  ;;  %v6807_v37 = vperm.slane %v3673_v46, %v7996_v27  ;;  %v7897_v41 = vunpack.i.h.bf16 %v6697_v3 }
 0x3ce   :  { %v6811_v14 = vpop.permute.xlu0 %4600  ;;  %v3442_v42 = vrot.slane %v4588_v29, 4  ;;  %v3386_v40 = vrot.slane %v4587_v48, 4  ;;  %v6828_v48 = vperm.slane %v3455_v0, %v7995_v36 }
 0x3cf   :  { %v3410_v43 = vrot.slane %v3391_v35, 4  ;;  %3735 = vrot.lane.b32.xlu1 %v6807_v37, %s4843_s6  ;;  %v3466_v2 = vrot.slane %v3447_v15, 4  ;;  %v4603_v52 = vunpack.i.h.bf16 %v6811_v14  ;;  %v4602_v46 = vunpack.i.l.bf16 %v6811_v14 }
 0x3d0   :  { %v3409_v29 = vsel %vm26_vm0, %v3408_v9, %v3391_v35  ;;  %v3036_v49 = vrot.slane %v7897_v41, 4  ;;  %v8021_v14 = vunpack.i.h.bf16 %v6546_v34  ;;  %v8022_v35 = vunpack.i.l.bf16 %v6546_v34 }
 0x3d1   :  { %v3411_v21 = vsel %vm26_vm0, %v3403_v20, %v3410_v43  ;;  %v6851_v20 = vsel %vm26_vm0, %v6614_v45, %v3616_v19  ;;  %v3467_v47 = vsel %vm26_vm0, %v3459_v30, %v3466_v2  ;;  %v6855_v43 = vperm.slane %v3409_v29, %v7996_v27  ;;  %v6872_v29 = vpop.permute.xlu2 %4595 }
 0x3d2   :  { %v3443_v9 = vsel %vm26_vm0, %v8021_v14, %v3442_v42  ;;  %v3387_v0 = vsel %vm26_vm0, %v8022_v35, %v3386_v40  ;;  %v2981_v42 = vsel %vm26_vm0, %v2980_v53, %v4602_v46  ;;  %v3037_v34 = vsel %vm26_vm0, %v3036_v49, %v4603_v52  ;;  %v6860_v40 = vpop.permute.xlu1 %4590  ;;  %8024 = vst [vmem:[#allocation27_spill] sm:$0xff] %v6872_v29 }
 0x3d3   :  { %8023 = vst [vmem:[#allocation19_spill] sm:$0xff] %v6855_v43  ;;  %v6863_v5 = vperm.slane %v3411_v21, %v7996_v27  ;;  %v3464_v14 = vrot.slane %v3459_v30, 4  ;;  %v3476_v45 = vrot.slane %v6828_v48, 4  ;;  %v6867_v19 = vperm.slane %v3443_v9, %v7995_v36 }
 0x3d4   :  { %v6870_v2 = vperm.slane %v3387_v0, %v7995_v36  ;;  %v3420_v53 = vrot.slane %v6831_v7, 4  ;;  %v3661_v49 = vsel %vm26_vm0, %v6534_v57, %v3660_v62  ;;  %v3670_v35 = vrot.slane %v6790_v59, 4 }
 0x3d5   :  { %v6879_v21 = vperm.slane %v3467_v47, %v7996_v27  ;;  %v6882_v30 = vperm.slane %v2981_v42, %v7995_v36  ;;  %v6885_v9 = vperm.slane %v3037_v34, %v7995_v36  ;;  %v3432_v0 = vrot.slane %v6855_v43, 4 }
 0x3d6   :  { %v3465_v23 = vsel %vm26_vm0, %v3464_v14, %v3447_v15  ;;  %v3421_v42 = vsel %vm26_vm0, %v3420_v53, %v6870_v2  ;;  %v3477_v34 = vsel %vm26_vm0, %v3476_v45, %v6867_v19  ;;  %v6903_v15 = vperm.slane %v6776_v56, %v7996_v27 }
 0x3d7   :  { %v4614_v41 = vpack.i.bf16 %v6879_v21, %v6863_v5  ;;  %v6894_v62 = vperm.slane %v3465_v23, %v7996_v27  ;;  %v3433_v14 = vsel %vm26_vm0, 0.0, %v3432_v0  ;;  %v6909_v23 = vperm.slane %v3421_v42, %v7996_v27 }
 0x3d8   :  { %8026 = vst [vmem:[#allocation20_spill] sm:$0xff] %v6903_v15  ;;  %v6912_v57 = vperm.slane %v3477_v34, %v7996_v27  ;;  %v3005_v45 = vsel %vm26_vm0, %v3004_v17, %v6882_v30  ;;  %v8027_v56 = vrot.slane %v6785_v12, 4  ;;  %v3671_v0 = vsel %vm26_vm0, %v3670_v35, %v6766_v10 }
 0x3d9   :  { %8025 = vst [vmem:[#allocation28_spill] sm:$0xff] %v6894_v62  ;;  %4615 = vrot.lane.b32.xlu0 %v4614_v41, %s4843_s6  ;;  %v3488_v59 = vrot.slane %v6894_v62, 4  ;;  %v6924_v47 = vperm.slane %v3661_v49, %v7995_v36  ;;  %v3648_v42 = vrot.slane %v6752_v38, 4  ;;  %v3038_v43 = vrot.slane %v4603_v52, 4 }
 0x3da   :  { %v3061_v41 = vsel %vm26_vm0, %v8027_v56, %v6885_v9  ;;  %v4644_v53 = vpack.i.bf16 %v6912_v57, %v6909_v23  ;;  %v2982_v17 = vrot.slane %v4602_v46, 4  ;;  %v6935_v10 = vpop.permute.xlu1 %4605  ;;  %v6938_v49 = vperm.slane %v3005_v45, %v7996_v27 }
 0x3db   :  { %v3489_v34 = vsel %vm26_vm0, 0.0, %v3488_v59  ;;  %v6941_v38 = vperm.slane %v3061_v41, %v7996_v27  ;;  %v6944_v35 = vperm.slane %v3671_v0, %v7996_v27  ;;  %v2608_v52 = vrot.slane %v6903_v15, 4 }
 0x3dc   :  { %v4609_v62 = vpack.i.bf16 %v3489_v34, %v3433_v14  ;;  %4645 = vrot.lane.b32.xlu1 %v4644_v53, %s4842_s5  ;;  %8029 = vst [vmem:[#allocation8_spill] sm:$0xff] %v6938_v49  ;;  %v8031_v46 = vunpack.i.h.bf16 %v6722_v28  ;;  %v2786_v14 = vrot.slane %v8032_v54, 4  ;;  %v8033_v53 = vunpack.i.h.bf16 %v6872_v29 }
 0x3dd   :  { %8030 = vst [vmem:[#allocation10_spill] sm:$0xff] %v6941_v38  ;;  %v8034_v45 = vunpack.i.l.bf16 %v6872_v29  ;;  %v3649_v41 = vsel %vm26_vm0, %v6647_v13, %v3648_v42  ;;  %v8035_v28 = vunpack.i.l.bf16 %v6697_v3  ;;  %v3694_v42 = vrot.slane %v6944_v35, 4 }
 0x3de   :  { %v2842_v59 = vrot.slane %v8031_v46, 4  ;;  %v2830_v56 = vrot.slane %v8033_v53, 4  ;;  %4610 = vrot.lane.b32.xlu2 %v4609_v62, %s4846_s23  ;;  %v3028_v46 = vrot.slane %v6938_v49, 4  ;;  %v8036_v53 = vunpack.i.h.bf16 %v6697_v3 }
 0x3df   :  { %v2774_v34 = vrot.slane %v8034_v45, 4  ;;  %v2983_v54 = vsel %vm26_vm0, %v8035_v28, %v2982_v17  ;;  %v3084_v62 = vrot.slane %v6941_v38, 4  ;;  %v2609_v0 = vsel %vm26_vm0, 0.0, %v2608_v52 }
 0x3e0   :  { %v3039_v29 = vsel %vm26_vm0, %v8036_v53, %v3038_v43  ;;  %v3029_v13 = vsel %vm26_vm0, 0.0, %v3028_v46  ;;  %v2664_v15 = vrot.slane %v6932_v1, 4  ;;  %v3006_v49 = vrot.slane %v6882_v30, 4 }
 0x3e1   :  { %v3085_v28 = vsel %vm26_vm0, 0.0, %v3084_v62  ;;  %v8037_v3 = vrot.slane %v6599_v31, 4  ;;  %v8038_v17 = vrot.slane %v6603_v55, 4  ;;  %v8039_v53 = vunpack.i.l.bf16 %v6860_v40 }
 0x3e2   :  { %v4619_v45 = vpack.i.bf16 %v3085_v28, %v3029_v13  ;;  %v2665_v1 = vsel %vm26_vm0, 0.0, %v2664_v15  ;;  %v7909_v31 = vunpack.i.h.bf16 %v6935_v10  ;;  %v8040_v62 = vunpack.i.l.bf16 %v6935_v10 }
 0x3e3   :  { %v3197_v43 = vsel %vm26_vm0, %v6582_v61, %v8037_v3  ;;  %v3253_v46 = vsel %vm26_vm0, %v6595_v16, %v8038_v17  ;;  %v2787_v52 = vsel %vm26_vm0, %v2786_v14, %v8039_v53  ;;  %v4649_v55 = vpack.i.bf16 %v2665_v1, %v2609_v0 }
 0x3e4   :  { %v6988_v30 = vperm.slane %v3197_v43, %v7996_v27  ;;  %v2775_v61 = vsel %vm26_vm0, %v2774_v34, %v8040_v62  ;;  %v6995_v3 = vperm.slane %v3253_v46, %v7996_v27  ;;  %4620 = vrot.lane.b32.xlu0 %v4619_v45, %s4846_s23  ;;  %v3695_v16 = vsel %vm26_vm0, 0.0, %v3694_v42 }
 0x3e5   :  { %v3434_v14 = vrot.slane %v6863_v5, 4  ;;  %v3490_v15 = vrot.slane %v6879_v21, 4  ;;  %v3062_v28 = vrot.slane %v6885_v9, 4  ;;  %v7004_v43 = vperm.slane %v2787_v52, %v7995_v36  ;;  %4650 = vrot.lane.b32.xlu1 %v4649_v55, %s4846_s23 }
 0x3e6   :  { %v3220_v13 = vrot.slane %v6988_v30, 4  ;;  %3731 = vrot.lane.b32.xlu2 %v3695_v16, %s4846_s23  ;;  %v3276_v1 = vrot.slane %v6995_v3, 4  ;;  %v4639_v34 = vpack.i.bf16 %v6995_v3, %v6988_v30  ;;  %v7012_v5 = vperm.slane %v3649_v41, %v7995_v36 }
 0x3e7   :  { %v7015_v21 = vperm.slane %v2983_v54, %v7995_v36  ;;  %v7018_v9 = vperm.slane %v3039_v29, %v7995_v36  ;;  %v8041_v45 = vunpack.i.h.bf16 %v6860_v40  ;;  %v2831_v17 = vsel %vm26_vm0, %v2830_v56, %v7909_v31 }
 0x3e8   :  { %v3221_v0 = vsel %vm26_vm0, 0.0, %v3220_v13  ;;  %v7028_v46 = vperm.slane %v2775_v61, %v7995_v36  ;;  %v3277_v41 = vsel %vm26_vm0, 0.0, %v3276_v1  ;;  %v3435_v54 = vsel %vm26_vm0, 0.0, %v3434_v14 }
 0x3e9   :  { %v2843_v42 = vsel %vm26_vm0, %v2842_v59, %v8041_v45  ;;  %v3491_v29 = vsel %vm26_vm0, 0.0, %v3490_v15  ;;  %v4664_v53 = vpack.i.bf16 %v3277_v41, %v3221_v0  ;;  %v3007_v52 = vsel %vm26_vm0, %v6797_v6, %v3006_v49 }
 0x3ea   :  { %v3682_v30 = vrot.slane %v6924_v47, 4  ;;  %v2798_v59 = vrot.slane %v7004_v43, 4  ;;  %v3625_v56 = vperm.slane %v6851_v20, %v7996_v27  ;;  %v3063_v62 = vsel %vm26_vm0, %v6785_v12, %v3062_v28 }
 0x3eb   :  { %v7042_v61 = vperm.slane %v2843_v42, %v7995_v36  ;;  %v8042_v55 = vrot.slane %v6821_v58, 4  ;;  %v8043_v6 = vrot.slane %v6705_v25, 4  ;;  %v8044_v20 = vrot.slane %v6701_v26, 4 }
 0x3ec   :  { %v7061_v12 = vperm.slane %v2831_v17, %v7995_v36  ;;  %v2799_v14 = vsel %vm26_vm0, %v2798_v59, %v7028_v46  ;;  %v4629_v15 = vpack.i.bf16 %v3491_v29, %v3435_v54  ;;  %v3015_v13 = vperm.slane %v3007_v52, %v7996_v27  ;;  %3707 = vrot.lane.b32.xlu0 %v3625_v56, %s4843_s6 }
 0x3ed   :  { %v3627_v3 = vsel %vm26_vm0, %v8042_v55, %v6847_v24  ;;  %v7052_v49 = vsel %vm26_vm0, %v8043_v6, %v6748_v32  ;;  %v7058_v16 = vsel %vm26_vm0, %v8044_v20, %v6737_v22  ;;  %v3071_v28 = vperm.slane %v3063_v62, %v7996_v27  ;;  %4665 = vrot.lane.b32.xlu1 %v4664_v53, %s4845_s16 }
 0x3ee   :  { %v3683_v1 = vsel %vm26_vm0, %v3682_v30, %v7012_v5  ;;  %v8045_v0 = vrot.slane %v6770_v60, 4  ;;  %v8046_v42 = vrot.slane %v6760_v63, 4  ;;  %4630 = vrot.lane.b32.xlu2 %v4629_v15, %s4845_s16  ;;  %v3696_v41 = vrot.slane %v6807_v37, 4 }
 0x3ef   :  { %v3640_v54 = vrot.slane %v3625_v56, 4  ;;  %v8047_v29 = vrot.slane %v6681_v18, 4  ;;  %v8048_v30 = vrot.slane %v6677_v8, 4  ;;  %v3628_v62 = vrot.slane %v6847_v24, 4 }
 0x3f0   :  { %v3017_v45 = vsel %vm26_vm0, %v8045_v0, %v7015_v21  ;;  %v3073_v17 = vsel %vm26_vm0, %v8046_v42, %v7018_v9  ;;  %v3478_v55 = vrot.slane %v6867_v19, 4  ;;  %v2854_v6 = vrot.slane %v7042_v61, 4 }
 0x3f1   :  { %v2587_v52 = vsel %vm26_vm0, %v6645_v50, %v8047_v29  ;;  %v2643_v59 = vsel %vm26_vm0, %v6641_v33, %v8048_v30  ;;  %v3422_v37 = vrot.slane %v6870_v2, 4  ;;  %v7097_v18 = vperm.slane %v3017_v45, %v7996_v27 }
 0x3f2   :  { %v7093_v53 = vperm.slane %v2587_v52, %v7996_v27  ;;  %v7100_v50 = vperm.slane %v3073_v17, %v7996_v27  ;;  %v7103_v8 = vperm.slane %v2643_v59, %v7996_v27  ;;  %v2855_v33 = vsel %vm26_vm0, %v2854_v6, %v7061_v12 }
 0x3f3   :  { %v7108_v24 = vperm.slane %v3683_v1, %v7996_v27  ;;  %v7111_v19 = vperm.slane %v2799_v14, %v7996_v27  ;;  %v4634_v56 = vpack.i.bf16 %v3071_v28, %v3015_v13  ;;  %v3697_v20 = vsel %vm26_vm0, 0.0, %v3696_v41 }
 0x3f4   :  { %v2610_v2 = vrot.slane %v7093_v53, 4  ;;  %v3641_v15 = vsel %vm26_vm0, 0.0, %v3640_v54  ;;  %v2666_v0 = vrot.slane %v7103_v8, 4  ;;  %v3030_v45 = vrot.slane %v3015_v13, 4  ;;  %4640 = vrot.lane.b32.xlu0 %v4639_v34, %s4843_s6 }
 0x3f5   :  { %8049 = vst [vmem:[#allocation12_spill] sm:$0xff] %v7111_v19  ;;  %v7122_v1 = vsel %vm26_vm0, %v6821_v58, %v3628_v62  ;;  %v8050_v14 = vrot.slane %v6748_v32, 4  ;;  %v4684_v41 = vpack.i.bf16 %v7100_v50, %v7097_v18  ;;  %v3086_v29 = vrot.slane %v3071_v28, 4  ;;  %3743 = vrot.lane.b32.xlu1 %v7108_v24, %s4842_s5 }
 0x3f6   :  { %v7118_v42 = vsel %vm26_vm0, 0.0, %v2610_v2  ;;  %v7131_v54 = vperm.slane %v2855_v33, %v7996_v27  ;;  %v7134_v13 = vsel %vm26_vm0, 0.0, %v2666_v0  ;;  %v2822_v58 = vrot.slane %v7111_v19, 4  ;;  %4635 = vrot.lane.b32.xlu2 %v4634_v56, %s4843_s6  ;;  %v8067_v19 = vld [vmem:[#allocation24_spill] sm:$0xff] }
 0x3f7   :  { %v2397_v17 = vsel %vm26_vm0, %v6705_v25, %v8050_v14  ;;  %v8052_v28 = vrot.slane %v6637_v4, 4  ;;  %v3262_v30 = vrot.slane %v6658_v51, 4  ;;  %v3423_v59 = vsel %vm26_vm0, %v6831_v7, %v3422_v37 }
 0x3f8   :  { %8051 = vst [vmem:[#allocation30_spill] sm:$0xff] %v7131_v54  ;;  %v7143_v52 = vperm.slane %v2397_v17, %v7996_v27  ;;  %v3479_v62 = vsel %vm26_vm0, %v6828_v48, %v3478_v55  ;;  %v3031_v6 = vsel %vm26_vm0, 0.0, %v3030_v45  ;;  %v7162_v2 = vperm.slane %v3423_v59, %v7996_v27 }
 0x3f9   :  { %v3207_v34 = vsel %vm26_vm0, %v8052_v28, %v6666_v44  ;;  %v7165_v56 = vperm.slane %v3479_v62, %v7996_v27  ;;  %v3087_v0 = vsel %vm26_vm0, 0.0, %v3086_v29  ;;  %v2878_v14 = vrot.slane %v7131_v54, 4 }
 0x3fa   :  { %v7159_v33 = vperm.slane %v3207_v34, %v7996_v27  ;;  %v3263_v7 = vsel %vm26_vm0, %v3262_v30, %v6673_v11  ;;  %v8053_v48 = vrot.slane %v6737_v22, 4  ;;  %v7176_v37 = vperm.slane %v3627_v3, %v7996_v27 }
 0x3fb   :  { %v7180_v17 = vperm.slane %v3263_v7, %v7996_v27  ;;  %v2823_v28 = vsel %vm26_vm0, 0.0, %v2822_v58  ;;  %v2420_v22 = vrot.slane %v7143_v52, 4  ;;  %v8058_v58 = vld [vmem:[#allocation16_spill] sm:$0xff]  ;;  %v8062_v25 = vrot.slane %v6731_v39, 4 }
 0x3fc   :  { %v2453_v55 = vsel %vm26_vm0, %v6701_v26, %v8053_v48  ;;  %v3222_v45 = vrot.slane %v7159_v33, 4  ;;  %v8054_v26 = vld [vmem:[#allocation17_spill] sm:$0xff]  ;;  %v8059_v29 = vrot.slane %v8058_v58, 4  ;;  %3739 = vrot.lane.b32.xlu0 %v3697_v20, %s4845_s16  ;;  %v8065_v20 = vld [vmem:[#allocation7_spill] sm:$0xff] }
 0x3fd   :  { %v7186_v34 = vperm.slane %v2453_v55, %v7996_v27  ;;  %v8055_v30 = vrot.slane %v8054_v26, 4  ;;  %v3278_v62 = vrot.slane %v7180_v17, 4  ;;  %v8057_v48 = vld [vmem:[#allocation25_spill] sm:$0xff]  ;;  %v7207_v31 = vsel %vm26_vm0, 0.0, %v2420_v22  ;;  %4685 = vrot.lane.b32.xlu1 %v4684_v41, %s4842_s5 }
 0x3fe   :  { %v7194_v59 = vsel %vm26_vm0, 0.0, %v3222_v45  ;;  %v2463_v55 = vsel %vm26_vm0, %v8059_v29, %v8057_v48  ;;  %8060 = vst [vmem:[#allocation32_spill] sm:$0xff] %v7207_v31  ;;  %v2409_v22 = vsel %vm26_vm0, %v8054_v26, %v8062_v25  ;;  %3711 = vrot.lane.b32.xlu2 %v3641_v15, %s4845_s16  ;;  %v8064_v26 = vrot.slane %v8057_v48, 4  ;;  %v8070_v48 = vld [vmem:[#allocation6_spill] sm:$0xff] }
 0x3ff   :  { %v2407_v3 = vsel %vm26_vm0, %v8055_v30, %v6731_v39  ;;  %v2476_v30 = vrot.slane %v7186_v34, 4  ;;  %v7211_v45 = vperm.slane %v2463_v55, %v7996_v27  ;;  %v2879_v55 = vsel %vm26_vm0, 0.0, %v2878_v14 }
 0x400   :  { %v7198_v7 = vperm.slane %v2407_v3, %v7996_v27  ;;  %v7215_v3 = vsel %vm26_vm0, 0.0, %v3278_v62  ;;  %v3642_v39 = vrot.slane %v7176_v37, 4  ;;  %v7242_v14 = vperm.slane %v2409_v22, %v7996_v27 }
 0x401   :  { %8061 = vst [vmem:[#allocation31_spill] sm:$0xff] %v7211_v45  ;;  %v7230_v62 = vsel %vm26_vm0, 0.0, %v2476_v30  ;;  %v2478_v41 = vrot.slane %v7211_v45, 4  ;;  %v2465_v30 = vsel %vm26_vm0, %v8058_v58, %v8064_v26  ;;  %v8066_v32 = vunpack.i.l.bf16 %v8065_v20 }
 0x402   :  { %8056 = vst [vmem:[#allocation33_spill] sm:$0xff] %v7198_v7  ;;  %v2422_v29 = vrot.slane %v7198_v7, 4  ;;  %v8068_v25 = vunpack.i.h.bf16 %v8065_v20  ;;  %v8069_v7 = vld [vmem:[#allocation26_spill] sm:$0xff]  ;;  %v7260_v22 = vperm.slane %v2465_v30, %v7996_v27  ;;  %v8071_v38 = vunpack.i.l.bf16 %v8070_v48 }
 0x403   :  { %8063 = vst [vmem:[#allocation3_spill] sm:$0xff] %v7230_v62  ;;  %v2337_v54 = vsel %vm204_vm6, %v8067_v19, %v8066_v32  ;;  %v7257_v45 = vsel %vm26_vm0, 0.0, %v2478_v41  ;;  %v8072_v26 = vunpack.i.h.bf16 %v8070_v48  ;;  %v2424_v32 = vrot.slane %v7242_v14, 4  ;;  %v8074_v48 = vld [vmem:[#allocation13_spill] sm:$0xff] }
 0x404   :  { %v7238_v15 = vsel %vm26_vm0, 0.0, %v2422_v29  ;;  %v2344_v29 = vsel %vm204_vm6, %v8069_v7, %v8068_v25  ;;  %v2338_v58 = vsel %vm206_vm7, %v2337_v54, %v8071_v38  ;;  %v4659_v25 = vpack.i.bf16 %v3087_v0, %v3031_v6  ;;  %v8073_v54 = vld [vmem:[#allocation14_spill] sm:$0xff] }
 0x405   :  { %v2345_v31 = vsel %vm206_vm7, %v2344_v29, %v8072_v26  ;;  %v4794_v19 = vpack.i.bf16 %v7257_v45, %v7238_v15  ;;  %v3774_v7 = vrot.slane %v2338_v58, 4  ;;  %v2480_v41 = vrot.slane %v7260_v22, 4 }
 0x406   :  { %v3775_v20 = vrot.slane %v2345_v31, 4  ;;  %v4654_v62 = vpack.i.bf16 %v2879_v55, %v2823_v28  ;;  %v7275_v38 = vsel %vm26_vm0, 0.0, %v2424_v32  ;;  %4660 = vrot.lane.b32.xlu0 %v4659_v25, %s4845_s16  ;;  %v3643_v31 = vsel %vm26_vm0, 0.0, %v3642_v39 }
 0x407   :  { %v7279_v29 = vsel %vm1879_vm8, %v8073_v54, %v3774_v7  ;;  %v3436_v6 = vrot.slane %v6909_v23, 4  ;;  %v3492_v0 = vrot.slane %v6912_v57, 4  ;;  %v7290_v28 = vsel %vm26_vm0, 0.0, %v2480_v41  ;;  %3719 = vrot.lane.b32.xlu1 %v3643_v31, %s4847_s26 }
 0x408   :  { %v7283_v26 = vsel %vm1879_vm8, %v8074_v48, %v3775_v20  ;;  %4655 = vrot.lane.b32.xlu2 %v4654_v62, %s4846_s23  ;;  %v4814_v55 = vpack.i.bf16 %v7290_v28, %v7275_v38  ;;  %v2856_v58 = vrot.slane %v7061_v12, 4  ;;  %v2800_v32 = vrot.slane %v7028_v46, 4 }
 0x409   :  { %v3437_v39 = vsel %vm26_vm0, 0.0, %v3436_v6  ;;  %v3493_v23 = vsel %vm26_vm0, 0.0, %v3492_v0  ;;  %v3018_v57 = vrot.slane %v7015_v21, 4  ;;  %v3074_v7 = vrot.slane %v7018_v9, 4 }
 0x40a   :  { %v4669_v20 = vpack.i.bf16 %v3493_v23, %v3437_v39  ;;  %v2801_v62 = vsel %vm26_vm0, %v7004_v43, %v2800_v32  ;;  %v2857_v25 = vsel %vm26_vm0, %v7042_v61, %v2856_v58  ;;  %v3438_v46 = vrot.slane %v7162_v2, 4  ;;  %v8079_v39 = vld [vmem:[#allocation9_spill] sm:$0xff] }
 0x40b   :  { %v3494_v12 = vrot.slane %v7165_v56, 4  ;;  %v8075_v41 = vunpack.i.h.bf16 %v6860_v40  ;;  %v8076_v21 = vunpack.i.l.bf16 %v6860_v40  ;;  %v8077_v43 = vpack.i.bf16 %v7134_v13, %v7118_v42 }
 0x40c   :  { %v7320_v61 = vperm.slane %v2801_v62, %v7996_v27  ;;  %v7326_v48 = vsel %vm26_vm0, 0.0, %v3438_v46  ;;  %v8078_v40 = vunpack.i.h.bf16 %v6935_v10  ;;  %v3019_v42 = vsel %vm26_vm0, %v6770_v60, %v3018_v57 }
 0x40d   :  { %v2844_v54 = vrot.slane %v8075_v41, 4  ;;  %v2788_v9 = vrot.slane %v8076_v21, 4  ;;  %v7329_v31 = vsel %vm26_vm0, 0.0, %v3494_v12  ;;  %v3075_v13 = vsel %vm26_vm0, %v6760_v63, %v3074_v7 }
 0x40e   :  { %3715 = vrot.lane.b32.xlu0 %v7176_v37, %s4842_s5  ;;  %v7323_v37 = vperm.slane %v2857_v25, %v7996_v27  ;;  %v2832_v6 = vrot.slane %v8078_v40, 4  ;;  %v4724_v0 = vpack.i.bf16 %v7329_v31, %v7326_v48  ;;  %v7340_v58 = vperm.slane %v3019_v42, %v7996_v27  ;;  %v8081_v25 = vld [vmem:[#allocation22_spill] sm:$0xff]  ;;  %v8085_v42 = vld [vmem:[#allocation5_spill] sm:$0xff] }
 0x40f   :  { %4705 = vrot.lane.b32.xlu1 %v8077_v43, %s4845_s16  ;;  %v7343_v32 = vperm.slane %v3075_v13, %v7996_v27  ;;  %v7347_v23 = vperm.slane %v8079_v39, %v7995_v36  ;;  %v8082_v46 = vunpack.i.h.bf16 %v8081_v25  ;;  %v8083_v63 = vunpack.i.l.bf16 %v6935_v10  ;;  %v8084_v43 = vld [vmem:[#allocation15_spill] sm:$0xff] }
 0x410   :  { %4670 = vrot.lane.b32.xlu2 %v4669_v20, %s4847_s26  ;;  %v8080_v20 = vld [vmem:[#allocation11_spill] sm:$0xff]  ;;  %v4679_v7 = vpack.i.bf16 %v7323_v37, %v7320_v61  ;;  %v3034_v41 = vrot.slane %v7340_v58, 4  ;;  %v7366_v40 = vperm.slane %v8084_v43, %v7995_v36  ;;  %v8086_v10 = vunpack.i.l.bf16 %v8081_v25 }
 0x411   :  { %v7351_v62 = vperm.slane %v8080_v20, %v7995_v36  ;;  %v2845_v60 = vsel %vm26_vm0, %v8082_v46, %v2844_v54  ;;  %v2776_v57 = vrot.slane %v8083_v63, 4  ;;  %v4744_v12 = vpack.i.bf16 %v7343_v32, %v7340_v58  ;;  %v8087_v39 = vld [vmem:[#allocation27_spill] sm:$0xff] }
 0x412   :  { %v3090_v21 = vrot.slane %v7343_v32, 4  ;;  %v7370_v54 = vperm.slane %v8085_v42, %v7995_v36  ;;  %v2789_v13 = vsel %vm26_vm0, %v8086_v10, %v2788_v9  ;;  %v8088_v20 = vunpack.i.h.bf16 %v8087_v39 }
 0x413   :  { %v3684_v63 = vrot.slane %v7012_v5, 4  ;;  %v7380_v30 = vperm.slane %v2845_v60, %v7995_v36  ;;  %v7384_v43 = vsel %vm26_vm0, 0.0, %v3034_v41  ;;  %v8089_v25 = vunpack.i.l.bf16 %v8087_v39 }
 0x414   :  { %v2833_v46 = vsel %vm26_vm0, %v8088_v20, %v2832_v6  ;;  %v7387_v42 = vsel %vm26_vm0, 0.0, %v3090_v21  ;;  %v8090_v6 = vpack.i.bf16 %v7103_v8, %v7093_v53  ;;  %v8091_v5 = vpack.i.bf16 %v7215_v3, %v7194_v59 }
 0x415   :  { %v2777_v9 = vsel %vm26_vm0, %v8089_v25, %v2776_v57  ;;  %v2596_v60 = vrot.slane %v7351_v62, 4  ;;  %v4769_v41 = vpack.i.bf16 %v7387_v42, %v7384_v43  ;;  %v7405_v21 = vperm.slane %v2789_v13, %v7995_v36  ;;  %v8102_v42 = vld [vmem:[#allocation31_spill] sm:$0xff] }
 0x416   :  { %4680 = vrot.lane.b32.xlu0 %v4679_v7, %s4843_s6  ;;  %v2652_v7 = vrot.slane %v7347_v23, 4  ;;  %v7408_v57 = vperm.slane %v2833_v46, %v7995_v36  ;;  %v7412_v53 = vperm.slane %v7052_v49, %v7996_v27  ;;  %v7416_v8 = vperm.slane %v7058_v16, %v7996_v27 }
 0x417   :  { %4720 = vrot.lane.b32.xlu1 %v8091_v5, %s4847_s26  ;;  %v2597_v59 = vsel %vm26_vm0, %v2596_v60, %v7370_v54  ;;  %v7423_v10 = vperm.slane %v2777_v9, %v7995_v36  ;;  %v3685_v13 = vsel %vm26_vm0, %v6924_v47, %v3684_v63  ;;  %v3208_v16 = vrot.slane %v6666_v44, 4 }
 0x418   :  { %4675 = vrot.lane.b32.xlu2 %v8090_v6, %s4843_s6  ;;  %v2653_v3 = vsel %vm26_vm0, %v2652_v7, %v7366_v40  ;;  %v7428_v39 = vperm.slane %v2597_v59, %v7996_v27  ;;  %v3264_v20 = vrot.slane %v6673_v11, 4  ;;  %v2866_v46 = vrot.slane %v7380_v30, 4 }
 0x419   :  { %v7431_v49 = vperm.slane %v2653_v3, %v7996_v27  ;;  %v2810_v25 = vrot.slane %v7405_v21, 4  ;;  %v7442_v63 = vperm.slane %v3685_v13, %v7996_v27  ;;  %v2418_v6 = vrot.slane %v7412_v53, 4 }
 0x41a   :  { %v2612_v36 = vrot.slane %v7428_v39, 4  ;;  %v2474_v44 = vrot.slane %v7416_v8, 4  ;;  %v8092_v11 = vpack.i.bf16 %v7165_v56, %v7162_v2  ;;  %v2867_v60 = vsel %vm26_vm0, %v2866_v46, %v7408_v57 }
 0x41b   :  { %v2668_v9 = vrot.slane %v7431_v49, 4  ;;  %v4734_v47 = vpack.i.bf16 %v7431_v49, %v7428_v39  ;;  %v2811_v5 = vsel %vm26_vm0, %v2810_v25, %v7423_v10  ;;  %v8093_v3 = vpack.i.bf16 %v7180_v17, %v7159_v33 }
 0x41c   :  { %v2613_v7 = vsel %vm26_vm0, 0.0, %v2612_v36  ;;  %v3209_v56 = vsel %vm26_vm0, %v6637_v4, %v3208_v16  ;;  %v3265_v13 = vsel %vm26_vm0, %v6658_v51, %v3264_v20  ;;  %v2419_v46 = vsel %vm26_vm0, 0.0, %v2418_v6 }
 0x41d   :  { %v2669_v59 = vsel %vm26_vm0, 0.0, %v2668_v9  ;;  %v7467_v39 = vperm.slane %v3209_v56, %v7996_v27  ;;  %v7470_v49 = vperm.slane %v3265_v13, %v7996_v27  ;;  %v2475_v33 = vsel %vm26_vm0, 0.0, %v2474_v44 }
 0x41e   :  { %4695 = vrot.lane.b32.xlu0 %v8092_v11, %s4844_s11  ;;  %v4759_v2 = vpack.i.bf16 %v2669_v59, %v2613_v7  ;;  %v7475_v17 = vperm.slane %v2811_v5, %v7996_v27  ;;  %v7478_v25 = vperm.slane %v2867_v60, %v7996_v27  ;;  %v3698_v4 = vrot.slane %v7108_v24, 4 }
 0x41f   :  { %3751 = vrot.lane.b32.xlu1 %v7442_v63, %s4844_s11  ;;  %v3224_v51 = vrot.slane %v7467_v39, 4  ;;  %v3280_v16 = vrot.slane %v7470_v49, 4  ;;  %v4749_v20 = vpack.i.bf16 %v7470_v49, %v7467_v39  ;;  %v4699_v36 = vpack.i.bf16 %v2475_v33, %v2419_v46 }
 0x420   :  { %4690 = vrot.lane.b32.xlu2 %v8093_v3, %s4842_s5  ;;  %v4739_v44 = vpack.i.bf16 %v7478_v25, %v7475_v17  ;;  %v3032_v11 = vrot.slane %v7097_v18, 4  ;;  %v3088_v5 = vrot.slane %v7100_v50, 4  ;;  %v3699_v60 = vsel %vm26_vm0, 0.0, %v3698_v4 }
 0x421   :  { %v3225_v9 = vsel %vm26_vm0, 0.0, %v3224_v51  ;;  %v3281_v6 = vsel %vm26_vm0, 0.0, %v3280_v16  ;;  %v2824_v7 = vrot.slane %v7320_v61, 4  ;;  %v2880_v59 = vrot.slane %v7323_v37, 4 }
 0x422   :  { %v4774_v24 = vpack.i.bf16 %v3281_v6, %v3225_v9  ;;  %v3637_v3 = vperm.slane %v7122_v1, %v7996_v27  ;;  %v3033_v18 = vsel %vm26_vm0, 0.0, %v3032_v11  ;;  %v3089_v50 = vsel %vm26_vm0, 0.0, %v3088_v5 }
 0x423   :  { %v2825_v56 = vsel %vm26_vm0, 0.0, %v2824_v7  ;;  %v2881_v13 = vsel %vm26_vm0, 0.0, %v2880_v59  ;;  %v4714_v49 = vpack.i.bf16 %v3089_v50, %v3033_v18  ;;  %v2868_v4 = vrot.slane %v7408_v57, 4 }
 0x424   :  { %v3644_v39 = vrot.slane %v3637_v3, 4  ;;  %v4709_v61 = vpack.i.bf16 %v2881_v13, %v2825_v56  ;;  %v2812_v51 = vrot.slane %v7423_v10, 4  ;;  %v2598_v16 = vrot.slane %v7370_v54, 4 }
 0x425   :  { %v2869_v48 = vsel %vm26_vm0, %v7380_v30, %v2868_v4  ;;  %v8094_v54 = vpack.i.bf16 %v7186_v34, %v7143_v52  ;;  %v2826_v56 = vrot.slane %v7475_v17, 4  ;;  %v8097_v4 = vld [vmem:[#allocation3_spill] sm:$0xff] }
 0x426   :  { %4700 = vrot.lane.b32.xlu0 %v4699_v36, %s4846_s23  ;;  %v3645_v37 = vsel %vm26_vm0, 0.0, %v3644_v39  ;;  %v2654_v36 = vrot.slane %v7366_v40, 4  ;;  %v2813_v9 = vsel %vm26_vm0, %v7405_v21, %v2812_v51  ;;  %v2599_v31 = vsel %vm26_vm0, %v7351_v62, %v2598_v16  ;;  %v8095_v39 = vld [vmem:[#allocation28_spill] sm:$0xff] }
 0x427   :  { %4740 = vrot.lane.b32.xlu1 %v4739_v44, %s4842_s5  ;;  %v7536_v40 = vperm.slane %v2599_v31, %v7996_v27  ;;  %v2821_v62 = vperm.slane %v2813_v9, %v7996_v27  ;;  %v2877_v10 = vperm.slane %v2869_v48, %v7996_v27  ;;  %v8098_v51 = vld [vmem:[#allocation32_spill] sm:$0xff] }
 0x428   :  { %3747 = vrot.lane.b32.xlu2 %v3699_v60, %s4847_s26  ;;  %v8099_v16 = vpack.i.bf16 %v8097_v4, %v8098_v51  ;;  %v8107_v51 = vld [vmem:[#allocation23_spill] sm:$0xff] }
 0x429   :  { %v4789_v6 = vpack.i.bf16 %v2877_v10, %v2821_v62  ;;  %v2828_v44 = vrot.slane %v2821_v62, 4  ;;  %v2884_v11 = vrot.slane %v2877_v10, 4 }
 0x42c   :  { %v7505_v1 = vpop.permute.xlu1 %3703 }
 0x42e   :  { %4715 = vrot.lane.b32.xlu0 %v4714_v49, %s4847_s26  ;;  %v8096_v49 = vld [vmem:[#allocation19_spill] sm:$0xff] }
 0x42f   :  { %3727 = vrot.lane.b32.xlu1 %v3645_v37, %s4849_s28 }
 0x430   :  { %4710 = vrot.lane.b32.xlu2 %v4709_v61, %s4845_s16 }
 0x434   :  { %v7510_v46 = vpop.permute.xlu1 %4625 }
 0x436   :  { %3723 = vrot.lane.b32.xlu0 %v3637_v3, %s4844_s11  ;;  %v2885_v3 = vsel %vm26_vm0, 0.0, %v2884_v11 }
 0x437   :  { %4760 = vrot.lane.b32.xlu1 %v4759_v2, %s4847_s26 }
 0x438   :  { %4725 = vrot.lane.b32.xlu2 %v4724_v0, %s4849_s28  ;;  %v4611_v33 = vpop.permute.xlu2 %4610  ;;  %v2655_v0 = vsel %vm26_vm0, %v7347_v23, %v2654_v36 }
 0x439   :  { %v7539_v21 = vperm.slane %v2655_v0, %v7996_v27  ;;  %v4613_v7 = vunpack.i.h.bf16 %v4611_v33  ;;  %v4612_v59 = vunpack.i.l.bf16 %v4611_v33 }
 0x43b   :  { %v4784_v23 = vpack.i.bf16 %v7539_v21, %v7536_v40  ;;  %v2670_v2 = vrot.slane %v7539_v21, 4  ;;  %v3552_v61 = vsel %vm194_vm1, %v8096_v49, %v4612_v59 }
 0x43d   :  { %v2671_v5 = vsel %vm26_vm0, 0.0, %v2670_v2 }
 0x43e   :  { %4735 = vrot.lane.b32.xlu0 %v4734_v47, %s4842_s5  ;;  %v2614_v47 = vrot.slane %v7536_v40, 4  ;;  %v2827_v40 = vsel %vm26_vm0, 0.0, %v2826_v56 }
 0x43f   :  { %4775 = vrot.lane.b32.xlu1 %v4774_v24, %s4849_s28  ;;  %v3700_v24 = vrot.slane %v7442_v63, 4  ;;  %v3559_v63 = vsel %vm194_vm1, %v8095_v39, %v4613_v7 }
 0x440   :  { %4730 = vrot.lane.b32.xlu2 %v8094_v54, %s4843_s6  ;;  %v3732_v57 = vpop.permute.xlu2 %3731  ;;  %v2615_v27 = vsel %vm26_vm0, 0.0, %v2614_v47 }
 0x441   :  { %v3736_v30 = vpop.permute.xlu1 %3735  ;;  %v3765_v52 = vsel %vm194_vm1, %v6944_v35, %v3732_v57  ;;  %v4799_v35 = vpack.i.bf16 %v2671_v5, %v2615_v27  ;;  %v3701_v18 = vsel %vm26_vm0, 0.0, %v3700_v24  ;;  %v8100_v27 = vld [vmem:[#allocation10_spill] sm:$0xff]  ;;  %v8101_v24 = vld [vmem:[#allocation8_spill] sm:$0xff] }
 0x442   :  { %v7548_v34 = vsel %vm196_vm2, %v3765_v52, %v3736_v30 }
 0x446   :  { %4750 = vrot.lane.b32.xlu0 %v4749_v20, %s4844_s11  ;;  %v2829_v20 = vsel %vm26_vm0, 0.0, %v2828_v44 }
 0x447   :  { %4790 = vrot.lane.b32.xlu1 %v4789_v6, %s4844_s11  ;;  %v4804_v13 = vpack.i.bf16 %v2885_v3, %v2829_v20  ;;  %v8105_v20 = vld [vmem:[#allocation21_spill] sm:$0xff] }
 0x448   :  { %4745 = vrot.lane.b32.xlu2 %v4744_v12, %s4844_s11  ;;  %v4631_v60 = vpop.permute.xlu2 %4630  ;;  %v2882_v12 = vrot.slane %v7478_v25, 4  ;;  %v3758_v3 = vsel %vm194_vm1, %v8105_v20, %v7505_v1 }
 0x449   :  { %v4633_v37 = vunpack.i.h.bf16 %v4631_v60  ;;  %v4632_v33 = vunpack.i.l.bf16 %v4631_v60 }
 0x44a   :  { %v2883_v21 = vsel %vm26_vm0, 0.0, %v2882_v12 }
 0x44b   :  { %v4616_v50 = vpop.permute.xlu0 %4615  ;;  %v4764_v62 = vpack.i.bf16 %v2883_v21, %v2827_v40  ;;  %v8110_v21 = vld [vmem:[#allocation20_spill] sm:$0xff] }
 0x44c   :  { %v4618_v58 = vunpack.i.h.bf16 %v4616_v50  ;;  %v4617_v32 = vunpack.i.l.bf16 %v4616_v50 }
 0x44e   :  { %4755 = vrot.lane.b32.xlu0 %v8099_v16, %s4845_s16  ;;  %v3553_v17 = vsel %vm196_vm2, %v3552_v61, %v4617_v32  ;;  %v3560_v25 = vsel %vm196_vm2, %v3559_v63, %v4618_v58  ;;  %v4646_v36 = vpop.permute.xlu1 %4645  ;;  %v4627_v32 = vunpack.i.l.bf16 %v7510_v46 }
 0x44f   :  { %4805 = vrot.lane.b32.xlu1 %v4804_v13, %s4849_s28  ;;  %v3554_v9 = vsel %vm198_vm3, %v3553_v17, %v4632_v33  ;;  %v3561_v48 = vsel %vm198_vm3, %v3560_v25, %v4633_v37  ;;  %v4648_v0 = vunpack.i.h.bf16 %v4646_v36  ;;  %v4647_v54 = vunpack.i.l.bf16 %v4646_v36  ;;  %v8106_v33 = vld [vmem:[#allocation18_spill] sm:$0xff] }
 0x450   :  { %3755 = vrot.lane.b32.xlu2 %v3701_v18, %s4849_s28  ;;  %v4636_v31 = vpop.permute.xlu2 %4635 }
 0x451   :  { %v3555_v30 = vsel %vm200_vm4, %v3554_v9, %v4647_v54  ;;  %v3562_v57 = vsel %vm200_vm4, %v3561_v48, %v4648_v0  ;;  %v4638_v44 = vunpack.i.h.bf16 %v4636_v31  ;;  %v4637_v11 = vunpack.i.l.bf16 %v4636_v31  ;;  %v8109_v54 = vld [vmem:[#allocation29_spill] sm:$0xff] }
 0x452   :  { %v8108_v31 = vpack.i.bf16 %v7260_v22, %v7242_v14 }
 0x456   :  { %4770 = vrot.lane.b32.xlu0 %v4769_v41, %s4849_s28  ;;  %v4621_v10 = vpop.permute.xlu0 %4620  ;;  %v8103_v41 = vld [vmem:[#allocation33_spill] sm:$0xff] }
 0x457   :  { %v4623_v52 = vunpack.i.h.bf16 %v4621_v10  ;;  %v4622_v47 = vunpack.i.l.bf16 %v4621_v10  ;;  %v4651_v6 = vpop.permute.xlu1 %4650  ;;  %v8104_v59 = vpack.i.bf16 %v8102_v42, %v8103_v41 }
 0x458   :  { %4765 = vrot.lane.b32.xlu2 %v4764_v62, %s4847_s26  ;;  %v3712_v2 = vpop.permute.xlu2 %3711  ;;  %v4653_v9 = vunpack.i.h.bf16 %v4651_v6  ;;  %v4652_v48 = vunpack.i.l.bf16 %v4651_v6 }
 0x459   :  { %v3155_v5 = vsel %vm194_vm1, %v8100_v27, %v4623_v52  ;;  %v3148_v60 = vsel %vm194_vm1, %v8101_v24, %v4622_v47 }
 0x45a   :  { %v3149_v7 = vsel %vm196_vm2, %v3148_v60, %v4637_v11  ;;  %v3156_v43 = vsel %vm196_vm2, %v3155_v5, %v4638_v44  ;;  %v2735_v40 = vsel %vm194_vm1, %v8109_v54, %v4653_v9 }
 0x45e   :  { %4785 = vrot.lane.b32.xlu0 %v4784_v23, %s4844_s11  ;;  %v3708_v18 = vpop.permute.xlu0 %3707  ;;  %v4628_v23 = vunpack.i.h.bf16 %v7510_v46  ;;  %v3338_v46 = vsel %vm194_vm1, %v8107_v51, %v4627_v32 }
 0x45f   :  { %v3759_v50 = vsel %vm196_vm2, %v3758_v3, %v3708_v18  ;;  %v4666_v13 = vpop.permute.xlu1 %4665 }
 0x460   :  { %4780 = vrot.lane.b32.xlu2 %v8104_v59, %s4842_s5  ;;  %v7607_v58 = vsel %vm198_vm3, %v3759_v50, %v3712_v2  ;;  %v4668_v1 = vunpack.i.h.bf16 %v4666_v13  ;;  %v4667_v12 = vunpack.i.l.bf16 %v4666_v13  ;;  %v3345_v4 = vsel %vm194_vm1, %v8106_v33, %v4628_v23 }
 0x462   :  { %v7604_v56 = vpop.permute.xlu2 %4655 }
 0x466   :  { %4800 = vrot.lane.b32.xlu0 %v4799_v35, %s4849_s28  ;;  %v4641_v39 = vpop.permute.xlu0 %4640 }
 0x467   :  { %v4643_v63 = vunpack.i.h.bf16 %v4641_v39  ;;  %v4642_v49 = vunpack.i.l.bf16 %v4641_v39  ;;  %v7616_v37 = vpop.permute.xlu1 %3743 }
 0x468   :  { %4795 = vrot.lane.b32.xlu2 %v4794_v19, %s4847_s26 }
 0x469   :  { %v3346_v17 = vsel %vm196_vm2, %v3345_v4, %v4643_v63  ;;  %v3339_v45 = vsel %vm196_vm2, %v3338_v46, %v4642_v49 }
 0x46a   :  { %v4671_v61 = vpop.permute.xlu2 %4670  ;;  %v7631_v25 = vsel %vm198_vm3, %v3339_v45, %v4667_v12  ;;  %v7634_v36 = vsel %vm198_vm3, %v3346_v17, %v4668_v1 }
 0x46b   :  { %v4673_v35 = vunpack.i.h.bf16 %v4671_v61  ;;  %v4672_v16 = vunpack.i.l.bf16 %v4671_v61 }
 0x46d   :  { %v7625_v15 = vsel %vm202_vm5, %v3555_v30, %v4672_v16  ;;  %v7628_v19 = vsel %vm202_vm5, %v3562_v57, %v4673_v35  ;;  %v2728_v30 = vsel %vm194_vm1, %v8110_v21, %v4652_v48 }
 0x46e   :  { %4815 = vrot.lane.b32.xlu0 %v4814_v55, %s4849_s28  ;;  %v3740_v0 = vpop.permute.xlu0 %3739 }
 0x46f   :  { %v4686_v62 = vpop.permute.xlu1 %4685  ;;  %v3767_v9 = vsel %vm198_vm3, %v7548_v34, %v3740_v0 }
 0x470   :  { %4810 = vrot.lane.b32.xlu2 %v8108_v31, %s4844_s11  ;;  %v4688_v6 = vunpack.i.h.bf16 %v4686_v62  ;;  %v4687_v44 = vunpack.i.l.bf16 %v4686_v62 }
 0x472   :  { %v4676_v57 = vpop.permute.xlu2 %4675 }
 0x473   :  { %v4678_v10 = vunpack.i.h.bf16 %v4676_v57  ;;  %v4677_v52 = vunpack.i.l.bf16 %v4676_v57 }
 0x475   :  { %v2736_v47 = vsel %vm196_vm2, %v2735_v40, %v4678_v10  ;;  %v2729_v38 = vsel %vm196_vm2, %v2728_v30, %v4677_v52 }
 0x478   :  { %v4661_v28 = vpop.permute.xlu0 %4660 }
 0x479   :  { %v4663_v55 = vunpack.i.h.bf16 %v4661_v28  ;;  %v4662_v2 = vunpack.i.l.bf16 %v4661_v28  ;;  %v3720_v22 = vpop.permute.xlu1 %3719 }
 0x47a   :  { %v7650_v14 = vpop.permute.xlu2 %4690 }
 0x47b   :  { %v3150_v11 = vsel %vm198_vm3, %v3149_v7, %v4662_v2  ;;  %v3157_v27 = vsel %vm198_vm3, %v3156_v43, %v4663_v55  ;;  %v4692_v28 = vunpack.i.l.bf16 %v7650_v14 }
 0x47c   :  { %v7655_v5 = vsel %vm200_vm4, %v3150_v11, %v4687_v44  ;;  %v7658_v24 = vsel %vm200_vm4, %v3157_v27, %v4688_v6 }
 0x480   :  { %v3716_v60 = vpop.permute.xlu0 %3715 }
 0x481   :  { %v4706_v41 = vpop.permute.xlu1 %4705 }
 0x482   :  { %v3748_v42 = vpop.permute.xlu2 %3747  ;;  %v4708_v59 = vunpack.i.h.bf16 %v4706_v41  ;;  %v4707_v20 = vunpack.i.l.bf16 %v4706_v41 }
 0x484   :  { %v7661_v3 = vsel %vm198_vm3, %v2729_v38, %v4707_v20  ;;  %v7664_v18 = vsel %vm198_vm3, %v2736_v47, %v4708_v59  ;;  %v4693_v38 = vunpack.i.h.bf16 %v7650_v14  ;;  %v3341_v14 = vsel %vm200_vm4, %v7631_v25, %v4692_v28 }
 0x486   :  { %v3348_v41 = vsel %vm200_vm4, %v7634_v36, %v4693_v38  ;;  %v7751_v38 = vld [vmem:[%s7845_s1] sm:$0xff] }
 0x487   :  { %4012 = vmatmul.msk.f32.vlgmr.msra.gmra.mxu0 %vm1889_vm9, %v7751_v38  ;;  %4014 = vmatmul.msk.f32.vlgmr.msra.gmra.mxu1 %vm1889_vm9, %v7751_v38 }
 0x488   :  { %v7666_v7 = vpop.permute.xlu0 %4680 }
 0x489   :  { %v4721_v50 = vpop.permute.xlu1 %4720 }
 0x48a   :  { %v7668_v43 = vpop.permute.xlu2 %4710  ;;  %v4722_v6 = vunpack.i.l.bf16 %v4721_v50 }
 0x48c   :  { %v3342_v20 = vsel %vm202_vm5, %v3341_v14, %v4722_v6 }
 0x490   :  { %v4696_v13 = vpop.permute.xlu0 %4695 }
 0x491   :  { %v3752_v32 = vpop.permute.xlu1 %3751  ;;  %v4697_v62 = vunpack.i.l.bf16 %v4696_v13 }
 0x492   :  { %v4726_v23 = vpop.permute.xlu2 %4725 }
 0x493   :  { %v4728_v52 = vunpack.i.h.bf16 %v4726_v23  ;;  %v4727_v47 = vunpack.i.l.bf16 %v4726_v23  ;;  %v3557_v55 = vsel %vm204_vm6, %v7625_v15, %v4697_v62 }
 0x498   :  { %v4701_v1 = vpop.permute.xlu0 %4700 }
 0x499   :  { %v4703_v12 = vunpack.i.h.bf16 %v4701_v1  ;;  %v4702_v39 = vunpack.i.l.bf16 %v4701_v1  ;;  %v7670_v49 = vpop.permute.xlu1 %4740 }
 0x49a   :  { %v4731_v63 = vpop.permute.xlu2 %4730 }
 0x49b   :  { %v4733_v61 = vunpack.i.h.bf16 %v4731_v63  ;;  %v4732_v33 = vunpack.i.l.bf16 %v4731_v63  ;;  %v2545_v4 = vsel %vm194_vm1, %v7416_v8, %v4703_v12  ;;  %v2538_v51 = vsel %vm194_vm1, %v7412_v53, %v4702_v39 }
 0x49c   :  { %v3761_v8 = vsel %vm200_vm4, %v7607_v58, %v3716_v60  ;;  %v3768_v53 = vsel %vm200_vm4, %v3767_v9, %v7616_v37  ;;  %v4698_v37 = vunpack.i.h.bf16 %v4696_v13  ;;  %v3558_v60 = vsel %vm206_vm7, %v3557_v55, %v4727_v47 }
 0x49d   :  { %v7677_v46 = vsel %vm196_vm2, %v2538_v51, %v4732_v33  ;;  %v7680_v35 = vsel %vm196_vm2, %v2545_v4, %v4733_v61  ;;  %v3769_v48 = vsel %vm202_vm5, %v3768_v53, %v3748_v42  ;;  %v3762_v31 = vsel %vm202_vm5, %v3761_v8, %v3720_v22  ;;  %v8111_v53 = vld [vmem:[#allocation30_spill] sm:$0xff] }
 0x49e   :  { %v3770_v40 = vsel %vm204_vm6, %v3769_v48, %v3752_v32  ;;  %v3564_v2 = vsel %vm204_vm6, %v7628_v19, %v4698_v37  ;;  %v4723_v22 = vunpack.i.h.bf16 %v4721_v50  ;;  %v3792_v13 = vrot.slane %v3558_v60, 4 }
 0x49f   :  { %v3565_v42 = vsel %vm206_vm7, %v3564_v2, %v4728_v52  ;;  %v4658_v61 = vunpack.i.h.bf16 %v7604_v56  ;;  %v4657_v33 = vunpack.i.l.bf16 %v7604_v56  ;;  %v4683_v51 = vunpack.i.h.bf16 %v7666_v7 }
 0x4a0   :  { %v7682_v16 = vpop.permute.xlu0 %4715  ;;  %v3349_v19 = vsel %vm202_vm5, %v3348_v41, %v4723_v22  ;;  %v3793_v32 = vrot.slane %v3565_v42, 4  ;;  %v4712_v56 = vunpack.i.l.bf16 %v7668_v43 }
 0x4a1   :  { %v3728_v45 = vpop.permute.xlu1 %3727  ;;  %v4718_v9 = vunpack.i.h.bf16 %v7682_v16  ;;  %v4717_v8 = vunpack.i.l.bf16 %v7682_v16  ;;  %v2949_v48 = vsel %vm194_vm1, %v8111_v53, %v4658_v61 }
 0x4a2   :  { %v7684_v17 = vpop.permute.xlu2 %4745 }
 0x4a3   :  { %v3159_v16 = vsel %vm202_vm5, %v7658_v24, %v4718_v9  ;;  %v4747_v37 = vunpack.i.l.bf16 %v7684_v17 }
 0x4a8   :  { %v3724_v54 = vpop.permute.xlu0 %3723 }
 0x4a9   :  { %v3763_v21 = vsel %vm204_vm6, %v3762_v31, %v3724_v54  ;;  %v7696_v57 = vpop.permute.xlu1 %4760  ;;  %v8112_v31 = vld [vmem:[#allocation12_spill] sm:$0xff] }
 0x4aa   :  { %v3756_v30 = vpop.permute.xlu2 %3755  ;;  %v3764_v34 = vsel %vm206_vm7, %v3763_v21, %v3728_v45  ;;  %v4682_v45 = vunpack.i.l.bf16 %v7666_v7  ;;  %v2942_v54 = vsel %vm194_vm1, %v8112_v31, %v4657_v33  ;;  %v4743_v7 = vunpack.i.h.bf16 %v7670_v49 }
 0x4ab   :  { %v3771_v0 = vsel %vm206_vm7, %v3770_v40, %v3756_v30  ;;  %4039 = vmatpush.msk.msra.mxu2 %vm1879_vm8, %v3764_v34  ;;  %v4713_v40 = vunpack.i.h.bf16 %v7668_v43  ;;  %v2950_v30 = vsel %vm196_vm2, %v2949_v48, %v4683_v51  ;;  %v4742_v34 = vunpack.i.l.bf16 %v7670_v49 }
 0x4ac   :  { %4041 = vmatpush.msk.msra.mxu3 %vm1879_vm8, %v3771_v0  ;;  %v2943_v21 = vsel %vm196_vm2, %v2942_v54, %v4682_v45  ;;  %v4748_v0 = vunpack.i.h.bf16 %v7684_v17  ;;  %v4763_v33 = vunpack.i.h.bf16 %v7696_v57  ;;  %v4762_v51 = vunpack.i.l.bf16 %v7696_v57 }
 0x4ad   :  { %v2944_v49 = vsel %vm198_vm3, %v2943_v21, %v4712_v56  ;;  %v2951_v24 = vsel %vm198_vm3, %v2950_v30, %v4713_v40 }
 0x4ae   :  { %v3160_v60 = vsel %vm204_vm6, %v3159_v16, %v4748_v0 }
 0x4b0   :  { %v7702_v58 = vpop.permute.xlu0 %4735 }
 0x4b1   :  { %v4776_v10 = vpop.permute.xlu1 %4775 }
 0x4b2   :  { %v4778_v44 = vunpack.i.h.bf16 %v4776_v10  ;;  %v4777_v11 = vunpack.i.l.bf16 %v4776_v10  ;;  %v4766_v39 = vpop.permute.xlu2 %4765  ;;  %v3152_v10 = vsel %vm202_vm5, %v7655_v5, %v4717_v8 }
 0x4b3   :  { %v4768_v43 = vunpack.i.h.bf16 %v4766_v39  ;;  %v4767_v52 = vunpack.i.l.bf16 %v4766_v39  ;;  %v4738_v39 = vunpack.i.h.bf16 %v7702_v58 }
 0x4b5   :  { %v2738_v9 = vsel %vm200_vm4, %v7664_v18, %v4738_v39 }
 0x4b6   :  { %v2739_v18 = vsel %vm202_vm5, %v2738_v9, %v4763_v33 }
 0x4b8   :  { %v4751_v27 = vpop.permute.xlu0 %4750 }
 0x4b9   :  { %v4753_v59 = vunpack.i.h.bf16 %v4751_v27  ;;  %v4752_v15 = vunpack.i.l.bf16 %v4751_v27  ;;  %v4791_v1 = vpop.permute.xlu1 %4790  ;;  %v3153_v27 = vsel %vm204_vm6, %v3152_v10, %v4747_v37 }
 0x4ba   :  { %v4781_v47 = vpop.permute.xlu2 %4780  ;;  %v4793_v28 = vunpack.i.h.bf16 %v4791_v1  ;;  %v4792_v55 = vunpack.i.l.bf16 %v4791_v1 }
 0x4bb   :  { %v3343_v50 = vsel %vm204_vm6, %v3342_v20, %v4752_v15  ;;  %v3350_v23 = vsel %vm204_vm6, %v3349_v19, %v4753_v59  ;;  %v4782_v54 = vunpack.i.l.bf16 %v4781_v47 }
 0x4bc   :  { %v3344_v12 = vsel %vm206_vm7, %v3343_v50, %v4777_v11  ;;  %v3351_v36 = vsel %vm206_vm7, %v3350_v23, %v4778_v44  ;;  %v2945_v44 = vsel %vm200_vm4, %v2944_v49, %v4742_v34  ;;  %v2952_v11 = vsel %vm200_vm4, %v2951_v24, %v4743_v7 }
 0x4bd   :  { %v3802_v25 = vsel %vm1879_vm8, %v3344_v12, %v3792_v13  ;;  %v3803_v63 = vsel %vm1879_vm8, %v3351_v36, %v3793_v32  ;;  %v2953_v42 = vsel %vm202_vm5, %v2952_v11, %v4768_v43  ;;  %v2946_v41 = vsel %vm202_vm5, %v2945_v44, %v4767_v52 }
 0x4be   :  { %3826 = vmatpush.msra.mxu2 %v3802_v25  ;;  %3846 = vmatpush.msra.mxu3 %v3803_v63  ;;  %v2947_v15 = vsel %vm204_vm6, %v2946_v41, %v4792_v55  ;;  %v2954_v19 = vsel %vm204_vm6, %v2953_v42, %v4793_v28  ;;  %v4737_v25 = vunpack.i.l.bf16 %v7702_v58 }
 0x4c0   :  { %v7726_v4 = vpop.permute.xlu0 %4755  ;;  %v2731_v8 = vsel %vm200_vm4, %v7661_v3, %v4737_v25 }
 0x4c1   :  { %v4806_v62 = vpop.permute.xlu1 %4805  ;;  %v4758_v63 = vunpack.i.h.bf16 %v7726_v4  ;;  %v4757_v61 = vunpack.i.l.bf16 %v7726_v4  ;;  %v4783_v4 = vunpack.i.h.bf16 %v4781_v47  ;;  %v2732_v21 = vsel %vm202_vm5, %v2731_v8, %v4762_v51 }
 0x4c2   :  { %v4808_v5 = vunpack.i.h.bf16 %v4806_v62  ;;  %v4807_v2 = vunpack.i.l.bf16 %v4806_v62  ;;  %v4796_v36 = vpop.permute.xlu2 %4795 }
 0x4c3   :  { %v2540_v53 = vsel %vm198_vm3, %v7677_v46, %v4757_v61  ;;  %v2547_v58 = vsel %vm198_vm3, %v7680_v35, %v4758_v63  ;;  %v4798_v30 = vunpack.i.h.bf16 %v4796_v36  ;;  %v4797_v7 = vunpack.i.l.bf16 %v4796_v36 }
 0x4c4   :  { %v2948_v13 = vsel %vm206_vm7, %v2947_v15, %v4807_v2  ;;  %v2955_v23 = vsel %vm206_vm7, %v2954_v19, %v4808_v5  ;;  %v2541_v3 = vsel %vm200_vm4, %v2540_v53, %v4782_v54  ;;  %v2548_v46 = vsel %vm200_vm4, %v2547_v58, %v4783_v4  ;;  %v3902_v54 = vld [vmem:[%s7847_s3] sm:$0xff] }
 0x4c5   :  { %v2542_v43 = vsel %vm202_vm5, %v2541_v3, %v4797_v7  ;;  %v2549_v52 = vsel %vm202_vm5, %v2548_v46, %v4798_v30  ;;  %v4851_v36 = vmov 0  }
 0x4c6   :  { %4819 = vset.pattern.permute.xlu1 %v4851_v36  ;;  %4820 = vset.pattern.permute.xlu2 %v4851_v36 }
 0x4c7   :  { %4821 = vset.pattern.permute.xlu0 %v4851_v36 }
 0x4c8   :  { %v4771_v17 = vpop.permute.xlu0 %4770 }
 0x4c9   :  { %v4773_v22 = vunpack.i.h.bf16 %v4771_v17  ;;  %v4772_v6 = vunpack.i.l.bf16 %v4771_v17 }
 0x4ca   :  { %v4811_v40 = vpop.permute.xlu2 %4810 }
 0x4cb   :  { %v3154_v14 = vsel %vm206_vm7, %v3153_v27, %v4772_v6  ;;  %v3161_v59 = vsel %vm206_vm7, %v3160_v60, %v4773_v22  ;;  %v4813_v34 = vunpack.i.h.bf16 %v4811_v40  ;;  %v4812_v16 = vunpack.i.l.bf16 %v4811_v40 }
 0x4cc   :  { %v3786_v20 = vrot.slane %v3154_v14, 4  ;;  %v3787_v50 = vrot.slane %v3161_v59, 4 }
 0x4cd   :  { %v2543_v24 = vsel %vm204_vm6, %v2542_v43, %v4812_v16  ;;  %v2550_v55 = vsel %vm204_vm6, %v2549_v52, %v4813_v34 }
 0x4ce   :  { %v3800_v32 = vsel %vm1879_vm8, %v2948_v13, %v3786_v20  ;;  %v3801_v1 = vsel %vm1879_vm8, %v2955_v23, %v3787_v50 }
 0x4cf   :  { %3827 = vmatpush.msra.mxu2 %v3800_v32  ;;  %3847 = vmatpush.msra.mxu3 %v3801_v1 }
 0x4d0   :  { %v4786_v12 = vpop.permute.xlu0 %4785 }
 0x4d1   :  { %v4788_v48 = vunpack.i.h.bf16 %v4786_v12  ;;  %v4787_v31 = vunpack.i.l.bf16 %v4786_v12 }
 0x4d3   :  { %v2733_v35 = vsel %vm204_vm6, %v2732_v21, %v4787_v31  ;;  %v2740_v0 = vsel %vm204_vm6, %v2739_v18, %v4788_v48  ;;  %v3889_v48 = vld [vmem:[%s7846_s2] sm:$0xff] }
 0x4d8   :  { %v4801_v45 = vpop.permute.xlu0 %4800 }
 0x4d9   :  { %v4803_v56 = vunpack.i.h.bf16 %v4801_v45  ;;  %v4802_v57 = vunpack.i.l.bf16 %v4801_v45 }
 0x4db   :  { %v2734_v37 = vsel %vm206_vm7, %v2733_v35, %v4802_v57  ;;  %v2741_v62 = vsel %vm206_vm7, %v2740_v0, %v4803_v56 }
 0x4dc   :  { %v3780_v28 = vrot.slane %v2734_v37, 4  ;;  %v3781_v17 = vrot.slane %v2741_v62, 4 }
 0x4e0   :  { %v4816_v10 = vpop.permute.xlu0 %4815 }
 0x4e1   :  { %v4818_v47 = vunpack.i.h.bf16 %v4816_v10  ;;  %v4817_v49 = vunpack.i.l.bf16 %v4816_v10 }
 0x4e3   :  { %v2544_v5 = vsel %vm206_vm7, %v2543_v24, %v4817_v49  ;;  %v2551_v2 = vsel %vm206_vm7, %v2550_v55, %v4818_v47 }
 0x4e4   :  { %v3798_v22 = vsel %vm1879_vm8, %v2544_v5, %v3780_v28  ;;  %v3799_v6 = vsel %vm1879_vm8, %v2551_v2, %v3781_v17 }
 0x4e5   :  { %3828 = vmatpush.msra.mxu2 %v3798_v22  ;;  %3848 = vmatpush.msra.mxu3 %v3799_v6 }
 0x4e7   :  { %3829 = vmatpush.msra.mxu2 %v7279_v29  ;;  %3849 = vmatpush.msra.mxu3 %v7283_v26 }
 0x4e8   :  { %4040 = vmatmul.msk.f32.vlgmr.msra.gmra.mxu2 %vm1889_vm9, %v7751_v38  ;;  %4042 = vmatmul.msk.f32.vlgmr.msra.gmra.mxu3 %vm1889_vm9, %v7751_v38 }
 0x504   :  { %v1916_v44 = vpop.f32.mrf.mxu0  ;;  %v1936_v11 = vpop.f32.mrf.mxu1 }
 0x505   :  { %v3865_v27 = vadd.f32 %v1936_v11, %v1916_v44 }
 0x507   :  { %3866 = vadd.xlane.f32.xlu1 %v3865_v27 }
 0x56b   :  { %v3831_v60 = vpop.f32.mrf.mxu2  ;;  %v3851_v42 = vpop.f32.mrf.mxu3 }
 0x56c   :  { %v3868_v41 = vadd.f32 %v3851_v42, %v3831_v60 }
 0x56e   :  { %3869 = vadd.xlane.f32.xlu2 %v3868_v41 }
 0x57a   :  { %v3867_v14 = vpop.xlane.xlu1 %3866 }
 0x5e1   :  { %v3870_v59 = vpop.xlane.xlu2 %3869 }
 0x5e2   :  { %v3871_v15 = vadd.f32 %v3870_v59, %v3867_v14 }
 0x5e4   :  { %v3872_v29 = vmul.f32 0.001953125, %v3871_v15 }
 0x5e6   :  { %v3875_v20 = vsub.f32 %v3831_v60, %v3872_v29  ;;  %v3876_v26 = vsub.f32 %v3851_v42, %v3872_v29  ;;  %v3873_v19 = vsub.f32 %v1916_v44, %v3872_v29  ;;  %v3874_v50 = vsub.f32 %v1936_v11, %v3872_v29 }
 0x5e8   :  { %v3879_v13 = vmul.f32 %v3875_v20, %v3875_v20  ;;  %v3880_v23 = vmul.f32 %v3876_v26, %v3876_v26  ;;  %v3877_v32 = vmul.f32 %v3873_v19, %v3873_v19  ;;  %v3878_v38 = vmul.f32 %v3874_v50, %v3874_v50 }
 0x5ea   :  { %v3884_v1 = vadd.f32 %v3880_v23, %v3879_v13  ;;  %v3881_v12 = vadd.f32 %v3878_v38, %v3877_v32 }
 0x5ec   :  { %3885 = vadd.xlane.f32.xlu2 %v3884_v1  ;;  %3882 = vadd.xlane.f32.xlu0 %v3881_v12 }
 0x65f   :  { %v3886_v39 = vpop.xlane.xlu2 %3885  ;;  %v3883_v25 = vpop.xlane.xlu0 %3882 }
 0x660   :  { %v3887_v63 = vadd.f32 %v3886_v39, %v3883_v25 }
 0x662   :  { %v3888_v61 = vmul.f32 0.001953125, %v3887_v63 }
 0x664   :  { %v3890_v33 = vadd.f32 1e-05, %v3888_v61 }
 0x666   :  { %4822 = vrsqrt.f32 %v3890_v33  ;;  %vm3897_vm11 = vweird.f32 %v3890_v33 }
 0x66c   :  { %v4823_v51 = vpop.eup %4822 }
 0x66d   :  { %v3892_v45 = vmul.f32 %v4823_v51, %v3890_v33  ;;  %vm3898_vm10 = vweird.f32 %v4823_v51 }
 0x66e   :  { %vm3899_vm12 = vmor %vm3897_vm11, %vm3898_vm10 }
 0x66f   :  { %v3893_v9 = vmul.f32 %v4823_v51, %v3892_v45 }
 0x671   :  { %v3894_v8 = vmul.f32 0.5, %v3893_v9 }
 0x673   :  { %v3895_v53 = vsub.f32 1.5, %v3894_v8 }
 0x675   :  { %v3896_v58 = vmul.f32 %v4823_v51, %v3895_v53 }
 0x677   :  { %v3900_v31 = vsel %vm3899_vm12, %v4823_v51, %v3896_v58 }
 0x678   :  { %v3901_v4 = vmul.f32 %v3900_v31, %v3889_v48 }
 0x67a   :  { %3907 = vperm.xlu1 %4819, %v3901_v4   ;;  %v3903_v40 = vmul.f32 %v3901_v4, %v3872_v29 }
 0x67c   :  { %v3904_v56 = vsub.f32 %v3902_v54, %v3903_v40 }
 0x67e   :  { %3916 = vperm.xlu2 %4820, %v3904_v56  }
 0x6d8   :  { %v3917_v3 = vpop.permute.xlu2 %3916 }
 0x6ec   :  { %v3908_v57 = vpop.permute.xlu1 %3907 }
 0x6ed   :  { %v3910_v21 = vmul.f32 %v3908_v57, %v1916_v44  ;;  %v3911_v18 = vmul.f32 %v3908_v57, %v1936_v11  ;;  %v3912_v30 = vmul.f32 %v3908_v57, %v3831_v60  ;;  %v3913_v7 = vmul.f32 %v3908_v57, %v3851_v42 }
 0x6ef   :  { %v3919_v46 = vadd.f32 %v3917_v3, %v3910_v21  ;;  %v3920_v34 = vadd.f32 %v3917_v3, %v3911_v18  ;;  %v3921_v16 = vadd.f32 %v3917_v3, %v3912_v30  ;;  %v3922_v35 = vadd.f32 %v3917_v3, %v3913_v7 }
 0x6f1   :  { %v4043_v0 = vmul.f32 -1.442695, %v3919_v46  ;;  %v4044_v37 = vmul.f32 -1.442695, %v3920_v34  ;;  %v4045_v62 = vmul.f32 -1.442695, %v3921_v16 }
 0x6f2   :  { %v4046_v10 = vmul.f32 -1.442695, %v3922_v35 }
 0x6f3   :  { %4824 = vpow2.f32 %v4043_v0 }
 0x6f4   :  { %4826 = vpow2.f32 %v4044_v37 }
 0x6f5   :  { %4828 = vpow2.f32 %v4045_v62 }
 0x6f6   :  { %4830 = vpow2.f32 %v4046_v10 }
 0x6f9   :  { %v4825_v43 = vpop.eup %4824 }
 0x6fa   :  { %v4827_v52 = vpop.eup %4826  ;;  %v3935_v47 = vadd.f32 1.0, %v4825_v43 }
 0x6fb   :  { %v4829_v49 = vpop.eup %4828  ;;  %v3936_v24 = vadd.f32 1.0, %v4827_v52 }
 0x6fc   :  { %v4831_v28 = vpop.eup %4830  ;;  %v3937_v55 = vadd.f32 1.0, %v4829_v49  ;;  %4832 = vrcp.f32 %v3935_v47  ;;  %v3948_v5 = vand.u32 2147483647, %v3935_v47  ;;  %v3950_v2 = vand.u32 2147483648, %v3935_v47 }
 0x6fd   :  { %v3938_v17 = vadd.f32 1.0, %v4831_v28  ;;  %4834 = vrcp.f32 %v3936_v24  ;;  %vm3944_vm13 = vweird.f32 %v3935_v47  ;;  %vm3959_vm14 = vweird.f32 %v3936_v24 }
 0x6fe   :  { %4836 = vrcp.f32 %v3937_v55  ;;  %v3963_v60 = vand.u32 2147483647, %v3936_v24  ;;  %v3965_v42 = vand.u32 2147483648, %v3936_v24  ;;  %vm7815_vm15 = vcmp.eq.f32.partialorder %v3948_v5, 8.507059e+37 }
 0x6ff   :  { %4838 = vrcp.f32 %v3938_v17  ;;  %v3951_v59 = vor.u32 1.1754944e-38, %v3950_v2  ;;  %vm3974_vm0 = vweird.f32 %v3937_v55  ;;  %v3978_v26 = vand.u32 2147483647, %v3937_v55 }
 0x700   :  { %v3980_v19 = vand.u32 2147483648, %v3937_v55  ;;  %vm7819_vm3 = vcmp.eq.f32.partialorder %v3963_v60, 8.507059e+37  ;;  %v3966_v1 = vor.u32 1.1754944e-38, %v3965_v42  ;;  %vm3989_vm6 = vweird.f32 %v3938_v17 }
 0x701   :  { %v3993_v63 = vand.u32 2147483647, %v3938_v17  ;;  %v3995_v61 = vand.u32 2147483648, %v3938_v17  ;;  %vm3979_vm10 = vcmp.eq.f32.partialorder %v3978_v26, 8.507059e+37 }
 0x702   :  { %v4833_v22 = vpop.eup %4832  ;;  %v3981_v53 = vor.u32 1.1754944e-38, %v3980_v19 }
 0x703   :  { %v4835_v6 = vpop.eup %4834  ;;  %v3940_v44 = vmul.f32 %v4833_v22, %v3935_v47  ;;  %vm3945_vm1 = vweird.f32 %v4833_v22  ;;  %v3996_v40 = vor.u32 1.1754944e-38, %v3995_v61  ;;  %vm3994_vm12 = vcmp.eq.f32.partialorder %v3993_v63, 8.507059e+37 }
 0x704   :  { %v4837_v11 = vpop.eup %4836  ;;  %v3955_v27 = vmul.f32 %v4835_v6, %v3936_v24  ;;  %vm3960_vm2 = vweird.f32 %v4835_v6  ;;  %vm3946_vm5 = vmor %vm3944_vm13, %vm3945_vm1 }
 0x705   :  { %v3941_v41 = vsub.f32 1.0, %v3940_v44  ;;  %v3970_v15 = vmul.f32 %v4837_v11, %v3937_v55  ;;  %v4839_v29 = vpop.eup %4838  ;;  %vm3975_vm4 = vweird.f32 %v4837_v11  ;;  %vm3961_vm7 = vmor %vm3959_vm14, %vm3960_vm2 }
 0x706   :  { %v3956_v20 = vsub.f32 1.0, %v3955_v27  ;;  %v3985_v23 = vmul.f32 %v4839_v29, %v3938_v17  ;;  %vm3990_vm8 = vweird.f32 %v4839_v29  ;;  %vm3976_vm9 = vmor %vm3974_vm0, %vm3975_vm4 }
 0x707   :  { %v3942_v50 = vmul.f32 %v4833_v22, %v3941_v41  ;;  %v3971_v13 = vsub.f32 1.0, %v3970_v15  ;;  %vm3991_vm11 = vmor %vm3989_vm6, %vm3990_vm8 }
 0x708   :  { %v3957_v32 = vmul.f32 %v4835_v6, %v3956_v20  ;;  %v3986_v39 = vsub.f32 1.0, %v3985_v23 }
 0x709   :  { %v3943_v12 = vadd.f32 %v4833_v22, %v3942_v50  ;;  %v3972_v36 = vmul.f32 %v4837_v11, %v3971_v13 }
 0x70a   :  { %v3958_v25 = vadd.f32 %v4835_v6, %v3957_v32  ;;  %v3987_v45 = vmul.f32 %v4839_v29, %v3986_v39 }
 0x70b   :  { %v3947_v33 = vsel %vm3946_vm5, %v4833_v22, %v3943_v12  ;;  %v3973_v51 = vadd.f32 %v4837_v11, %v3972_v36 }
 0x70c   :  { %v3952_v9 = vsel %vm7815_vm15, %v3951_v59, %v3947_v33  ;;  %v3962_v8 = vsel %vm3961_vm7, %v4835_v6, %v3958_v25  ;;  %v3988_v31 = vadd.f32 %v4839_v29, %v3987_v45 }
 0x70d   :  { %v3967_v58 = vsel %vm7819_vm3, %v3966_v1, %v3962_v8  ;;  %v3977_v48 = vsel %vm3976_vm9, %v4837_v11, %v3973_v51  ;;  %v3999_v4 = vmul.f32 0.3, %v3952_v9 }
 0x70e   :  { %v3982_v54 = vsel %vm3979_vm10, %v3981_v53, %v3977_v48  ;;  %v4000_v56 = vmul.f32 0.3, %v3967_v58  ;;  %v3992_v57 = vsel %vm3991_vm11, %v4839_v29, %v3988_v31 }
 0x70f   :  { %v4001_v21 = vmul.f32 0.3, %v3982_v54  ;;  %4003 = vst [vmem:[%s7848_s4] sm:$0xff] %v3999_v4  ;;  %v3997_v18 = vsel %vm3994_vm12, %v3996_v40, %v3992_v57 }
 0x710   :  { %4004 = vst [vmem:[%s7848_s4 + $0x8] sm:$0xff] %v4000_v56  ;;  %v4002_v30 = vmul.f32 0.3, %v3997_v18 }
 0x711   :  { %4005 = vst [vmem:[%s7848_s4 + $0x10] sm:$0xff] %v4001_v21 }
 0x712   :  { %4006 = vst [vmem:[%s7848_s4 + $0x18] sm:$0xff] %v4002_v30 }

</bundles_post_ra>
